<compile_context>
chip_gen: v6e
topology: v6e:2x2x1
jax: 0.10.0
libtpu: 0.0.40
codegen_flags: <defaults>
</compile_context>

<pallas_src>
import numpy as np
import jax
import jax.numpy as jnp
from jax import lax
from jax.experimental import pallas as pl
from jax.experimental.pallas import tpu as pltpu

LAYER_SIZES = [300, 300, 256, 256, 128, 128, 64, 64, 32, 32, 16, 8, 4, 2, 1]
NUM_LAYERS = len(LAYER_SIZES) - 1  # 14 Linear layers
BN_EPS = 1e-5
LEAKY_SLOPE = 0.01  # torch.nn.LeakyReLU default negative_slope


def _round_up(n, m):
    return ((n + m - 1) // m) * m


def _pad_dim(d):
    # Lane-clean padding for "wide" feature dims; tiny tail dims stay as-is
    # (their BlockSpecs use the full array shape, which is always legal).
    return _round_up(d, 128) if d >= 128 else d


PADDED_SIZES = [_pad_dim(d) for d in LAYER_SIZES]  # [384,384,256,256,128,...,2,1]

# Packed-bias layout: each layer's (padded) output width, rounded up to 8 sublanes so
# every static slice start is 8-aligned.
BIAS_OFFSETS = []
_off = 0
for _i in range(NUM_LAYERS):
    BIAS_OFFSETS.append(_off)
    _off += _round_up(PADDED_SIZES[_i + 1], 8)
BIAS_TOTAL = _off  # 1392


def _choose_tile(batch):
    # 128-lane minimum keeps every intermediate / output store lane-dense.
    b128 = _round_up(max(batch, 1), 128)
    if b128 <= 256:
        return int(b128)  # single small tile
    # Large batches: amortize the ~0.35us per-grid-step overhead with a big tile, but
    # keep n_tiles >= 2 so v7x's two TensorCores both get a share of the "parallel"
    # batch axis.  Cap at 2048 so the double-buffered bf16 input tile plus f32
    # intermediates stay comfortably inside the explicit 32 MiB scoped-VMEM budget.
    half = _round_up(-(-b128 // 2), 128)
    return int(min(2048, max(256, half)))


def mlp_kernel(*refs):
    """refs = (x_ref, w_0..w_13, b_ref, o_ref); everything lives in VMEM.

    x_ref: (TILE_B, 384) bf16  -- natural batch-major input tile (already padded)
    w_i:   (out_i, in_i) bf16  -- PyTorch (out, in) orientation, BN folded, padded
    b_ref: (1392, 1)     f32   -- all biases packed, 8-aligned segments
    o_ref: (1, TILE_B)   f32   -- lane-dense output slab
    """
    x_ref = refs[0]
    w_refs = refs[1:1 + NUM_LAYERS]
    b_ref = refs[1 + NUM_LAYERS]
    o_ref = refs[2 + NUM_LAYERS]

    h = x_ref[...]  # bf16 (TILE_B, 384)
    hf = None
    for i in range(NUM_LAYERS):
        out_f = PADDED_SIZES[i + 1]
        if i == 0:
            # A.B^T on the MXU: contract the last dim of both W0 (out,in) and the
            # batch-major x tile (TILE_B,in) -> (out, TILE_B) transposed activation.
            acc = lax.dot_general(w_refs[0][...], h, (((1,), (1,)), ((), ())),
                                  preferred_element_type=jnp.float32)
        else:
            acc = jnp.dot(w_refs[i][...], h, preferred_element_type=jnp.float32)
        b_i = b_ref[BIAS_OFFSETS[i]:BIAS_OFFSETS[i] + out_f, :]  # (out_f, 1) f32
        hf = acc + b_i  # f32, bias broadcasts across lanes
        if i < NUM_LAYERS - 1:
            # LeakyReLU(0.01): single VALU max; store inter-layer activation as bf16
            # (halves vld/vst traffic between unrolled layers, exact MXU input anyway).
            h = jnp.maximum(hf, jnp.float32(LEAKY_SLOPE) * hf).astype(jnp.bfloat16)
        else:
            hf = jnp.tanh(hf)  # EUP
    # forward() returns (data + 1) / 2 ; hf is (1, TILE_B)
    o_ref[...] = (hf + jnp.float32(1.0)) * jnp.float32(0.5)


def init_params(key):
    """Deterministic init mimicking torch.nn.Linear defaults (U(-1/sqrt(fan_in), +))."""
    weights, biases = [], []
    for i in range(1, len(LAYER_SIZES)):
        fan_in, fan_out = LAYER_SIZES[i - 1], LAYER_SIZES[i]
        key, kw, kb = jax.random.split(key, 3)
        bound = 1.0 / np.sqrt(fan_in)
        W = jax.random.uniform(kw, (fan_out, fan_in), jnp.float32, -bound, bound)
        b = jax.random.uniform(kb, (fan_out,), jnp.float32, -bound, bound)
        weights.append(W)
        biases.append(b)
    return weights, biases


def fold_and_pad_params(weights, biases):
    """Fold eval-mode BatchNorm1d (default stats) into each preceding Linear, zero-pad
    the 300-wide dims to 384, cast weights to bf16 (MXU operands), and pack all biases
    into a single (BIAS_TOTAL, 1) f32 slab with 8-aligned segments."""
    folded_w = []
    b_packed = jnp.zeros((BIAS_TOTAL, 1), jnp.float32)
    for i in range(NUM_LAYERS):
        W, b = weights[i], biases[i]  # W: (out, in)
        if i < NUM_LAYERS - 1:
            out_f = LAYER_SIZES[i + 1]
            gamma = jnp.ones((out_f,), jnp.float32)
            beta = jnp.zeros((out_f,), jnp.float32)
            running_mean = jnp.zeros((out_f,), jnp.float32)
            running_var = jnp.ones((out_f,), jnp.float32)
            s = gamma / jnp.sqrt(running_var + BN_EPS)
            W = W * s[:, None]
            b = b * s + (beta - running_mean * s)
        p_in, p_out = PADDED_SIZES[i], PADDED_SIZES[i + 1]
        Wp = jnp.zeros((p_out, p_in), jnp.float32).at[:W.shape[0], :W.shape[1]].set(W)
        folded_w.append(Wp.astype(jnp.bfloat16))
        b_packed = b_packed.at[BIAS_OFFSETS[i]:BIAS_OFFSETS[i] + b.shape[0], 0].set(b)
    return folded_w, b_packed


def conversation_root_forward(x, weights, bias_packed):
    """x: (B, 300) f32 -> (B, 1) f32, matching ConversationRootModel.forward (eval mode)."""
    B = x.shape[0]
    tile_b = _choose_tile(B)
    padded_B = _round_up(B, tile_b)
    n_tiles = padded_B // tile_b
    feat = PADDED_SIZES[0]

    # Single fused producer: cast to bf16 + zero-pad.  No transpose, no f32 round-trip.
    x_pad = jnp.pad(x.astype(jnp.bfloat16),
                    ((0, padded_B - B), (0, feat - x.shape[1])))

    in_specs = [pl.BlockSpec((tile_b, feat), lambda i: (i, 0))]
    # Constant index maps -> weights / packed biases stay VMEM-resident across tiles.
    in_specs += [pl.BlockSpec(w.shape, lambda i: (0, 0)) for w in weights]
    in_specs += [pl.BlockSpec(bias_packed.shape, lambda i: (0, 0))]
    out_specs = pl.BlockSpec((1, tile_b), lambda i: (0, i))

    flops = 2 * padded_B * sum(PADDED_SIZES[j] * PADDED_SIZES[j + 1]
                               for j in range(NUM_LAYERS))
    bytes_accessed = (int(x_pad.size) * 2 + padded_B * 4
                      + sum(int(w.size) * 2 for w in weights)
                      + int(bias_packed.size) * 4)

    out = pl.pallas_call(
        mlp_kernel,
        out_shape=jax.ShapeDtypeStruct((1, padded_B), jnp.float32),
        grid=(n_tiles,),
        in_specs=in_specs,
        out_specs=out_specs,
        compiler_params=pltpu.CompilerParams(
            dimension_semantics=("parallel",),       # batch tiles split across TCs on v7x
            vmem_limit_bytes=32 * 1024 * 1024,       # clears v5e's 16 MiB default for big tiles
        ),
        cost_estimate=pl.CostEstimate(
            flops=flops,
            transcendentals=padded_B,
            bytes_accessed=bytes_accessed,
        ),
    )(x_pad, *weights, bias_packed)

    return jnp.reshape(out[0, :B], (B, 1))


def reference_forward(x, weights, bias_packed):
    """Pure-JAX reference of the same (BN-folded, padded, bf16-operand) forward pass."""
    feat = PADDED_SIZES[0]
    h = jnp.pad(x.astype(jnp.bfloat16), ((0, 0), (0, feat - x.shape[1])))
    hf = None
    for i in range(NUM_LAYERS):
        out_f = PADDED_SIZES[i + 1]
        if i == 0:
            acc = lax.dot_general(weights[0], h, (((1,), (1,)), ((), ())),
                                  preferred_element_type=jnp.float32)
        else:
            acc = jnp.dot(weights[i], h, preferred_element_type=jnp.float32)
        hf = acc + bias_packed[BIAS_OFFSETS[i]:BIAS_OFFSETS[i] + out_f, :]
        if i < NUM_LAYERS - 1:
            h = jnp.maximum(hf, LEAKY_SLOPE * hf).astype(jnp.bfloat16)
        else:
            hf = jnp.tanh(hf)
    return jnp.transpose((hf + 1.0) * 0.5)  # (B, 1)


if __name__ == "__main__":
    key = jax.random.PRNGKey(0)
    key, kx = jax.random.split(key)

    batch = 512  # -> TILE_B=256, two batch tiles: exercises the parallel grid
    x = jax.random.normal(kx, (batch, LAYER_SIZES[0]), jnp.float32)  # (512, 300)

    raw_w, raw_b = init_params(key)
    weights, bias_packed = fold_and_pad_params(raw_w, raw_b)

    out = conversation_root_forward(x, weights, bias_packed)
    out = jax.block_until_ready(out)
    assert out.shape == (batch, 1)

    ref = reference_forward(x, weights, bias_packed)
    np.testing.assert_allclose(np.asarray(out), np.asarray(ref), rtol=2e-3, atol=2e-3)

    print("KERNEL_OK")
</pallas_src>

<mosaic_0001>
module attributes {stable_mosaic.version = 11 : i64} {
  func.func @mlp_kernel(%arg0: i32, %arg1: memref<256x384xbf16, #tpu.memory_space<vmem>>, %arg2: memref<384x384xbf16, #tpu.memory_space<vmem>>, %arg3: memref<256x384xbf16, #tpu.memory_space<vmem>>, %arg4: memref<256x256xbf16, #tpu.memory_space<vmem>>, %arg5: memref<128x256xbf16, #tpu.memory_space<vmem>>, %arg6: memref<128x128xbf16, #tpu.memory_space<vmem>>, %arg7: memref<64x128xbf16, #tpu.memory_space<vmem>>, %arg8: memref<64x64xbf16, #tpu.memory_space<vmem>>, %arg9: memref<32x64xbf16, #tpu.memory_space<vmem>>, %arg10: memref<32x32xbf16, #tpu.memory_space<vmem>>, %arg11: memref<16x32xbf16, #tpu.memory_space<vmem>>, %arg12: memref<8x16xbf16, #tpu.memory_space<vmem>>, %arg13: memref<4x8xbf16, #tpu.memory_space<vmem>>, %arg14: memref<2x4xbf16, #tpu.memory_space<vmem>>, %arg15: memref<1x2xbf16, #tpu.memory_space<vmem>>, %arg16: memref<1392x1xf32, #tpu.memory_space<vmem>>, %arg17: memref<1x256xf32, #tpu.memory_space<vmem>>) attributes {dimension_semantics = [#tpu.dimension_semantics<parallel>], iteration_bounds = array<i64: 2>, scalar_prefetch = 0 : i64, scratch_operands = 0 : i64, tpu.core_type = #tpu.core_type<tc>, window_params = [{transform_indices = @transform_0, window_bounds = array<i64: 256, 384>}, {pipeline_mode = #tpu.pipeline_mode<synchronous>, transform_indices = @transform_1, window_bounds = array<i64: 384, 384>}, {pipeline_mode = #tpu.pipeline_mode<synchronous>, transform_indices = @transform_2, window_bounds = array<i64: 256, 384>}, {pipeline_mode = #tpu.pipeline_mode<synchronous>, transform_indices = @transform_3, window_bounds = array<i64: 256, 256>}, {pipeline_mode = #tpu.pipeline_mode<synchronous>, transform_indices = @transform_4, window_bounds = array<i64: 128, 256>}, {pipeline_mode = #tpu.pipeline_mode<synchronous>, transform_indices = @transform_5, window_bounds = array<i64: 128, 128>}, {pipeline_mode = #tpu.pipeline_mode<synchronous>, transform_indices = @transform_6, window_bounds = array<i64: 64, 128>}, {pipeline_mode = #tpu.pipeline_mode<synchronous>, transform_indices = @transform_7, window_bounds = array<i64: 64, 64>}, {pipeline_mode = #tpu.pipeline_mode<synchronous>, transform_indices = @transform_8, window_bounds = array<i64: 32, 64>}, {pipeline_mode = #tpu.pipeline_mode<synchronous>, transform_indices = @transform_9, window_bounds = array<i64: 32, 32>}, {pipeline_mode = #tpu.pipeline_mode<synchronous>, transform_indices = @transform_10, window_bounds = array<i64: 16, 32>}, {pipeline_mode = #tpu.pipeline_mode<synchronous>, transform_indices = @transform_11, window_bounds = array<i64: 8, 16>}, {pipeline_mode = #tpu.pipeline_mode<synchronous>, transform_indices = @transform_12, window_bounds = array<i64: 4, 8>}, {pipeline_mode = #tpu.pipeline_mode<synchronous>, transform_indices = @transform_13, window_bounds = array<i64: 2, 4>}, {pipeline_mode = #tpu.pipeline_mode<synchronous>, transform_indices = @transform_14, window_bounds = array<i64: 1, 2>}, {pipeline_mode = #tpu.pipeline_mode<synchronous>, transform_indices = @transform_15, window_bounds = array<i64: 1392, 1>}, {transform_indices = @transform_16, window_bounds = array<i64: 1, 256>}]} {
    %c0 = arith.constant 0 : index
    %c0_0 = arith.constant 0 : index
    %0 = vector.load %arg1[%c0, %c0_0] : memref<256x384xbf16, #tpu.memory_space<vmem>>, vector<256x384xbf16>
    %c0_1 = arith.constant 0 : index
    %c0_2 = arith.constant 0 : index
    %1 = vector.load %arg2[%c0_1, %c0_2] : memref<384x384xbf16, #tpu.memory_space<vmem>>, vector<384x384xbf16>
    %cst = arith.constant dense<0.000000e+00> : vector<384x256xf32>
    %2 = tpu.matmul %1, %0, %cst {dimension_numbers = #tpu.dot_dimension_numbers<[1], [1], [0], [0], [0, 0, 1, 0], [], []>} : vector<384x384xbf16>, vector<256x384xbf16>, vector<384x256xf32> -> vector<384x256xf32>
    %c0_3 = arith.constant 0 : index
    %c0_4 = arith.constant 0 : index
    %3 = vector.load %arg16[%c0_3, %c0_4] : memref<1392x1xf32, #tpu.memory_space<vmem>>, vector<384x1xf32>
    %4 = vector.broadcast %3 : vector<384x1xf32> to vector<384x256xf32>
    %5 = arith.addf %2, %4 : vector<384x256xf32>
    %cst_5 = arith.constant 0.00999999977 : f32
    %6 = vector.broadcast %cst_5 : f32 to vector<384x256xf32>
    %7 = arith.mulf %6, %5 : vector<384x256xf32>
    %8 = arith.maximumf %5, %7 : vector<384x256xf32>
    %9 = arith.truncf %8 : vector<384x256xf32> to vector<384x256xbf16>
    %c0_6 = arith.constant 0 : index
    %c0_7 = arith.constant 0 : index
    %10 = vector.load %arg3[%c0_6, %c0_7] : memref<256x384xbf16, #tpu.memory_space<vmem>>, vector<256x384xbf16>
    %cst_8 = arith.constant dense<0.000000e+00> : vector<256x256xf32>
    %11 = tpu.matmul %10, %9, %cst_8 {dimension_numbers = #tpu.dot_dimension_numbers<[1], [0], [0], [1], [0, 0, 1, 1], [], []>} : vector<256x384xbf16>, vector<384x256xbf16>, vector<256x256xf32> -> vector<256x256xf32>
    %c384 = arith.constant 384 : index
    %c0_9 = arith.constant 0 : index
    %12 = vector.load %arg16[%c384, %c0_9] : memref<1392x1xf32, #tpu.memory_space<vmem>>, vector<256x1xf32>
    %13 = vector.broadcast %12 : vector<256x1xf32> to vector<256x256xf32>
    %14 = arith.addf %11, %13 : vector<256x256xf32>
    %cst_10 = arith.constant 0.00999999977 : f32
    %15 = vector.broadcast %cst_10 : f32 to vector<256x256xf32>
    %16 = arith.mulf %15, %14 : vector<256x256xf32>
    %17 = arith.maximumf %14, %16 : vector<256x256xf32>
    %18 = arith.truncf %17 : vector<256x256xf32> to vector<256x256xbf16>
    %c0_11 = arith.constant 0 : index
    %c0_12 = arith.constant 0 : index
    %19 = vector.load %arg4[%c0_11, %c0_12] : memref<256x256xbf16, #tpu.memory_space<vmem>>, vector<256x256xbf16>
    %cst_13 = arith.constant dense<0.000000e+00> : vector<256x256xf32>
    %20 = tpu.matmul %19, %18, %cst_13 {dimension_numbers = #tpu.dot_dimension_numbers<[1], [0], [0], [1], [0, 0, 1, 1], [], []>} : vector<256x256xbf16>, vector<256x256xbf16>, vector<256x256xf32> -> vector<256x256xf32>
    %c640 = arith.constant 640 : index
    %c0_14 = arith.constant 0 : index
    %21 = vector.load %arg16[%c640, %c0_14] : memref<1392x1xf32, #tpu.memory_space<vmem>>, vector<256x1xf32>
    %22 = vector.broadcast %21 : vector<256x1xf32> to vector<256x256xf32>
    %23 = arith.addf %20, %22 : vector<256x256xf32>
    %cst_15 = arith.constant 0.00999999977 : f32
    %24 = vector.broadcast %cst_15 : f32 to vector<256x256xf32>
    %25 = arith.mulf %24, %23 : vector<256x256xf32>
    %26 = arith.maximumf %23, %25 : vector<256x256xf32>
    %27 = arith.truncf %26 : vector<256x256xf32> to vector<256x256xbf16>
    %c0_16 = arith.constant 0 : index
    %c0_17 = arith.constant 0 : index
    %28 = vector.load %arg5[%c0_16, %c0_17] : memref<128x256xbf16, #tpu.memory_space<vmem>>, vector<128x256xbf16>
    %cst_18 = arith.constant dense<0.000000e+00> : vector<128x256xf32>
    %29 = tpu.matmul %28, %27, %cst_18 {dimension_numbers = #tpu.dot_dimension_numbers<[1], [0], [0], [1], [0, 0, 1, 1], [], []>} : vector<128x256xbf16>, vector<256x256xbf16>, vector<128x256xf32> -> vector<128x256xf32>
    %c896 = arith.constant 896 : index
    %c0_19 = arith.constant 0 : index
    %30 = vector.load %arg16[%c896, %c0_19] : memref<1392x1xf32, #tpu.memory_space<vmem>>, vector<128x1xf32>
    %31 = vector.broadcast %30 : vector<128x1xf32> to vector<128x256xf32>
    %32 = arith.addf %29, %31 : vector<128x256xf32>
    %cst_20 = arith.constant 0.00999999977 : f32
    %33 = vector.broadcast %cst_20 : f32 to vector<128x256xf32>
    %34 = arith.mulf %33, %32 : vector<128x256xf32>
    %35 = arith.maximumf %32, %34 : vector<128x256xf32>
    %36 = arith.truncf %35 : vector<128x256xf32> to vector<128x256xbf16>
    %c0_21 = arith.constant 0 : index
    %c0_22 = arith.constant 0 : index
    %37 = vector.load %arg6[%c0_21, %c0_22] : memref<128x128xbf16, #tpu.memory_space<vmem>>, vector<128x128xbf16>
    %cst_23 = arith.constant dense<0.000000e+00> : vector<128x256xf32>
    %38 = tpu.matmul %37, %36, %cst_23 {dimension_numbers = #tpu.dot_dimension_numbers<[1], [0], [0], [1], [0, 0, 1, 1], [], []>} : vector<128x128xbf16>, vector<128x256xbf16>, vector<128x256xf32> -> vector<128x256xf32>
    %c1024 = arith.constant 1024 : index
    %c0_24 = arith.constant 0 : index
    %39 = vector.load %arg16[%c1024, %c0_24] : memref<1392x1xf32, #tpu.memory_space<vmem>>, vector<128x1xf32>
    %40 = vector.broadcast %39 : vector<128x1xf32> to vector<128x256xf32>
    %41 = arith.addf %38, %40 : vector<128x256xf32>
    %cst_25 = arith.constant 0.00999999977 : f32
    %42 = vector.broadcast %cst_25 : f32 to vector<128x256xf32>
    %43 = arith.mulf %42, %41 : vector<128x256xf32>
    %44 = arith.maximumf %41, %43 : vector<128x256xf32>
    %45 = arith.truncf %44 : vector<128x256xf32> to vector<128x256xbf16>
    %c0_26 = arith.constant 0 : index
    %c0_27 = arith.constant 0 : index
    %46 = vector.load %arg7[%c0_26, %c0_27] : memref<64x128xbf16, #tpu.memory_space<vmem>>, vector<64x128xbf16>
    %cst_28 = arith.constant dense<0.000000e+00> : vector<64x256xf32>
    %47 = tpu.matmul %46, %45, %cst_28 {dimension_numbers = #tpu.dot_dimension_numbers<[1], [0], [0], [1], [0, 0, 1, 1], [], []>} : vector<64x128xbf16>, vector<128x256xbf16>, vector<64x256xf32> -> vector<64x256xf32>
    %c1152 = arith.constant 1152 : index
    %c0_29 = arith.constant 0 : index
    %48 = vector.load %arg16[%c1152, %c0_29] : memref<1392x1xf32, #tpu.memory_space<vmem>>, vector<64x1xf32>
    %49 = vector.broadcast %48 : vector<64x1xf32> to vector<64x256xf32>
    %50 = arith.addf %47, %49 : vector<64x256xf32>
    %cst_30 = arith.constant 0.00999999977 : f32
    %51 = vector.broadcast %cst_30 : f32 to vector<64x256xf32>
    %52 = arith.mulf %51, %50 : vector<64x256xf32>
    %53 = arith.maximumf %50, %52 : vector<64x256xf32>
    %54 = arith.truncf %53 : vector<64x256xf32> to vector<64x256xbf16>
    %c0_31 = arith.constant 0 : index
    %c0_32 = arith.constant 0 : index
    %55 = vector.load %arg8[%c0_31, %c0_32] : memref<64x64xbf16, #tpu.memory_space<vmem>>, vector<64x64xbf16>
    %cst_33 = arith.constant dense<0.000000e+00> : vector<64x256xf32>
    %56 = tpu.matmul %55, %54, %cst_33 {dimension_numbers = #tpu.dot_dimension_numbers<[1], [0], [0], [1], [0, 0, 1, 1], [], []>} : vector<64x64xbf16>, vector<64x256xbf16>, vector<64x256xf32> -> vector<64x256xf32>
    %c1216 = arith.constant 1216 : index
    %c0_34 = arith.constant 0 : index
    %57 = vector.load %arg16[%c1216, %c0_34] : memref<1392x1xf32, #tpu.memory_space<vmem>>, vector<64x1xf32>
    %58 = vector.broadcast %57 : vector<64x1xf32> to vector<64x256xf32>
    %59 = arith.addf %56, %58 : vector<64x256xf32>
    %cst_35 = arith.constant 0.00999999977 : f32
    %60 = vector.broadcast %cst_35 : f32 to vector<64x256xf32>
    %61 = arith.mulf %60, %59 : vector<64x256xf32>
    %62 = arith.maximumf %59, %61 : vector<64x256xf32>
    %63 = arith.truncf %62 : vector<64x256xf32> to vector<64x256xbf16>
    %c0_36 = arith.constant 0 : index
    %c0_37 = arith.constant 0 : index
    %64 = vector.load %arg9[%c0_36, %c0_37] : memref<32x64xbf16, #tpu.memory_space<vmem>>, vector<32x64xbf16>
    %cst_38 = arith.constant dense<0.000000e+00> : vector<32x256xf32>
    %65 = tpu.matmul %64, %63, %cst_38 {dimension_numbers = #tpu.dot_dimension_numbers<[1], [0], [0], [1], [0, 0, 1, 1], [], []>} : vector<32x64xbf16>, vector<64x256xbf16>, vector<32x256xf32> -> vector<32x256xf32>
    %c1280 = arith.constant 1280 : index
    %c0_39 = arith.constant 0 : index
    %66 = vector.load %arg16[%c1280, %c0_39] : memref<1392x1xf32, #tpu.memory_space<vmem>>, vector<32x1xf32>
    %67 = vector.broadcast %66 : vector<32x1xf32> to vector<32x256xf32>
    %68 = arith.addf %65, %67 : vector<32x256xf32>
    %cst_40 = arith.constant 0.00999999977 : f32
    %69 = vector.broadcast %cst_40 : f32 to vector<32x256xf32>
    %70 = arith.mulf %69, %68 : vector<32x256xf32>
    %71 = arith.maximumf %68, %70 : vector<32x256xf32>
    %72 = arith.truncf %71 : vector<32x256xf32> to vector<32x256xbf16>
    %c0_41 = arith.constant 0 : index
    %c0_42 = arith.constant 0 : index
    %73 = vector.load %arg10[%c0_41, %c0_42] : memref<32x32xbf16, #tpu.memory_space<vmem>>, vector<32x32xbf16>
    %cst_43 = arith.constant dense<0.000000e+00> : vector<32x256xf32>
    %74 = tpu.matmul %73, %72, %cst_43 {dimension_numbers = #tpu.dot_dimension_numbers<[1], [0], [0], [1], [0, 0, 1, 1], [], []>} : vector<32x32xbf16>, vector<32x256xbf16>, vector<32x256xf32> -> vector<32x256xf32>
    %c1312 = arith.constant 1312 : index
    %c0_44 = arith.constant 0 : index
    %75 = vector.load %arg16[%c1312, %c0_44] : memref<1392x1xf32, #tpu.memory_space<vmem>>, vector<32x1xf32>
    %76 = vector.broadcast %75 : vector<32x1xf32> to vector<32x256xf32>
    %77 = arith.addf %74, %76 : vector<32x256xf32>
    %cst_45 = arith.constant 0.00999999977 : f32
    %78 = vector.broadcast %cst_45 : f32 to vector<32x256xf32>
    %79 = arith.mulf %78, %77 : vector<32x256xf32>
    %80 = arith.maximumf %77, %79 : vector<32x256xf32>
    %81 = arith.truncf %80 : vector<32x256xf32> to vector<32x256xbf16>
    %c0_46 = arith.constant 0 : index
    %c0_47 = arith.constant 0 : index
    %82 = vector.load %arg11[%c0_46, %c0_47] : memref<16x32xbf16, #tpu.memory_space<vmem>>, vector<16x32xbf16>
    %cst_48 = arith.constant dense<0.000000e+00> : vector<16x256xf32>
    %83 = tpu.matmul %82, %81, %cst_48 {dimension_numbers = #tpu.dot_dimension_numbers<[1], [0], [0], [1], [0, 0, 1, 1], [], []>} : vector<16x32xbf16>, vector<32x256xbf16>, vector<16x256xf32> -> vector<16x256xf32>
    %c1344 = arith.constant 1344 : index
    %c0_49 = arith.constant 0 : index
    %84 = vector.load %arg16[%c1344, %c0_49] : memref<1392x1xf32, #tpu.memory_space<vmem>>, vector<16x1xf32>
    %85 = vector.broadcast %84 : vector<16x1xf32> to vector<16x256xf32>
    %86 = arith.addf %83, %85 : vector<16x256xf32>
    %cst_50 = arith.constant 0.00999999977 : f32
    %87 = vector.broadcast %cst_50 : f32 to vector<16x256xf32>
    %88 = arith.mulf %87, %86 : vector<16x256xf32>
    %89 = arith.maximumf %86, %88 : vector<16x256xf32>
    %90 = arith.truncf %89 : vector<16x256xf32> to vector<16x256xbf16>
    %c0_51 = arith.constant 0 : index
    %c0_52 = arith.constant 0 : index
    %91 = vector.load %arg12[%c0_51, %c0_52] : memref<8x16xbf16, #tpu.memory_space<vmem>>, vector<8x16xbf16>
    %cst_53 = arith.constant dense<0.000000e+00> : vector<8x256xf32>
    %92 = tpu.matmul %91, %90, %cst_53 {dimension_numbers = #tpu.dot_dimension_numbers<[1], [0], [0], [1], [0, 0, 1, 1], [], []>} : vector<8x16xbf16>, vector<16x256xbf16>, vector<8x256xf32> -> vector<8x256xf32>
    %c1360 = arith.constant 1360 : index
    %c0_54 = arith.constant 0 : index
    %93 = vector.load %arg16[%c1360, %c0_54] : memref<1392x1xf32, #tpu.memory_space<vmem>>, vector<8x1xf32>
    %94 = vector.broadcast %93 : vector<8x1xf32> to vector<8x256xf32>
    %95 = arith.addf %92, %94 : vector<8x256xf32>
    %cst_55 = arith.constant 0.00999999977 : f32
    %96 = vector.broadcast %cst_55 : f32 to vector<8x256xf32>
    %97 = arith.mulf %96, %95 : vector<8x256xf32>
    %98 = arith.maximumf %95, %97 : vector<8x256xf32>
    %99 = arith.truncf %98 : vector<8x256xf32> to vector<8x256xbf16>
    %c0_56 = arith.constant 0 : index
    %c0_57 = arith.constant 0 : index
    %100 = vector.load %arg13[%c0_56, %c0_57] : memref<4x8xbf16, #tpu.memory_space<vmem>>, vector<4x8xbf16>
    %cst_58 = arith.constant dense<0.000000e+00> : vector<4x256xf32>
    %101 = tpu.matmul %100, %99, %cst_58 {dimension_numbers = #tpu.dot_dimension_numbers<[1], [0], [0], [1], [0, 0, 1, 1], [], []>} : vector<4x8xbf16>, vector<8x256xbf16>, vector<4x256xf32> -> vector<4x256xf32>
    %c1368 = arith.constant 1368 : index
    %c0_59 = arith.constant 0 : index
    %102 = vector.load %arg16[%c1368, %c0_59] : memref<1392x1xf32, #tpu.memory_space<vmem>>, vector<4x1xf32>
    %103 = vector.broadcast %102 : vector<4x1xf32> to vector<4x256xf32>
    %104 = arith.addf %101, %103 : vector<4x256xf32>
    %cst_60 = arith.constant 0.00999999977 : f32
    %105 = vector.broadcast %cst_60 : f32 to vector<4x256xf32>
    %106 = arith.mulf %105, %104 : vector<4x256xf32>
    %107 = arith.maximumf %104, %106 : vector<4x256xf32>
    %108 = arith.truncf %107 : vector<4x256xf32> to vector<4x256xbf16>
    %c0_61 = arith.constant 0 : index
    %c0_62 = arith.constant 0 : index
    %109 = vector.load %arg14[%c0_61, %c0_62] : memref<2x4xbf16, #tpu.memory_space<vmem>>, vector<2x4xbf16>
    %cst_63 = arith.constant dense<0.000000e+00> : vector<2x256xf32>
    %110 = tpu.matmul %109, %108, %cst_63 {dimension_numbers = #tpu.dot_dimension_numbers<[1], [0], [0], [1], [0, 0, 1, 1], [], []>} : vector<2x4xbf16>, vector<4x256xbf16>, vector<2x256xf32> -> vector<2x256xf32>
    %c1376 = arith.constant 1376 : index
    %c0_64 = arith.constant 0 : index
    %111 = vector.load %arg16[%c1376, %c0_64] : memref<1392x1xf32, #tpu.memory_space<vmem>>, vector<2x1xf32>
    %112 = vector.broadcast %111 : vector<2x1xf32> to vector<2x256xf32>
    %113 = arith.addf %110, %112 : vector<2x256xf32>
    %cst_65 = arith.constant 0.00999999977 : f32
    %114 = vector.broadcast %cst_65 : f32 to vector<2x256xf32>
    %115 = arith.mulf %114, %113 : vector<2x256xf32>
    %116 = arith.maximumf %113, %115 : vector<2x256xf32>
    %117 = arith.truncf %116 : vector<2x256xf32> to vector<2x256xbf16>
    %c0_66 = arith.constant 0 : index
    %c0_67 = arith.constant 0 : index
    %118 = vector.load %arg15[%c0_66, %c0_67] : memref<1x2xbf16, #tpu.memory_space<vmem>>, vector<1x2xbf16>
    %cst_68 = arith.constant dense<0.000000e+00> : vector<1x256xf32>
    %119 = tpu.matmul %118, %117, %cst_68 {dimension_numbers = #tpu.dot_dimension_numbers<[1], [0], [0], [1], [0, 0, 1, 1], [], []>} : vector<1x2xbf16>, vector<2x256xbf16>, vector<1x256xf32> -> vector<1x256xf32>
    %c1384 = arith.constant 1384 : index
    %c0_69 = arith.constant 0 : index
    %120 = vector.load %arg16[%c1384, %c0_69] : memref<1392x1xf32, #tpu.memory_space<vmem>>, vector<1x1xf32>
    %121 = vector.broadcast %120 : vector<1x1xf32> to vector<1x256xf32>
    %122 = arith.addf %119, %121 : vector<1x256xf32>
    %123 = math.tanh %122 : vector<1x256xf32>
    %cst_70 = arith.constant 1.000000e+00 : f32
    %124 = vector.broadcast %cst_70 : f32 to vector<1x256xf32>
    %125 = arith.addf %123, %124 : vector<1x256xf32>
    %cst_71 = arith.constant 5.000000e-01 : f32
    %126 = vector.broadcast %cst_71 : f32 to vector<1x256xf32>
    %127 = arith.mulf %125, %126 : vector<1x256xf32>
    %c0_72 = arith.constant 0 : index
    %c0_73 = arith.constant 0 : index
    %128 = vector.load %arg17[%c0_72, %c0_73] : memref<1x256xf32, #tpu.memory_space<vmem>>, vector<1x256xf32>
    tpu.vector_store %arg17[%c0_72, %c0_73], %127 {strides = array<i32>} : memref<1x256xf32, #tpu.memory_space<vmem>>, vector<1x256xf32>,
    return
  }
  func.func @transform_0(%arg0: i32) -> (i32, i32) {
    %c0_i32 = arith.constant 0 : i32
    %c0_i32_0 = arith.constant 0 : i32
    return %arg0, %c0_i32 : i32, i32
  }
  func.func @transform_1(%arg0: i32) -> (i32, i32) {
    %c0_i32 = arith.constant 0 : i32
    %c0_i32_0 = arith.constant 0 : i32
    %c0_i32_1 = arith.constant 0 : i32
    return %c0_i32, %c0_i32_0 : i32, i32
  }
  func.func @transform_2(%arg0: i32) -> (i32, i32) {
    %c0_i32 = arith.constant 0 : i32
    %c0_i32_0 = arith.constant 0 : i32
    %c0_i32_1 = arith.constant 0 : i32
    return %c0_i32, %c0_i32_0 : i32, i32
  }
  func.func @transform_3(%arg0: i32) -> (i32, i32) {
    %c0_i32 = arith.constant 0 : i32
    %c0_i32_0 = arith.constant 0 : i32
    %c0_i32_1 = arith.constant 0 : i32
    return %c0_i32, %c0_i32_0 : i32, i32
  }
  func.func @transform_4(%arg0: i32) -> (i32, i32) {
    %c0_i32 = arith.constant 0 : i32
    %c0_i32_0 = arith.constant 0 : i32
    %c0_i32_1 = arith.constant 0 : i32
    return %c0_i32, %c0_i32_0 : i32, i32
  }
  func.func @transform_5(%arg0: i32) -> (i32, i32) {
    %c0_i32 = arith.constant 0 : i32
    %c0_i32_0 = arith.constant 0 : i32
    %c0_i32_1 = arith.constant 0 : i32
    return %c0_i32, %c0_i32_0 : i32, i32
  }
  func.func @transform_6(%arg0: i32) -> (i32, i32) {
    %c0_i32 = arith.constant 0 : i32
    %c0_i32_0 = arith.constant 0 : i32
    %c0_i32_1 = arith.constant 0 : i32
    return %c0_i32, %c0_i32_0 : i32, i32
  }
  func.func @transform_7(%arg0: i32) -> (i32, i32) {
    %c0_i32 = arith.constant 0 : i32
    %c0_i32_0 = arith.constant 0 : i32
    %c0_i32_1 = arith.constant 0 : i32
    return %c0_i32, %c0_i32_0 : i32, i32
  }
  func.func @transform_8(%arg0: i32) -> (i32, i32) {
    %c0_i32 = arith.constant 0 : i32
    %c0_i32_0 = arith.constant 0 : i32
    %c0_i32_1 = arith.constant 0 : i32
    return %c0_i32, %c0_i32_0 : i32, i32
  }
  func.func @transform_9(%arg0: i32) -> (i32, i32) {
    %c0_i32 = arith.constant 0 : i32
    %c0_i32_0 = arith.constant 0 : i32
    %c0_i32_1 = arith.constant 0 : i32
    return %c0_i32, %c0_i32_0 : i32, i32
  }
  func.func @transform_10(%arg0: i32) -> (i32, i32) {
    %c0_i32 = arith.constant 0 : i32
    %c0_i32_0 = arith.constant 0 : i32
    %c0_i32_1 = arith.constant 0 : i32
    return %c0_i32, %c0_i32_0 : i32, i32
  }
  func.func @transform_11(%arg0: i32) -> (i32, i32) {
    %c0_i32 = arith.constant 0 : i32
    %c0_i32_0 = arith.constant 0 : i32
    %c0_i32_1 = arith.constant 0 : i32
    return %c0_i32, %c0_i32_0 : i32, i32
  }
  func.func @transform_12(%arg0: i32) -> (i32, i32) {
    %c0_i32 = arith.constant 0 : i32
    %c0_i32_0 = arith.constant 0 : i32
    %c0_i32_1 = arith.constant 0 : i32
    return %c0_i32, %c0_i32_0 : i32, i32
  }
  func.func @transform_13(%arg0: i32) -> (i32, i32) {
    %c0_i32 = arith.constant 0 : i32
    %c0_i32_0 = arith.constant 0 : i32
    %c0_i32_1 = arith.constant 0 : i32
    return %c0_i32, %c0_i32_0 : i32, i32
  }
  func.func @transform_14(%arg0: i32) -> (i32, i32) {
    %c0_i32 = arith.constant 0 : i32
    %c0_i32_0 = arith.constant 0 : i32
    %c0_i32_1 = arith.constant 0 : i32
    return %c0_i32, %c0_i32_0 : i32, i32
  }
  func.func @transform_15(%arg0: i32) -> (i32, i32) {
    %c0_i32 = arith.constant 0 : i32
    %c0_i32_0 = arith.constant 0 : i32
    %c0_i32_1 = arith.constant 0 : i32
    return %c0_i32, %c0_i32_0 : i32, i32
  }
  func.func @transform_16(%arg0: i32) -> (i32, i32) {
    %c0_i32 = arith.constant 0 : i32
    %c0_i32_0 = arith.constant 0 : i32
    return %c0_i32, %arg0 : i32, i32
  }
}

</mosaic_0001>

<bundles_post_ra>
// kernel: tpu_custom_call.1
= control target key start
LH: loop header
LB: loop body
LE: loop exit
PB: predicated region body
PF: predicated region fallthrough
CT: control target
= control target key end

     0   :  { %s9999_s0 = inlined_call_operand.vmem [shape: bf16[512,384], index: 0, kind: input, shape index: {}]   ;;  %s10000_s1 = inlined_call_operand.vmem [shape: bf16[384,384], index: 1, kind: input, shape index: {}]   ;;  %s10001_s2 = inlined_call_operand.hbm [shape: bf16[256,384], index: 2, kind: input, shape index: {}]   ;;  %s10002_s3 = inlined_call_operand.hbm [shape: bf16[256,256], index: 3, kind: input, shape index: {}]   ;;  %s10003_s4 = inlined_call_operand.hbm [shape: bf16[128,256], index: 4, kind: input, shape index: {}]   ;;  %s10004_s5 = inlined_call_operand.hbm [shape: bf16[128,128], index: 5, kind: input, shape index: {}]   ;;  %s10005_s6 = inlined_call_operand.vmem [shape: bf16[64,128], index: 6, kind: input, shape index: {}]   ;;  %s10006_s7 = inlined_call_operand.hbm [shape: bf16[64,64], index: 7, kind: input, shape index: {}]   ;;  %s10007_s8 = inlined_call_operand.vmem [shape: bf16[32,64], index: 8, kind: input, shape index: {}]   ;;  %s10008_s9 = inlined_call_operand.vmem [shape: bf16[32,32], index: 9, kind: input, shape index: {}]   ;;  %s10009_s10 = inlined_call_operand.hbm [shape: bf16[16,32], index: 10, kind: input, shape index: {}]   ;;  %s10010_s11 = inlined_call_operand.vmem [shape: bf16[8,16], index: 11, kind: input, shape index: {}]   ;;  %s10011_s12 = inlined_call_operand.hbm [shape: bf16[4,8], index: 12, kind: input, shape index: {}]   ;;  %s10012_s13 = inlined_call_operand.vmem [shape: bf16[2,4], index: 13, kind: input, shape index: {}]   ;;  %s10013_s14 = inlined_call_operand.hbm [shape: bf16[1,2], index: 14, kind: input, shape index: {}]   ;;  %s10014_s15 = inlined_call_operand.vmem [shape: f32[1392,1], index: 15, kind: input, shape index: {}]   ;;  %s10015_s16 = inlined_call_operand.hbm [shape: f32[1,512], index: 16, kind: output, shape index: {}]  }
   0x1   :  { %10113 = sst [smem:[#allocation114_spill]] %s9999_s0 }
   0x2   :  { %10114 = sst [smem:[#allocation115_spill]] %s10002_s3 }
   0x3   :  { %10115 = sst [smem:[#allocation116_spill]] %s10004_s5 }
   0x4   :  { %21 = vsyncpa [#allocation3], 0 }
   0x5   :  { %22 = vsyncpa [#allocation6], 0 }
   0x6   :  { %23 = vsyncpa [#allocation9], 0 }
   0x7   :  { %24 = vsyncpa [#allocation12], 0 }
   0x8   :  { %25 = vsyncpa [#allocation15], 0 }
   0x9   :  { %26 = vsyncpa [#allocation4], 0 }
   0xa   :  { %28 = vsyncpa [#allocation4 + $0x1], 0  ;;  %s7371_s21 = smov 0   ;;  %s7373_s22 = smov 0  }
   0xb   :  { %s7375_s23 = smov 0   ;;  %s7377_s24 = smov 0  }
   0xc LB: > { %10116 = sst [smem:[#allocation23_spill]] %s7255_s21  ;;  %s7392_s25 = sadd.s32 4294967295, %s7267_s24   ;;  %s7267_s24 = sphi %s7377_s24, %s10422_s24   ;;  %s7263_s23 = sphi %s7375_s23, %s10424_s23   ;;  %s7259_s22 = sphi %s7373_s22, %s10426_s22   ;;  %s7255_s21 = sphi %s7371_s21, %s10425_s21  }
   0xd   : > { %10117 = sst [smem:[#allocation24_spill]] %s7263_s23  ;;  %s6181_s26 = sadd.s32 4294967294, %s7267_s24  }
   0xe   : > { %10118 = sst [smem:[#allocation25_spill]] %s7267_s24  ;;  %s7396_s27 = sadd.s32 1, %s7267_s24  }
   0xf   : > { %10119 = sst [smem:[#allocation26_spill]] %s7396_s27  ;;  %s382_s28 = sadd.s32 1, %s7263_s23 }
  0x10   : > { %s379_s29 = ssub.s32 %s7267_s24, %s7396_s27  ;;  %p392_p0 = scmp.ne.s32.totalorder %s7263_s23, %s7259_s22 }
  0x11   : > { %p380_p1 = scmp.eq.s32.totalorder %s379_s29, 0  ;;  %p393_p2 = scmp.eq.s32.totalorder %s7392_s25, 1 }
  0x12   : > { %p398_p3 = scmp.ne.s32.totalorder %s7259_s22, %s7255_s21  ;;  %p399_p4 = scmp.eq.s32.totalorder %s6181_s26, 1 }
  0x13   : > { %s7407_s30 = scalar_select %p380_p1, %s7263_s23, %s382_s28  }
  0x14   : > { %p7409_p5 = por %p393_p2, %p392_p0  ;;  %p7413_p6 = por %p399_p4, %p398_p3 }
  0x15   : > { %10120 = sst [smem:[#allocation27_spill]] %s7407_s30  ;;  %p6182_p7 = scmp.ge.s32.totalorder %s7267_s24, 1 }
  0x16   : > { %s10121_s0 = scalar_select %p7409_p5, 1, 0 }
  0x17   : > { %s10122_s17 = scalar_select %p7413_p6, 1, 0 }
  0x18   : > { %p406_p8 = scmp.lt.s32.totalorder %s7267_s24, 3  ;;  %p10024_p9 = scmp.eq.s32.totalorder %s7392_s25, 0 }
  0x19   : > { %10123 = sst [smem:[#allocation28_spill]] %s10122_s17  ;;  %s7269_s19 = smov [#allocation5]  }
  0x1a   : > { %p7420_p10 = pnand %p6182_p7, %p406_p8  ;;  %s434_s20 = sshll.u32 %s7269_s19, 4  ;;  %s435_s20 = int_to_ptr.vmem [resolvable:$true] %s434_s20 }
  0x1b   : > { %s7270_s28 = smov [#allocation8]   ;;  %s6990_s23 = scalar_lea.vmem %s435_s20, 4096 }
  0x1c   : > { %s10124_s18 = scalar_select %p7420_p10, 1, 0 }
  0x1d   : > { %p6562_p11 = pneg %p7420_p10  ;;  %s460_s29 = sshll.u32 %s7270_s28, 4  ;;  %s461_s29 = int_to_ptr.vmem [resolvable:$true] %s460_s29 }
  0x1e   : > { %p6991_p0 = scmp.ne.s32.totalorder %s435_s20, %s6990_s23  ;;  %p6998_p3 = scmp.lt.s32.totalorder %s435_s20, %s435_s20 }
  0x1f   : > { %p7428_p12 = pnand %p10024_p9, %p6562_p11  ;;  %p6999_p4 = scmp.lt.s32.totalorder %s6990_s23, %s6990_s23 }
  0x21   : > { %p7434_p13 = pneg %p7428_p12  ;;  %p7000_p7 = por %p6999_p4, %p6998_p3 }
  0x23   : > { %p6993_p1 = pnand %p6991_p0, %p7434_p13 }
  0x25   : > { %p6994_p2 = pneg %p6993_p1 }
  0x27   : > { %p7001_p8 = pnand %p7000_p7, %p6994_p2 }
  0x29   : > { %7004 = shalt.err (!%p7001_p8)
}
  0x2a   : > { %s10022_s19 = smov 128   ;;  %s10023_s28 = smov 8  }
  0x2b   : > { %s10127_s3 = sld [smem:[#allocation115_spill]]  ;;  %s7016_s21 = scalar_lea.vmem %s461_s29, 1024 }
  0x2c   : > { %p7017_p11 = scmp.ne.s32.totalorder %s461_s29, %s7016_s21  ;;  %p7024_p3 = scmp.lt.s32.totalorder %s461_s29, %s461_s29 }
  0x2d   : > { %p7025_p2 = scmp.lt.s32.totalorder %s7016_s21, %s7016_s21 }
  0x2e   : > { %p7019_p0 = pnand %p7017_p11, %p7434_p13 }
  0x2f   : > { %p7026_p4 = por %p7025_p2, %p7024_p3 }
  0x30   : > { %p7020_p1 = pneg %p7019_p0 }
  0x31   : > { %6568 = dma.hbm_to_vmem [thread:$0]  (!%p7428_p12), %s10127_s3, 4096, %s435_s20, [#allocation6], %s10022_s19, %s10022_s19, %s10023_s28  }
  0x32   : > { %p7027_p7 = pnand %p7026_p4, %p7020_p1 }
  0x34   : > { %7030 = shalt.err (!%p7027_p7)
}
  0x35   : > { %s10025_s23 = smov 64   ;;  %s10026_s24 = smov 4  }
  0x36   : > { %s10128_s5 = sld [smem:[#allocation116_spill]]  ;;  %s7275_s20 = smov [#allocation11]  }
  0x37   : > { %s495_s19 = sshll.u32 %s7275_s20, 4  ;;  %s7276_s28 = smov [#allocation2]   ;;  %s496_s19 = int_to_ptr.vmem [resolvable:$true] %s495_s19 }
  0x38   : > { %s421_s3 = sshll.u32 %s7276_s28, 4  ;;  %s7042_s21 = scalar_lea.vmem %s496_s19, 128  ;;  %s422_s3 = int_to_ptr.vmem [resolvable:$true] %s421_s3 }
  0x39   : > { %p7043_p8 = scmp.ne.s32.totalorder %s496_s19, %s7042_s21  ;;  %p7050_p1 = scmp.lt.s32.totalorder %s496_s19, %s496_s19 }
  0x3a   : > { %p7051_p3 = scmp.lt.s32.totalorder %s7042_s21, %s7042_s21 }
  0x3b   : > { %p7045_p11 = pnand %p7043_p8, %p7434_p13 }
  0x3c   : > { %6574 = dma.hbm_to_vmem [thread:$0]  (!%p7428_p12), %s10128_s5, 1024, %s461_s29, [#allocation9], %s10025_s23, %s10025_s23, %s10026_s24  }
  0x3d   : > { %p7046_p0 = pneg %p7045_p11  ;;  %p7052_p2 = por %p7051_p3, %p7050_p1 }
  0x3f   : > { %p7053_p4 = pnand %p7052_p2, %p7046_p0 }
  0x41   : > { %7056 = shalt.err (!%p7053_p4)
}
  0x42   : > { %6580 = dma.hbm_to_vmem [thread:$0]  (!%p7428_p12), %s10009_s10, 128, %s496_s19, [#allocation12], %s10025_s23, %s10025_s23, %s10026_s24  }
  0x43   : > { %s7068_s28 = scalar_lea.vmem %s422_s3, 6144  ;;  %p7076_p9 = scmp.lt.s32.totalorder %s422_s3, %s422_s3 }
  0x44   : > { %p7069_p7 = scmp.ne.s32.totalorder %s422_s3, %s7068_s28  ;;  %p7077_p6 = scmp.lt.s32.totalorder %s7068_s28, %s7068_s28 }
  0x46   : > { %p7071_p8 = pnand %p7069_p7, %p7434_p13  ;;  %p7078_p1 = por %p7077_p6, %p7076_p9 }
  0x48   : > { %p7072_p11 = pneg %p7071_p8 }
  0x4a   : > { %p7079_p0 = pnand %p7078_p1, %p7072_p11 }
  0x4c   : > { %7082 = shalt.err (!%p7079_p0)
}
  0x4d   : > { %s7277_s17 = smov 192   ;;  %s7278_s20 = smov 12  }
  0x4e   : > { %6565 = dma.hbm_to_vmem [thread:$0]  (!%p7428_p12), %s10001_s2, 6144, %s422_s3, [#allocation3], %s7277_s17, %s7277_s17, %s7278_s20  }
  0x4f   : > { %s7279_s19 = smov [#allocation7]   ;;  %s7280_s27 = smov [#allocation10]  }
  0x50   : > { %s447_s29 = sshll.u32 %s7279_s19, 4  ;;  %s476_s23 = sshll.u32 %s7280_s27, 4  ;;  %s448_s29 = int_to_ptr.vmem [resolvable:$true] %s447_s29  ;;  %s477_s23 = int_to_ptr.vmem [resolvable:$true] %s476_s23 }
  0x51   : > { %s7094_s24 = scalar_lea.vmem %s448_s29, 2048  ;;  %p7102_p2 = scmp.lt.s32.totalorder %s448_s29, %s448_s29 }
  0x52   : > { %p7095_p3 = scmp.ne.s32.totalorder %s448_s29, %s7094_s24  ;;  %p7103_p4 = scmp.lt.s32.totalorder %s7094_s24, %s7094_s24 }
  0x54   : > { %p7097_p6 = pnand %p7095_p3, %p7434_p13  ;;  %p7104_p7 = por %p7103_p4, %p7102_p2 }
  0x56   : > { %p7098_p9 = pneg %p7097_p6 }
  0x58   : > { %p7105_p8 = pnand %p7104_p7, %p7098_p9 }
  0x5a   : > { %7108 = shalt.err (!%p7105_p8)
}
  0x5b   : > { %s10129_s5 = smov 8   ;;  %s10130_s3 = smov 128  }
  0x5c   : > { %6571 = dma.hbm_to_vmem [thread:$0]  (!%p7428_p12), %s10003_s4, 2048, %s448_s29, [#allocation6], %s10130_s3, %s10130_s3, %s10129_s5  }
  0x5d   : > { %s7120_s20 = scalar_lea.vmem %s477_s23, 512  ;;  %p7128_p3 = scmp.lt.s32.totalorder %s477_s23, %s477_s23 }
  0x5e   : > { %p7121_p11 = scmp.ne.s32.totalorder %s477_s23, %s7120_s20  ;;  %p7129_p6 = scmp.lt.s32.totalorder %s7120_s20, %s7120_s20 }
  0x60   : > { %p7123_p1 = pnand %p7121_p11, %p7434_p13  ;;  %p7130_p2 = por %p7129_p6, %p7128_p3 }
  0x62   : > { %p7124_p0 = pneg %p7123_p1 }
  0x64   : > { %p7131_p9 = pnand %p7130_p2, %p7124_p0 }
  0x66   : > { %7134 = shalt.err (!%p7131_p9)
}
  0x67   : > { %s10131_s24 = smov 4   ;;  %s10132_s21 = smov 64  }
  0x68   : > { %6577 = dma.hbm_to_vmem [thread:$0]  (!%p7428_p12), %s10006_s7, 512, %s477_s23, [#allocation9], %s10132_s21, %s10132_s21, %s10131_s24  }
  0x69   : > { %s7281_s29 = smov [#allocation13]   ;;  %s7282_s3 = smov [#allocation14]  }
  0x6a   : > { %s512_s5 = sshll.u32 %s7281_s29, 4  ;;  %s526_s28 = sshll.u32 %s7282_s3, 4  ;;  %s513_s5 = int_to_ptr.vmem [resolvable:$true] %s512_s5  ;;  %s527_s28 = int_to_ptr.vmem [resolvable:$true] %s526_s28 }
  0x6b   : > { %s7146_s17 = scalar_lea.vmem %s513_s5, 32  ;;  %p7154_p11 = scmp.lt.s32.totalorder %s513_s5, %s513_s5 }
  0x6c   : > { %p7147_p4 = scmp.ne.s32.totalorder %s513_s5, %s7146_s17  ;;  %p7155_p1 = scmp.lt.s32.totalorder %s7146_s17, %s7146_s17 }
  0x6e   : > { %p7149_p7 = pnand %p7147_p4, %p7434_p13  ;;  %p7156_p0 = por %p7155_p1, %p7154_p11 }
  0x70   : > { %p7150_p8 = pneg %p7149_p7 }
  0x72   : > { %p7157_p3 = pnand %p7156_p0, %p7150_p8 }
  0x74   : > { %7160 = shalt.err (!%p7157_p3)
}
  0x75   : > { %6583 = dma.hbm_to_vmem [thread:$0]  (!%p7428_p12), %s10011_s12, 32, %s513_s5, [#allocation12]  }
  0x76   : > { %s7172_s24 = scalar_lea.vmem %s527_s28, 16  ;;  %s7179_s21 = scalar_lea.vmem %s527_s28, 32 }
  0x77   : > { %p7173_p6 = scmp.ne.s32.totalorder %s527_s28, %s7172_s24  ;;  %p7180_p4 = scmp.lt.s32.totalorder %s527_s28, %s527_s28 }
  0x78   : > { %p7181_p7 = scmp.lt.s32.totalorder %s7179_s21, %s7172_s24 }
  0x79   : > { %p7175_p2 = pnand %p7173_p6, %p7434_p13 }
  0x7a   : > { %p7182_p5 = por %p7181_p7, %p7180_p4 }
  0x7b   : > { %p7176_p9 = pneg %p7175_p2 }
  0x7d   : > { %p7183_p10 = pnand %p7182_p5, %p7176_p9 }
  0x7f   : > { %7186 = shalt.err (!%p7183_p10)
}
  0x80   : > { %6586 = dma.hbm_to_vmem [thread:$0]  (!%p7428_p12), %s10013_s14, 16, %s527_s28, [#allocation15]  }
  0x81   : > { %p10133_p8 = scmp.ne.s32.totalorder %s10124_s18, 0 }
  0x83   : > { %552 = sbr.rel (%p10133_p8) target bundleno = 4027 (0xfbb), region = 84 }
  0x88   : > { %p10134_p11 = scmp.eq.s32.totalorder %s7392_s25, 0 }
  0x8a   : > { %7230 = dma.done.wait (%p10134_p11), [#allocation3], 6144   ;;  %p10135_p13 = pmov %p10134_p11 }
  0x8b   : > { %p10136_p1 = pmov %p10134_p11 }
  0x8c   : > { %7232 = vsyncadd (%p10135_p13), [#allocation3], 4294961152 }
  0x8d   : > { %7234 = dma.done.wait (%p10136_p1), [#allocation6], 6144   ;;  %p10137_p5 = pmov %p10136_p1 }
  0x8e   : > { %p10138_p10 = pmov %p10136_p1 }
  0x8f   : > { %7236 = vsyncadd (%p10137_p5), [#allocation6], 4294961152 }
  0x90   : > { %7238 = dma.done.wait (%p10138_p10), [#allocation9], 1536   ;;  %p10139_p12 = pmov %p10136_p1 }
  0x91   : > { %p10140_p0 = pmov %p10136_p1 }
  0x92   : > { %7240 = vsyncadd (%p10139_p12), [#allocation9], 4294965760 }
  0x93   : > { %7242 = dma.done.wait (%p10140_p0), [#allocation12], 160   ;;  %p10141_p3 = pmov %p10140_p0 }
  0x94   : > { %p10142_p6 = pmov %p10140_p0 }
  0x95   : > { %7244 = vsyncadd (%p10141_p3), [#allocation12], 4294967136 }
  0x96   : > { %7246 = dma.done.wait (%p10142_p6), [#allocation15], 16   ;;  %p10143_p2 = pmov %p10140_p0 }
  0x97   : > { %s7532_s30 = sshll.u32 %s7392_s25, 5  ;;  %v10029_v0 = vmov 0   ;;  %s10144_s3 = sld [smem:[#allocation114_spill]]  ;;  %v814_v1 = vld [vmem:[%s10014_s15 + $0x70] sm:$0xff]  ;;  %v812_v2 = vld [vmem:[%s10014_s15 + $0x60] sm:$0xff]  ;;  %v815_v3 = vld [vmem:[%s10014_s15 + $0x78] sm:$0xff] }
  0x98   : > { %7248 = vsyncadd (%p10143_p2), [#allocation15], 4294967280  ;;  %p632_p9 = scmp.lt.s32.totalorder %s7532_s30, 63  ;;  %6657 = vset.pattern.permute.xlu1 %v10029_v0  ;;  %6656 = vset.pattern.permute.xlu0 %v10029_v0  ;;  %v813_v7 = vld [vmem:[%s10014_s15 + $0x68] sm:$0xff]  ;;  %v810_v8 = vld [vmem:[%s10014_s15 + $0x50] sm:$0xff]  ;;  %vm5316_vm0 = vcmask 523264   ;;  %s6041_s29 = scalar_lea.hbm %s10015_s16, %s7532_s30 }
  0x99   : > { %920 = vperm.xlu0 %6656, %v814_v1   ;;  %910 = vperm.xlu1 %6657, %v812_v2   ;;  %v811_v9 = vld [vmem:[%s10014_s15 + $0x58] sm:$0xff]  ;;  %v808_v12 = vld [vmem:[%s10014_s15 + $0x40] sm:$0xff]  ;;  %v809_v13 = vld [vmem:[%s10014_s15 + $0x48] sm:$0xff]  ;;  %vm5597_vm1 = vcmask 261120   ;;  %vm5759_vm2 = vcmask 130048   ;;  %vm5821_vm3 = vcmask 1043456  }
  0x9a   : > { %s633_s18 = scalar_select %p632_p9, %s7532_s30, 63  ;;  %v806_v14 = vld [vmem:[%s10014_s15 + $0x30] sm:$0xff]  ;;  %v807_v15 = vld [vmem:[%s10014_s15 + $0x38] sm:$0xff]  ;;  %v804_v18 = vld [vmem:[%s10014_s15 + $0x20] sm:$0xff]  ;;  %vm5817_vm4 = vcmask 64512   ;;  %vm5886_vm5 = vcmask 1041408  }
  0x9b   : > { %v805_v19 = vld [vmem:[%s10014_s15 + $0x28] sm:$0xff]  ;;  %v802_v22 = vld [vmem:[%s10014_s15 + $0x10] sm:$0xff]  ;;  %v803_v23 = vld [vmem:[%s10014_s15 + $0x18] sm:$0xff]  ;;  %vm5882_vm6 = vcmask 31744   ;;  %vm5951_vm7 = vcmask 1040384   ;;  %vm5947_vm8 = vcmask 15360  }
  0x9c   : > { %s6527_s26 = smul.u32 12, %s633_s18  ;;  %v801_v27 = vld [vmem:[%s10014_s15 + $0x8] sm:$0xff]  ;;  %v800_v28 = vld [vmem:[%s10014_s15] sm:$0xff]  ;;  %v830_v30 = vld [vmem:[%s10014_s15 + $0xf0] sm:$0xff]  ;;  %s628_s24 = sand.u32 1, %s7259_s22  }
  0x9d   : > { %925 = vperm.xlu0 %6656, %v815_v3   ;;  %915 = vperm.xlu1 %6657, %v813_v7   ;;  %v831_v32 = vld [vmem:[%s10014_s15 + $0xf8] sm:$0xff]  ;;  %v846_v36 = vld [vmem:[%s10014_s15 + $0x170] sm:$0xff]  ;;  %v828_v39 = vld [vmem:[%s10014_s15 + $0xe0] sm:$0xff]  ;;  %s6201_s21 = sshll.u32 %s628_s24, 1  ;;  %s6029_s5 = scalar_lea.sflag [#allocation4], %s628_s24 }
  0x9e   : > { %s7541_s28 = scalar_lea.vmem %s10144_s3, %s6527_s26  ;;  %v847_v35 = vld [vmem:[%s10014_s15 + $0x178] sm:$0xff]  ;;  %v829_v40 = vld [vmem:[%s10014_s15 + $0xe8] sm:$0xff]  ;;  %v844_v44 = vld [vmem:[%s10014_s15 + $0x160] sm:$0xff]  ;;  %s630_s19 = scalar_lea.vmem [#allocation16], %s6201_s21 }
  0x9f   : > { %v6658_v4 = vld [vmem:[%s7541_s28 + $0xac] ss:$12 sps:$4 sm:$0xff]   ;;  %v6660_v5 = vld [vmem:[%s7541_s28 + $0xa8] ss:$12 sps:$4 sm:$0xff]   ;;  %v6663_v10 = vld [vmem:[%s7541_s28 + $0x90] ss:$12 sps:$4 sm:$0xff]  }
  0xa0   : > { %1728 = vmatprep.subr.bf16.mxu0 %v6658_v4  ;;  %v6661_v6 = vld [vmem:[%s7541_s28 + $0x94] ss:$12 sps:$4 sm:$0xff]   ;;  %v6664_v11 = vld [vmem:[%s7541_s28 + $0x7c] ss:$12 sps:$4 sm:$0xff]   ;;  %v6666_v16 = vld [vmem:[%s7541_s28 + $0x78] ss:$12 sps:$4 sm:$0xff]  }
  0xa1   : > { %1729 = vmatpush1.bf16.xpose.msra.mxu0 %v6660_v5  ;;  %900 = vperm.xlu0 %6656, %v810_v8   ;;  %v6667_v17 = vld [vmem:[%s7541_s28 + $0x64] ss:$12 sps:$4 sm:$0xff]   ;;  %v6669_v24 = vld [vmem:[%s7541_s28 + $0x60] ss:$12 sps:$4 sm:$0xff]   ;;  %v6672_v33 = vld [vmem:[%s7541_s28 + $0x48] ss:$12 sps:$4 sm:$0xff]  }
  0xa2   : > { %1730 = vmatprep.subr.bf16.mxu0 %v6661_v6  ;;  %905 = vperm.xlu1 %6657, %v811_v9   ;;  %v6682_v20 = vld [vmem:[%s7541_s28 + $0x170] ss:$12 sps:$4 sm:$0xff]   ;;  %v6670_v25 = vld [vmem:[%s7541_s28 + $0x4c] ss:$12 sps:$4 sm:$0xff]   ;;  %v6673_v34 = vld [vmem:[%s7541_s28 + $0x34] ss:$12 sps:$4 sm:$0xff]  }
  0xa3   : > { %v6683_v21 = vld [vmem:[%s7541_s28 + $0xb0] ss:$12 sps:$4 sm:$0xff]   ;;  %6463 = vmatprep.subr.bf16.mxu1 %v6682_v20  ;;  %v6687_v26 = vld [vmem:[%s7541_s28 + $0x158] ss:$12 sps:$4 sm:$0xff]   ;;  %v6692_v31 = vld [vmem:[%s7541_s28 + $0x140] ss:$12 sps:$4 sm:$0xff]  }
  0xa4   : > { %6464 = vmatpush3.bf16.xpose.msra.mxu1 %v6683_v21  ;;  %v6688_v29 = vld [vmem:[%s7541_s28 + $0x98] ss:$12 sps:$4 sm:$0xff]   ;;  %v6693_v37 = vld [vmem:[%s7541_s28 + $0x80] ss:$12 sps:$4 sm:$0xff]   ;;  %v6697_v38 = vld [vmem:[%s7541_s28 + $0x128] ss:$12 sps:$4 sm:$0xff]  }
  0xa5   : > { %890 = vperm.xlu0 %6656, %v808_v12   ;;  %6465 = vmatprep.subr.bf16.mxu1 %v6687_v26  ;;  %v6675_v41 = vld [vmem:[%s7541_s28 + $0x30] ss:$12 sps:$4 sm:$0xff]   ;;  %v845_v43 = vld [vmem:[%s10014_s15 + $0x168] sm:$0xff]  ;;  %v6678_v49 = vld [vmem:[%s7541_s28 + $0x18] ss:$12 sps:$4 sm:$0xff]   ;;  %s6043_s27 = sshll.u32 %s630_s19, 4  ;;  %s6044_s27 = int_to_ptr.vmem [resolvable:$true] %s6043_s27 }
  0xa6   : > { %895 = vperm.xlu1 %6657, %v809_v13   ;;  %v6676_v42 = vld [vmem:[%s7541_s28 + $0x1c] ss:$12 sps:$4 sm:$0xff]   ;;  %v826_v47 = vld [vmem:[%s10014_s15 + $0xd0] sm:$0xff]  ;;  %v6707_v54 = vld [vmem:[%s7541_s28 + $0xf8] ss:$12 sps:$4 sm:$0xff]   ;;  %s7187_s3 = scalar_lea.vmem %s6044_s27, 32 }
  0xa7   : > { %v6698_v45 = vld [vmem:[%s7541_s28 + $0x68] ss:$12 sps:$4 sm:$0xff]   ;;  %v6702_v46 = vld [vmem:[%s7541_s28 + $0x110] ss:$12 sps:$4 sm:$0xff]   ;;  %v824_v55 = vld [vmem:[%s10014_s15 + $0xc0] sm:$0xff]  ;;  %p7188_p4 = scmp.ne.s32.totalorder %s6044_s27, %s7187_s3  ;;  %p10417_p7 = scmp.ne.s32.totalorder %s10121_s0, 0 }
  0xa8   : > { %v827_v48 = vld [vmem:[%s10014_s15 + $0xd8] sm:$0xff]  ;;  %v6679_v50 = vld [vmem:[%s7541_s28 + $0x4] ss:$12 sps:$4 sm:$0xff]   ;;  %v825_v56 = vld [vmem:[%s10014_s15 + $0xc8] sm:$0xff]  ;;  %s7285_s17 = smov [#allocation16]  }
  0xa9   : > { %1731 = vmatpush1.bf16.xpose.msra.mxu0 %v6663_v10  ;;  %880 = vperm.xlu0 %6656, %v806_v14   ;;  %v842_v51 = vld [vmem:[%s10014_s15 + $0x150] sm:$0xff]  ;;  %v843_v52 = vld [vmem:[%s10014_s15 + $0x158] sm:$0xff]  ;;  %v6681_v57 = vld [vmem:[%s7541_s28] ss:$12 sps:$4 sm:$0xff]   ;;  %p7189_p8 = pnand %p7188_p4, %p10417_p7 }
  0xaa   : > { %1732 = vmatprep.subr.bf16.mxu0 %v6664_v11  ;;  %885 = vperm.xlu1 %6657, %v807_v15   ;;  %v6703_v53 = vld [vmem:[%s7541_s28 + $0x50] ss:$12 sps:$4 sm:$0xff]   ;;  %v6684_v58 = vld [vmem:[%s7541_s28 + $0x16c] ss:$12 sps:$4 sm:$0xff]   ;;  %v840_v60 = vld [vmem:[%s10014_s15 + $0x140] sm:$0xff] }
  0xab   : > { %v841_v59 = vld [vmem:[%s10014_s15 + $0x148] sm:$0xff]  ;;  %v6708_v62 = vld [vmem:[%s7541_s28 + $0x38] ss:$12 sps:$4 sm:$0xff]   ;;  %v822_v2 = vld [vmem:[%s10014_s15 + $0xb0] sm:$0xff]  ;;  %p7190_p11 = pneg %p7189_p8 }
  0xac   : > { %6466 = vmatpush3.bf16.xpose.msra.mxu1 %v6688_v29  ;;  %v6722_v61 = vld [vmem:[%s10000_s1 + $0x8] ss:$12 sps:$4 sm:$0xff]   ;;  %v6712_v63 = vld [vmem:[%s7541_s28 + $0xe0] ss:$12 sps:$4 sm:$0xff]   ;;  %v6725_v1 = vld [vmem:[%s10000_s1 + $0x4] ss:$12 sps:$4 sm:$0xff]  }
  0xad   : > { %870 = vperm.xlu0 %6656, %v804_v18   ;;  %6467 = vmatprep.subr.bf16.mxu1 %v6692_v31  ;;  %v823_v3 = vld [vmem:[%s10014_s15 + $0xb8] sm:$0xff]  ;;  %v6686_v4 = vld [vmem:[%s7541_s28 + $0x168] ss:$12 sps:$4 sm:$0xff]   ;;  %v6713_v8 = vld [vmem:[%s7541_s28 + $0x20] ss:$12 sps:$4 sm:$0xff]  }
  0xae   : > { %875 = vperm.xlu1 %6657, %v805_v19   ;;  %6479 = vmatprep.mubr.bf16.mxu1 %v6722_v61  ;;  %v6689_v5 = vld [vmem:[%s7541_s28 + $0x154] ss:$12 sps:$4 sm:$0xff]   ;;  %v839_v7 = vld [vmem:[%s10014_s15 + $0x138] sm:$0xff]  ;;  %v821_v11 = vld [vmem:[%s10014_s15 + $0xa8] sm:$0xff] }
  0xaf   : > { %1760 = vmatprep.mubr.bf16.mxu0 %v6725_v1  ;;  %v838_v6 = vld [vmem:[%s10014_s15 + $0x130] sm:$0xff]  ;;  %v820_v10 = vld [vmem:[%s10014_s15 + $0xa0] sm:$0xff]  ;;  %v6694_v13 = vld [vmem:[%s7541_s28 + $0x13c] ss:$12 sps:$4 sm:$0xff]  }
  0xb0   : > { %v6717_v9 = vld [vmem:[%s7541_s28 + $0xc8] ss:$12 sps:$4 sm:$0xff]   ;;  %v6691_v12 = vld [vmem:[%s7541_s28 + $0x150] ss:$12 sps:$4 sm:$0xff]   ;;  %v836_v14 = vld [vmem:[%s10014_s15 + $0x120] sm:$0xff] }
  0xb1   : > { %1733 = vmatpush1.bf16.xpose.msra.mxu0 %v6666_v16  ;;  %860 = vperm.xlu0 %6656, %v802_v22   ;;  %v837_v15 = vld [vmem:[%s10014_s15 + $0x128] sm:$0xff]  ;;  %v819_v18 = vld [vmem:[%s10014_s15 + $0x98] sm:$0xff]  ;;  %v6699_v20 = vld [vmem:[%s7541_s28 + $0x124] ss:$12 sps:$4 sm:$0xff]  }
  0xb2   : > { %1734 = vmatprep.subr.bf16.mxu0 %v6667_v17  ;;  %865 = vperm.xlu1 %6657, %v803_v23   ;;  %v6718_v16 = vld [vmem:[%s7541_s28 + $0x8] ss:$12 sps:$4 sm:$0xff]   ;;  %v6696_v19 = vld [vmem:[%s7541_s28 + $0x138] ss:$12 sps:$4 sm:$0xff]   ;;  %v6726_v23 = vld [vmem:[%s10000_s1 + $0x20] ss:$12 sps:$4 sm:$0xff]  }
  0xb3   : > { %v818_v17 = vld [vmem:[%s10014_s15 + $0x90] sm:$0xff]  ;;  %v835_v21 = vld [vmem:[%s10014_s15 + $0x118] sm:$0xff]  ;;  %v6701_v26 = vld [vmem:[%s7541_s28 + $0x120] ss:$12 sps:$4 sm:$0xff]  }
  0xb4   : > { %6468 = vmatpush3.bf16.xpose.msra.mxu1 %v6693_v37  ;;  %v834_v22 = vld [vmem:[%s10014_s15 + $0x110] sm:$0xff]  ;;  %v833_v29 = vld [vmem:[%s10014_s15 + $0x108] sm:$0xff] }
  0xb5   : > { %850 = vperm.xlu0 %6656, %v800_v28   ;;  %6469 = vmatprep.subr.bf16.mxu1 %v6697_v38  ;;  %v832_v28 = vld [vmem:[%s10014_s15 + $0x100] sm:$0xff]  ;;  %v2592_v31 = vld [vmem:[%s10014_s15 + $0x1f0] sm:$0xff] }
  0xb6   : > { %855 = vperm.xlu1 %6657, %v801_v27   ;;  %v6704_v27 = vld [vmem:[%s7541_s28 + $0x10c] ss:$12 sps:$4 sm:$0xff]   ;;  %v6734_v37 = vld [vmem:[%s10000_s1 + $0x50] ss:$12 sps:$4 sm:$0xff]  }
  0xb7   : > { %v2588_v38 = vld [vmem:[%s10014_s15 + $0x1d0] sm:$0xff] }
  0xb9   : > { %1735 = vmatpush1.bf16.xpose.msra.mxu0 %v6669_v24  ;;  %1000 = vperm.xlu0 %6656, %v830_v30   ;;  %v816_v24 = vld [vmem:[%s10014_s15 + $0x80] sm:$0xff] }
  0xba   : > { %1736 = vmatprep.subr.bf16.mxu0 %v6670_v25  ;;  %1005 = vperm.xlu1 %6657, %v831_v32   ;;  %v817_v25 = vld [vmem:[%s10014_s15 + $0x88] sm:$0xff]  ;;  %v6730_v30 = vld [vmem:[%s10000_s1 + $0x38] ss:$12 sps:$4 sm:$0xff]  }
  0xbb   : > { %v2593_v32 = vld [vmem:[%s10014_s15 + $0x1f8] sm:$0xff] }
  0xbc   : > { %6470 = vmatpush3.bf16.xpose.msra.mxu1 %v6698_v45  ;;  %v2584_v45 = vld [vmem:[%s10014_s15 + $0x1b0] sm:$0xff] }
  0xbd   : > { %1080 = vperm.xlu0 %6656, %v846_v36   ;;  %6471 = vmatprep.subr.bf16.mxu1 %v6702_v46  ;;  %v2590_v36 = vld [vmem:[%s10014_s15 + $0x1e0] sm:$0xff]  ;;  %v2585_v46 = vld [vmem:[%s10014_s15 + $0x1b8] sm:$0xff] }
  0xbe   : > { %1085 = vperm.xlu1 %6657, %v847_v35   ;;  %v2591_v35 = vld [vmem:[%s10014_s15 + $0x1e8] sm:$0xff] }
  0xc1   : > { %1737 = vmatpush1.bf16.xpose.msra.mxu0 %v6672_v33  ;;  %990 = vperm.xlu0 %6656, %v828_v39   ;;  %v6706_v33 = vld [vmem:[%s7541_s28 + $0x108] ss:$12 sps:$4 sm:$0xff]   ;;  %v2589_v39 = vld [vmem:[%s10014_s15 + $0x1d8] sm:$0xff] }
  0xc2   : > { %1738 = vmatprep.subr.bf16.mxu0 %v6673_v34  ;;  %995 = vperm.xlu1 %6657, %v829_v40   ;;  %v6709_v34 = vld [vmem:[%s7541_s28 + $0xf4] ss:$12 sps:$4 sm:$0xff]   ;;  %v6711_v40 = vld [vmem:[%s7541_s28 + $0xf0] ss:$12 sps:$4 sm:$0xff]  }
  0xc4   : > { %6472 = vmatpush3.bf16.xpose.msra.mxu1 %v6703_v53  ;;  %v2580_v53 = vld [vmem:[%s10014_s15 + $0x190] sm:$0xff] }
  0xc5   : > { %1070 = vperm.xlu0 %6656, %v844_v44   ;;  %6473 = vmatprep.subr.bf16.mxu1 %v6707_v54  ;;  %v6738_v44 = vld [vmem:[%s10000_s1 + $0x68] ss:$12 sps:$4 sm:$0xff]   ;;  %v6721_v54 = vld [vmem:[%s7541_s28 + $0xc0] ss:$12 sps:$4 sm:$0xff]  }
  0xc6   : > { %1075 = vperm.xlu1 %6657, %v845_v43   ;;  %v2587_v43 = vld [vmem:[%s10014_s15 + $0x1c8] sm:$0xff] }
  0xc9   : > { %1739 = vmatpush1.bf16.xpose.msra.mxu0 %v6675_v41  ;;  %980 = vperm.xlu0 %6656, %v826_v47   ;;  %v6714_v41 = vld [vmem:[%s7541_s28 + $0xdc] ss:$12 sps:$4 sm:$0xff]   ;;  %v6716_v47 = vld [vmem:[%s7541_s28 + $0xd8] ss:$12 sps:$4 sm:$0xff]  }
  0xca   : > { %1740 = vmatprep.subr.bf16.mxu0 %v6676_v42  ;;  %985 = vperm.xlu1 %6657, %v827_v48   ;;  %v2586_v42 = vld [vmem:[%s10014_s15 + $0x1c0] sm:$0xff] }
  0xcb   : > { %v6719_v48 = vld [vmem:[%s7541_s28 + $0xc4] ss:$12 sps:$4 sm:$0xff]   ;;  %s7191_s28 = sshll.u32 %s7285_s17, 4  ;;  %s7192_s28 = int_to_ptr.vmem [resolvable:$false] %s7191_s28 }
  0xcc   : > { %6474 = vmatpush3.bf16.xpose.msra.mxu1 %v6708_v62  ;;  %v2608_v62 = vld [vmem:[%s10014_s15 + $0x270] sm:$0xff]  ;;  %s7193_s20 = scalar_lea.vmem %s7192_s28, 64  ;;  %p7194_p13 = scmp.lt.s32.totalorder %s6044_s27, %s7192_s28 }
  0xcd   : > { %1060 = vperm.xlu0 %6656, %v842_v51   ;;  %6475 = vmatprep.subr.bf16.mxu1 %v6712_v63  ;;  %v6742_v51 = vld [vmem:[%s10000_s1 + $0x80] ss:$12 sps:$4 sm:$0xff]   ;;  %v6727_v63 = vld [vmem:[%s10000_s1 + $0x1c] ss:$12 sps:$4 sm:$0xff]   ;;  %p7195_p1 = scmp.lt.s32.totalorder %s7193_s20, %s7187_s3 }
  0xce   : > { %1065 = vperm.xlu1 %6657, %v843_v52   ;;  %v2581_v52 = vld [vmem:[%s10014_s15 + $0x198] sm:$0xff] }
  0xcf   : > { %p7196_p5 = por %p7195_p1, %p7194_p13 }
  0xd1   : > { %1741 = vmatpush1.bf16.xpose.msra.mxu0 %v6678_v49  ;;  %970 = vperm.xlu0 %6656, %v824_v55   ;;  %v2582_v49 = vld [vmem:[%s10014_s15 + $0x1a0] sm:$0xff]  ;;  %p7197_p10 = pnand %p7196_p5, %p7190_p11 }
  0xd2   : > { %1742 = vmatprep.subr.bf16.mxu0 %v6679_v50  ;;  %975 = vperm.xlu1 %6657, %v825_v56   ;;  %v2583_v50 = vld [vmem:[%s10014_s15 + $0x1a8] sm:$0xff]  ;;  %v2578_v55 = vld [vmem:[%s10014_s15 + $0x180] sm:$0xff] }
  0xd3   : > { %v2579_v56 = vld [vmem:[%s10014_s15 + $0x188] sm:$0xff] }
  0xd4   : > { %6476 = vmatpush3.bf16.xpose.msra.mxu1 %v6713_v8  ;;  %v2604_v8 = vld [vmem:[%s10014_s15 + $0x250] sm:$0xff] }
  0xd5   : > { %1050 = vperm.xlu0 %6656, %v840_v60   ;;  %6477 = vmatprep.subr.bf16.mxu1 %v6717_v9  ;;  %v6723_v60 = vld [vmem:[%s10000_s1] ss:$12 sps:$4 sm:$0xff]  }
  0xd6   : > { %1055 = vperm.xlu1 %6657, %v841_v59   ;;  %v6731_v9 = vld [vmem:[%s10000_s1 + $0x34] ss:$12 sps:$4 sm:$0xff]  }
  0xd9   : > { %1743 = vmatpush1.bf16.xpose.msra.mxu0 %v6681_v57  ;;  %960 = vperm.xlu0 %6656, %v822_v2   ;;  %v6746_v57 = vld [vmem:[%s10000_s1 + $0x98] ss:$12 sps:$4 sm:$0xff]  }
  0xda   : > { %1744 = vmatprep.subr.bf16.mxu0 %v6684_v58  ;;  %965 = vperm.xlu1 %6657, %v823_v3   ;;  %v2606_v2 = vld [vmem:[%s10014_s15 + $0x260] sm:$0xff] }
  0xdc   : > { %6478 = vmatpush3.bf16.xpose.msra.mxu1 %v6718_v16  ;;  %v6733_v16 = vld [vmem:[%s10000_s1 + $0x30] ss:$12 sps:$4 sm:$0xff]  }
  0xdd   : > { %1040 = vperm.xlu0 %6656, %v838_v6   ;;  %v6729_v6 = vld [vmem:[%s10000_s1 + $0x18] ss:$12 sps:$4 sm:$0xff]  }
  0xde   : > { %1045 = vperm.xlu1 %6657, %v839_v7   ;;  %v2605_v7 = vld [vmem:[%s10014_s15 + $0x258] sm:$0xff] }
  0xe1   : > { %1745 = vmatpush2.bf16.xpose.msra.mxu0 %v6686_v4  ;;  %950 = vperm.xlu0 %6656, %v820_v10   ;;  %v2607_v4 = vld [vmem:[%s10014_s15 + $0x268] sm:$0xff] }
  0xe2   : > { %1746 = vmatprep.subr.bf16.mxu0 %v6689_v5  ;;  %955 = vperm.xlu1 %6657, %v821_v11   ;;  %v6750_v5 = vld [vmem:[%s10000_s1 + $0xb0] ss:$12 sps:$4 sm:$0xff]  }
  0xe3   : > { %6480 = vmatmul.mubr.bf16.vlgmr.msra.gmra.mxu1 %v6722_v61  ;;  %v2609_v61 = vld [vmem:[%s10014_s15 + $0x278] sm:$0xff] }
  0xe4   : > { %6481 = vmatprep.mubr.bf16.mxu1 %v6726_v23 }
  0xe5   : > { %1030 = vperm.xlu0 %6656, %v836_v14   ;;  %v6754_v14 = vld [vmem:[%s10000_s1 + $0xc8] ss:$12 sps:$4 sm:$0xff]  }
  0xe6   : > { %1035 = vperm.xlu1 %6657, %v837_v15  }
  0xe9   : > { %1747 = vmatpush2.bf16.xpose.msra.mxu0 %v6691_v12  ;;  %940 = vperm.xlu0 %6656, %v818_v17   ;;  %v2602_v12 = vld [vmem:[%s10014_s15 + $0x240] sm:$0xff]  ;;  %v2601_v17 = vld [vmem:[%s10014_s15 + $0x238] sm:$0xff] }
  0xea   : > { %1748 = vmatprep.subr.bf16.mxu0 %v6694_v13  ;;  %945 = vperm.xlu1 %6657, %v819_v18   ;;  %v2603_v13 = vld [vmem:[%s10014_s15 + $0x248] sm:$0xff]  ;;  %v2600_v18 = vld [vmem:[%s10014_s15 + $0x230] sm:$0xff] }
  0xeb   : > { %6482 = vmatmul.mubr.bf16.gmra.mxu1 %v6726_v23  ;;  %v2599_v23 = vld [vmem:[%s10014_s15 + $0x228] sm:$0xff] }
  0xec   : > { %6483 = vmatprep.mubr.bf16.mxu1 %v6730_v30 }
  0xed   : > { %1020 = vperm.xlu0 %6656, %v834_v22  }
  0xee   : > { %1025 = vperm.xlu1 %6657, %v835_v21   ;;  %v2598_v21 = vld [vmem:[%s10014_s15 + $0x220] sm:$0xff] }
  0xf1   : > { %1749 = vmatpush2.bf16.xpose.msra.mxu0 %v6696_v19  ;;  %930 = vperm.xlu0 %6656, %v816_v24   ;;  %v6758_v24 = vld [vmem:[%s10000_s1 + $0xe0] ss:$12 sps:$4 sm:$0xff]  }
  0xf2   : > { %1750 = vmatprep.subr.bf16.mxu0 %v6699_v20  ;;  %935 = vperm.xlu1 %6657, %v817_v25   ;;  %v6735_v20 = vld [vmem:[%s10000_s1 + $0x4c] ss:$12 sps:$4 sm:$0xff]  }
  0xf3   : > { %6484 = vmatmul.mubr.bf16.gmra.mxu1 %v6730_v30 }
  0xf4   : > { %6485 = vmatprep.mubr.bf16.mxu1 %v6734_v37 }
  0xf5   : > { %1010 = vperm.xlu0 %6656, %v832_v28   ;;  %v2596_v28 = vld [vmem:[%s10014_s15 + $0x210] sm:$0xff] }
  0xf6   : > { %1015 = vperm.xlu1 %6657, %v833_v29   ;;  %v6739_v29 = vld [vmem:[%s10000_s1 + $0x64] ss:$12 sps:$4 sm:$0xff]  }
  0xf9   : > { %1751 = vmatpush2.bf16.xpose.msra.mxu0 %v6701_v26  ;;  %2682 = vperm.xlu0 %6656, %v2592_v31   ;;  %v6737_v26 = vld [vmem:[%s10000_s1 + $0x48] ss:$12 sps:$4 sm:$0xff]   ;;  %v2594_v31 = vld [vmem:[%s10014_s15 + $0x200] sm:$0xff] }
  0xfa   : > { %1752 = vmatprep.subr.bf16.mxu0 %v6704_v27  ;;  %2687 = vperm.xlu1 %6657, %v2593_v32   ;;  %v2597_v27 = vld [vmem:[%s10014_s15 + $0x218] sm:$0xff] }
  0xfb   : > { %6486 = vmatmul.mubr.bf16.gmra.mxu1 %v6734_v37  ;;  %v3618_v37 = vld [vmem:[%s10014_s15 + $0x2f0] sm:$0xff] }
  0xfc   : > { %6487 = vmatprep.mubr.bf16.mxu1 %v6738_v44 }
  0xfd   : > { %2672 = vperm.xlu0 %6656, %v2590_v36   ;;  %v3619_v36 = vld [vmem:[%s10014_s15 + $0x2f8] sm:$0xff] }
  0xfe   : > { %2677 = vperm.xlu1 %6657, %v2591_v35   ;;  %v6741_v35 = vld [vmem:[%s10000_s1 + $0x60] ss:$12 sps:$4 sm:$0xff]  }
 0x101   : > { %1753 = vmatpush2.bf16.xpose.msra.mxu0 %v6706_v33  ;;  %2662 = vperm.xlu0 %6656, %v2588_v38   ;;  %v2595_v33 = vld [vmem:[%s10014_s15 + $0x208] sm:$0xff] }
 0x102   : > { %1754 = vmatprep.subr.bf16.mxu0 %v6709_v34  ;;  %2667 = vperm.xlu1 %6657, %v2589_v39   ;;  %v6762_v34 = vld [vmem:[%s10000_s1 + $0xf8] ss:$12 sps:$4 sm:$0xff]   ;;  %v6743_v38 = vld [vmem:[%s10000_s1 + $0x7c] ss:$12 sps:$4 sm:$0xff]  }
 0x103   : > { %6488 = vmatmul.mubr.bf16.gmra.mxu1 %v6738_v44 }
 0x104   : > { %6489 = vmatprep.mubr.bf16.mxu1 %v6742_v51 }
 0x105   : > { %2652 = vperm.xlu0 %6656, %v2586_v42   ;;  %v3617_v42 = vld [vmem:[%s10014_s15 + $0x2e8] sm:$0xff] }
 0x106   : > { %2657 = vperm.xlu1 %6657, %v2587_v43   ;;  %v6766_v43 = vld [vmem:[%s10000_s1 + $0x110] ss:$12 sps:$4 sm:$0xff]  }
 0x109   : > { %1755 = vmatpush2.bf16.xpose.msra.mxu0 %v6711_v40  ;;  %2642 = vperm.xlu0 %6656, %v2584_v45   ;;  %v6745_v45 = vld [vmem:[%s10000_s1 + $0x78] ss:$12 sps:$4 sm:$0xff]  }
 0x10a   : > { %1756 = vmatprep.subr.bf16.mxu0 %v6714_v41  ;;  %2647 = vperm.xlu1 %6657, %v2585_v46   ;;  %v3616_v41 = vld [vmem:[%s10014_s15 + $0x2e0] sm:$0xff]  ;;  %v3615_v46 = vld [vmem:[%s10014_s15 + $0x2d8] sm:$0xff] }
 0x10b   : > { %6490 = vmatmul.mubr.bf16.gmra.mxu1 %v6742_v51 }
 0x10c   : > { %6491 = vmatprep.mubr.bf16.mxu1 %v6746_v57 }
 0x10d   : > { %2632 = vperm.xlu0 %6656, %v2582_v49   ;;  %v6747_v49 = vld [vmem:[%s10000_s1 + $0x94] ss:$12 sps:$4 sm:$0xff]  }
 0x10e   : > { %2637 = vperm.xlu1 %6657, %v2583_v50   ;;  %v3612_v50 = vld [vmem:[%s10014_s15 + $0x2c0] sm:$0xff] }
 0x111   : > { %1757 = vmatpush2.bf16.xpose.msra.mxu0 %v6716_v47  ;;  %2622 = vperm.xlu0 %6656, %v2580_v53   ;;  %v3614_v47 = vld [vmem:[%s10014_s15 + $0x2d0] sm:$0xff] }
 0x112   : > { %1758 = vmatprep.subr.bf16.mxu0 %v6719_v48  ;;  %2627 = vperm.xlu1 %6657, %v2581_v52   ;;  %v3613_v52 = vld [vmem:[%s10014_s15 + $0x2c8] sm:$0xff] }
 0x113   : > { %6492 = vmatmul.mubr.bf16.gmra.mxu1 %v6746_v57  ;;  %v6770_v53 = vld [vmem:[%s10000_s1 + $0x128] ss:$12 sps:$4 sm:$0xff]  }
 0x114   : > { %v7807_v58 = vpop.permute.xlu0 %920  ;;  %v7809_v59 = vpop.permute.xlu1 %910  ;;  %6493 = vmatprep.mubr.bf16.mxu1 %v6750_v5  ;;  %v3610_v57 = vld [vmem:[%s10014_s15 + $0x2b0] sm:$0xff] }
 0x115   : > { %2612 = vperm.xlu0 %6656, %v2578_v55   ;;  %v6749_v55 = vld [vmem:[%s10000_s1 + $0x90] ss:$12 sps:$4 sm:$0xff]  }
 0x116   : > { %2617 = vperm.xlu1 %6657, %v2579_v56   ;;  %v3611_v56 = vld [vmem:[%s10014_s15 + $0x2b8] sm:$0xff] }
 0x118   : > { %v7823_v1 = vpop.permute.xlu0 %925  ;;  %v7828_v3 = vpop.permute.xlu1 %915 }
 0x119   : > { %1759 = vmatpush2.bf16.xpose.msra.mxu0 %v6721_v54  ;;  %2762 = vperm.xlu0 %6656, %v2608_v62   ;;  %v3608_v62 = vld [vmem:[%s10014_s15 + $0x2a0] sm:$0xff] }
 0x11a   : > { %2767 = vperm.xlu1 %6657, %v2609_v61  }
 0x11b   : > { %6494 = vmatmul.mubr.bf16.gmra.mxu1 %v6750_v5  ;;  %v6753_v5 = vld [vmem:[%s10000_s1 + $0xa8] ss:$12 sps:$4 sm:$0xff]  }
 0x11c   : > { %v7848_v10 = vpop.permute.xlu0 %900  ;;  %6495 = vmatprep.mubr.bf16.mxu1 %v6754_v14 }
 0x11d   : > { %2752 = vperm.xlu0 %6656, %v2606_v2   ;;  %v7850_v11 = vpop.permute.xlu1 %905  ;;  %v3609_v2 = vld [vmem:[%s10014_s15 + $0x2a8] sm:$0xff] }
 0x11e   : > { %2757 = vperm.xlu1 %6657, %v2607_v4   ;;  %v6774_v4 = vld [vmem:[%s10000_s1 + $0x140] ss:$12 sps:$4 sm:$0xff]  }
 0x120   : > { %1761 = vmatmul.mubr.bf16.vlgmr.msra.gmra.mxu0 %v6723_v60  ;;  %v7861_v15 = vpop.permute.xlu0 %890  ;;  %v6751_v60 = vld [vmem:[%s10000_s1 + $0xac] ss:$12 sps:$4 sm:$0xff]  }
 0x121   : > { %1770 = vmatprep.mubr.bf16.mxu0 %v6727_v63  ;;  %2742 = vperm.xlu0 %6656, %v2604_v8   ;;  %v7872_v19 = vpop.permute.xlu1 %895  ;;  %v6755_v8 = vld [vmem:[%s10000_s1 + $0xc4] ss:$12 sps:$4 sm:$0xff]  }
 0x122   : > { %2747 = vperm.xlu1 %6657, %v2605_v7   ;;  %v3606_v7 = vld [vmem:[%s10014_s15 + $0x290] sm:$0xff] }
 0x123   : > { %6496 = vmatmul.mubr.bf16.gmra.mxu1 %v6754_v14  ;;  %v3604_v14 = vld [vmem:[%s10014_s15 + $0x280] sm:$0xff] }
 0x124   : > { %v7880_v22 = vpop.permute.xlu0 %880  ;;  %6497 = vmatprep.mubr.bf16.mxu1 %v6758_v24 }
 0x125   : > { %2732 = vperm.xlu0 %6656, %v2602_v12   ;;  %v7888_v25 = vpop.permute.xlu1 %885 }
 0x126   : > { %2737 = vperm.xlu1 %6657, %v2603_v13   ;;  %v3605_v13 = vld [vmem:[%s10014_s15 + $0x288] sm:$0xff] }
 0x128   : > { %1771 = vmatmul.mubr.bf16.gmra.mxu0 %v6729_v6  ;;  %v7902_v30 = vpop.permute.xlu0 %870  ;;  %v3607_v6 = vld [vmem:[%s10014_s15 + $0x298] sm:$0xff] }
 0x129   : > { %1780 = vmatprep.mubr.bf16.mxu0 %v6731_v9  ;;  %2722 = vperm.xlu0 %6656, %v2600_v18   ;;  %v7907_v32 = vpop.permute.xlu1 %875  ;;  %v6757_v18 = vld [vmem:[%s10000_s1 + $0xc0] ss:$12 sps:$4 sm:$0xff]  }
 0x12a   : > { %2727 = vperm.xlu1 %6657, %v2601_v17  }
 0x12b   : > { %6498 = vmatmul.mubr.bf16.gmra.mxu1 %v6758_v24  ;;  %v6759_v24 = vld [vmem:[%s10000_s1 + $0xdc] ss:$12 sps:$4 sm:$0xff]  }
 0x12c   : > { %v7927_v39 = vpop.permute.xlu0 %860  ;;  %6499 = vmatprep.mubr.bf16.mxu1 %v6762_v34 }
 0x12d   : > { %2712 = vperm.xlu0 %6656, %v2598_v21   ;;  %v7929_v40 = vpop.permute.xlu1 %865  ;;  %v3634_v21 = vld [vmem:[%s10014_s15 + $0x370] sm:$0xff] }
 0x12e   : > { %2717 = vperm.xlu1 %6657, %v2599_v23  }
 0x130   : > { %1781 = vmatmul.mubr.bf16.gmra.mxu0 %v6733_v16  ;;  %v7940_v44 = vpop.permute.xlu0 %850  ;;  %v6778_v16 = vld [vmem:[%s10000_s1 + $0x158] ss:$12 sps:$4 sm:$0xff]  }
 0x131   : > { %1790 = vmatprep.mubr.bf16.mxu0 %v6735_v20  ;;  %2702 = vperm.xlu0 %6656, %v2596_v28   ;;  %v7951_v48 = vpop.permute.xlu1 %855  ;;  %v3635_v20 = vld [vmem:[%s10014_s15 + $0x378] sm:$0xff] }
 0x132   : > { %2707 = vperm.xlu1 %6657, %v2597_v27   ;;  %v3632_v27 = vld [vmem:[%s10014_s15 + $0x360] sm:$0xff]  ;;  %v6782_v28 = vld [vmem:[%s10000_s1 + $0x170] ss:$12 sps:$4 sm:$0xff]  }
 0x133   : > { %6500 = vmatmul.mubr.bf16.gmra.mxu1 %v6762_v34  ;;  %v6761_v34 = vld [vmem:[%s10000_s1 + $0xd8] ss:$12 sps:$4 sm:$0xff]  }
 0x134   : > { %6501 = vmatprep.mubr.bf16.mxu1 %v6766_v43  ;;  %v7959_v51 = vpop.permute.xlu0 %1000 }
 0x135   : > { %2692 = vperm.xlu0 %6656, %v2594_v31   ;;  %10145 = vst [vmem:[#allocation29_spill] sm:$0xff] %v7959_v51  ;;  %v7967_v54 = vpop.permute.xlu1 %1005 }
 0x136   : > { %2697 = vperm.xlu1 %6657, %v2595_v33   ;;  %10146 = vst [vmem:[#allocation30_spill] sm:$0xff] %v7967_v54  ;;  %v3630_v33 = vld [vmem:[%s10014_s15 + $0x350] sm:$0xff] }
 0x138   : > { %1791 = vmatmul.mubr.bf16.gmra.mxu0 %v6737_v26  ;;  %v7981_v61 = vpop.permute.xlu0 %1080  ;;  %v3633_v26 = vld [vmem:[%s10014_s15 + $0x368] sm:$0xff] }
 0x139   : > { %1800 = vmatprep.mubr.bf16.mxu0 %v6739_v29  ;;  %3708 = vperm.xlu0 %6656, %v3618_v37   ;;  %10147 = vst [vmem:[#allocation31_spill] sm:$0xff] %v7981_v61  ;;  %v7986_v63 = vpop.permute.xlu1 %1085 }
 0x13a   : > { %3713 = vperm.xlu1 %6657, %v3619_v36   ;;  %10148 = vst [vmem:[#allocation32_spill] sm:$0xff] %v7986_v63  ;;  %v6763_v36 = vld [vmem:[%s10000_s1 + $0xf4] ss:$12 sps:$4 sm:$0xff]  }
 0x13b   : > { %6502 = vmatmul.mubr.bf16.gmra.mxu1 %v6766_v43  ;;  %v6786_v43 = vld [vmem:[%s10000_s1 + $0x188] ss:$12 sps:$4 sm:$0xff]  }
 0x13c   : > { %6503 = vmatprep.mubr.bf16.mxu1 %v6770_v53  ;;  %v8006_v9 = vpop.permute.xlu0 %990 }
 0x13d   : > { %3698 = vperm.xlu0 %6656, %v3616_v41   ;;  %10149 = vst [vmem:[#allocation33_spill] sm:$0xff] %v8006_v9  ;;  %v8008_v12 = vpop.permute.xlu1 %995  ;;  %v3628_v41 = vld [vmem:[%s10014_s15 + $0x340] sm:$0xff] }
 0x13e   : > { %3703 = vperm.xlu1 %6657, %v3617_v42   ;;  %10150 = vst [vmem:[#allocation34_spill] sm:$0xff] %v8008_v12  ;;  %v3629_v42 = vld [vmem:[%s10014_s15 + $0x348] sm:$0xff] }
 0x140   : > { %1801 = vmatmul.mubr.bf16.gmra.mxu0 %v6741_v35  ;;  %v8019_v17 = vpop.permute.xlu0 %1070  ;;  %v3631_v35 = vld [vmem:[%s10014_s15 + $0x358] sm:$0xff] }
 0x141   : > { %1810 = vmatprep.mubr.bf16.mxu0 %v6743_v38  ;;  %3688 = vperm.xlu0 %6656, %v3614_v47   ;;  %10151 = vst [vmem:[#allocation35_spill] sm:$0xff] %v8019_v17  ;;  %v8030_v23 = vpop.permute.xlu1 %1075  ;;  %v6765_v47 = vld [vmem:[%s10000_s1 + $0xf0] ss:$12 sps:$4 sm:$0xff]  }
 0x142   : > { %3693 = vperm.xlu1 %6657, %v3615_v46   ;;  %10152 = vst [vmem:[#allocation36_spill] sm:$0xff] %v8030_v23 }
 0x143   : > { %6504 = vmatmul.mubr.bf16.gmra.mxu1 %v6770_v53  ;;  %v3624_v53 = vld [vmem:[%s10014_s15 + $0x320] sm:$0xff] }
 0x144   : > { %6505 = vmatprep.mubr.bf16.mxu1 %v6774_v4  ;;  %v8044_v29 = vpop.permute.xlu0 %980 }
 0x145   : > { %3678 = vperm.xlu0 %6656, %v3612_v50   ;;  %10153 = vst [vmem:[#allocation37_spill] sm:$0xff] %v8044_v29  ;;  %v8046_v31 = vpop.permute.xlu1 %985 }
 0x146   : > { %3683 = vperm.xlu1 %6657, %v3613_v52   ;;  %10154 = vst [vmem:[#allocation38_spill] sm:$0xff] %v8046_v31  ;;  %v6767_v52 = vld [vmem:[%s10000_s1 + $0x10c] ss:$12 sps:$4 sm:$0xff]  }
 0x148   : > { %1811 = vmatmul.mubr.bf16.gmra.mxu0 %v6745_v45  ;;  %v8060_v37 = vpop.permute.xlu0 %1060  ;;  %v3626_v45 = vld [vmem:[%s10014_s15 + $0x330] sm:$0xff] }
 0x149   : > { %1820 = vmatprep.mubr.bf16.mxu0 %v6747_v49  ;;  %3668 = vperm.xlu0 %6656, %v3610_v57   ;;  %10155 = vst [vmem:[#allocation39_spill] sm:$0xff] %v8060_v37  ;;  %v8062_v38 = vpop.permute.xlu1 %1065  ;;  %v3627_v49 = vld [vmem:[%s10014_s15 + $0x338] sm:$0xff] }
 0x14a   : > { %3673 = vperm.xlu1 %6657, %v3611_v56   ;;  %10156 = vst [vmem:[#allocation40_spill] sm:$0xff] %v8062_v38  ;;  %v6790_v56 = vld [vmem:[%s10000_s1 + $0x1a0] ss:$12 sps:$4 sm:$0xff]  }
 0x14b   : > { %6506 = vmatmul.mubr.bf16.gmra.mxu1 %v6774_v4  ;;  %v3623_v4 = vld [vmem:[%s10014_s15 + $0x318] sm:$0xff] }
 0x14c   : > { %6507 = vmatprep.mubr.bf16.mxu1 %v6778_v16  ;;  %v8076_v46 = vpop.permute.xlu0 %970 }
 0x14d   : > { %3658 = vperm.xlu0 %6656, %v3608_v62   ;;  %10157 = vst [vmem:[#allocation41_spill] sm:$0xff] %v8076_v46  ;;  %v8084_v50 = vpop.permute.xlu1 %975  ;;  %v3622_v62 = vld [vmem:[%s10014_s15 + $0x310] sm:$0xff] }
 0x14e   : > { %3663 = vperm.xlu1 %6657, %v3609_v2   ;;  %10158 = vst [vmem:[#allocation42_spill] sm:$0xff] %v8084_v50  ;;  %v6769_v2 = vld [vmem:[%s10000_s1 + $0x108] ss:$12 sps:$4 sm:$0xff]  }
 0x150   : > { %1821 = vmatmul.mubr.bf16.gmra.mxu0 %v6749_v55  ;;  %v3625_v55 = vld [vmem:[%s10014_s15 + $0x328] sm:$0xff]  ;;  %v8098_v57 = vpop.permute.xlu0 %1050 }
 0x151   : > { %1830 = vmatprep.mubr.bf16.mxu0 %v6751_v60  ;;  %3648 = vperm.xlu0 %6656, %v3606_v7   ;;  %10159 = vst [vmem:[#allocation43_spill] sm:$0xff] %v8098_v57  ;;  %v8100_v60 = vpop.permute.xlu1 %1055  ;;  %v5056_v57 = vld [vmem:[%s10014_s15 + $0x488] sm:$0xff] }
 0x152   : > { %3653 = vperm.xlu1 %6657, %v3607_v6   ;;  %10160 = vst [vmem:[#allocation44_spill] sm:$0xff] %v8100_v60  ;;  %v3620_v6 = vld [vmem:[%s10014_s15 + $0x300] sm:$0xff] }
 0x153   : > { %6508 = vmatmul.mubr.bf16.gmra.mxu1 %v6778_v16  ;;  %v4339_v16 = vld [vmem:[%s10014_s15 + $0x3f0] sm:$0xff]  ;;  %v5055_v60 = vld [vmem:[%s10014_s15 + $0x480] sm:$0xff] }
 0x154   : > { %6509 = vmatprep.mubr.bf16.mxu1 %v6782_v28  ;;  %v8117_v7 = vpop.permute.xlu0 %960 }
 0x155   : > { %3638 = vperm.xlu0 %6656, %v3604_v14   ;;  %10161 = vst [vmem:[#allocation45_spill] sm:$0xff] %v8117_v7  ;;  %v8125_v14 = vpop.permute.xlu1 %965  ;;  %v5679_v7 = vld [vmem:[%s10014_s15 + $0x540] sm:$0xff] }
 0x156   : > { %3643 = vperm.xlu1 %6657, %v3605_v13   ;;  %v6794_v13 = vld [vmem:[%s10000_s1 + $0x1b8] ss:$12 sps:$4 sm:$0xff]   ;;  %10162 = vst [vmem:[#allocation46_spill] sm:$0xff] %v8125_v14 }
 0x158   : > { %1831 = vmatmul.mubr.bf16.gmra.mxu0 %v6753_v5  ;;  %v6771_v5 = vld [vmem:[%s10000_s1 + $0x124] ss:$12 sps:$4 sm:$0xff]  }
 0x159   : > { %1840 = vmatprep.mubr.bf16.mxu0 %v6755_v8  ;;  %3788 = vperm.xlu0 %6656, %v3634_v21   ;;  %v3621_v8 = vld [vmem:[%s10014_s15 + $0x308] sm:$0xff] }
 0x15a   : > { %3793 = vperm.xlu1 %6657, %v3635_v20   ;;  %v4340_v20 = vld [vmem:[%s10014_s15 + $0x3f8] sm:$0xff] }
 0x15b   : > { %6510 = vmatmul.mubr.bf16.gmra.mxu1 %v6782_v28  ;;  %v6775_v21 = vld [vmem:[%s10000_s1 + $0x13c] ss:$12 sps:$4 sm:$0xff]  }
 0x15c   : > { %6511 = vmatprep.mubr.bf16.mxu1 %v6786_v43  ;;  %v4338_v28 = vld [vmem:[%s10014_s15 + $0x3e8] sm:$0xff] }
 0x15d   : > { %3778 = vperm.xlu0 %6656, %v3632_v27   ;;  %v4337_v27 = vld [vmem:[%s10014_s15 + $0x3e0] sm:$0xff] }
 0x15e   : > { %3783 = vperm.xlu1 %6657, %v3633_v26   ;;  %v8141_v26 = vpop.permute.xlu1 %1045 }
 0x15f   : > { %10164 = vst [vmem:[#allocation48_spill] sm:$0xff] %v8141_v26  ;;  %v5253_v26 = vld [vmem:[%s10014_s15 + $0x4e8] sm:$0xff] }
 0x160   : > { %1841 = vmatmul.mubr.bf16.gmra.mxu0 %v6757_v18  ;;  %v6773_v18 = vld [vmem:[%s10000_s1 + $0x120] ss:$12 sps:$4 sm:$0xff]  }
 0x161   : > { %1850 = vmatprep.mubr.bf16.mxu0 %v6759_v24  ;;  %3768 = vperm.xlu0 %6656, %v3630_v33   ;;  %v8139_v24 = vpop.permute.xlu0 %1040  ;;  %v6798_v33 = vld [vmem:[%s10000_s1 + $0x1d0] ss:$12 sps:$4 sm:$0xff]  }
 0x162   : > { %3773 = vperm.xlu1 %6657, %v3631_v35   ;;  %10163 = vst [vmem:[#allocation47_spill] sm:$0xff] %v8139_v24 }
 0x163   : > { %6512 = vmatmul.mubr.bf16.gmra.mxu1 %v6786_v43  ;;  %v6779_v43 = vld [vmem:[%s10000_s1 + $0x154] ss:$12 sps:$4 sm:$0xff]  }
 0x164   : > { %6513 = vmatprep.mubr.bf16.mxu1 %v6790_v56 }
 0x165   : > { %3758 = vperm.xlu0 %6656, %v3628_v41   ;;  %v8155_v35 = vpop.permute.xlu0 %950  ;;  %v4336_v41 = vld [vmem:[%s10014_s15 + $0x3d8] sm:$0xff] }
 0x166   : > { %3763 = vperm.xlu1 %6657, %v3629_v42   ;;  %10165 = vst [vmem:[#allocation49_spill] sm:$0xff] %v8155_v35  ;;  %v8163_v42 = vpop.permute.xlu1 %955 }
 0x167   : > { %10166 = vst [vmem:[#allocation50_spill] sm:$0xff] %v8163_v42 }
 0x168   : > { %1851 = vmatmul.mubr.bf16.gmra.mxu0 %v6761_v34  ;;  %v4335_v34 = vld [vmem:[%s10014_s15 + $0x3d0] sm:$0xff] }
 0x169   : > { %1860 = vmatprep.mubr.bf16.mxu0 %v6763_v36  ;;  %3748 = vperm.xlu0 %6656, %v3626_v45   ;;  %v6777_v36 = vld [vmem:[%s10000_s1 + $0x138] ss:$12 sps:$4 sm:$0xff]  }
 0x16a   : > { %3753 = vperm.xlu1 %6657, %v3627_v49   ;;  %v4333_v45 = vld [vmem:[%s10014_s15 + $0x3c0] sm:$0xff]  ;;  %v6802_v49 = vld [vmem:[%s10000_s1 + $0x1e8] ss:$12 sps:$4 sm:$0xff]  }
 0x16b   : > { %6514 = vmatmul.mubr.bf16.gmra.mxu1 %v6790_v56  ;;  %v6781_v56 = vld [vmem:[%s10000_s1 + $0x150] ss:$12 sps:$4 sm:$0xff]  }
 0x16c   : > { %6515 = vmatprep.mubr.bf16.mxu1 %v6794_v13 }
 0x16d   : > { %3738 = vperm.xlu0 %6656, %v3624_v53   ;;  %v8179_v53 = vpop.permute.xlu1 %1035 }
 0x16e   : > { %3743 = vperm.xlu1 %6657, %v3625_v55   ;;  %10168 = vst [vmem:[#allocation52_spill] sm:$0xff] %v8179_v53  ;;  %v4331_v55 = vld [vmem:[%s10014_s15 + $0x3b0] sm:$0xff] }
 0x170   : > { %1861 = vmatmul.mubr.bf16.gmra.mxu0 %v6765_v47  ;;  %v4334_v47 = vld [vmem:[%s10014_s15 + $0x3c8] sm:$0xff] }
 0x171   : > { %1870 = vmatprep.mubr.bf16.mxu0 %v6767_v52  ;;  %3728 = vperm.xlu0 %6656, %v3622_v62   ;;  %v8177_v52 = vpop.permute.xlu0 %1030  ;;  %v4332_v62 = vld [vmem:[%s10014_s15 + $0x3b8] sm:$0xff] }
 0x172   : > { %3733 = vperm.xlu1 %6657, %v3623_v4   ;;  %10167 = vst [vmem:[#allocation51_spill] sm:$0xff] %v8177_v52  ;;  %v4329_v4 = vld [vmem:[%s10014_s15 + $0x3a0] sm:$0xff]  ;;  %v10198_v52 = vmov 0  }
 0x173   : > { %6516 = vmatmul.mubr.bf16.gmra.mxu1 %v6794_v13  ;;  %v8204_v13 = vpop.permute.xlu1 %945 }
 0x174   : > { %6517 = vmatprep.mubr.bf16.mxu1 %v6798_v33  ;;  %10170 = vst [vmem:[#allocation54_spill] sm:$0xff] %v8204_v13 }
 0x175   : > { %3718 = vperm.xlu0 %6656, %v3620_v6   ;;  %v4330_v6 = vld [vmem:[%s10014_s15 + $0x3a8] sm:$0xff] }
 0x176   : > { %3723 = vperm.xlu1 %6657, %v3621_v8   ;;  %v6806_v8 = vld [vmem:[%s10000_s1 + $0x200] ss:$12 sps:$4 sm:$0xff]  }
 0x178   : > { %1871 = vmatmul.mubr.bf16.gmra.mxu0 %v6769_v2  ;;  %v6783_v2 = vld [vmem:[%s10000_s1 + $0x16c] ss:$12 sps:$4 sm:$0xff]  }
 0x179   : > { %1880 = vmatprep.mubr.bf16.mxu0 %v6771_v5  ;;  %4413 = vperm.xlu0 %6656, %v4339_v16   ;;  %v8196_v5 = vpop.permute.xlu0 %940  ;;  %v4327_v16 = vld [vmem:[%s10014_s15 + $0x390] sm:$0xff] }
 0x17a   : > { %4418 = vperm.xlu1 %6657, %v4340_v20   ;;  %10169 = vst [vmem:[#allocation53_spill] sm:$0xff] %v8196_v5  ;;  %v4328_v20 = vld [vmem:[%s10014_s15 + $0x398] sm:$0xff] }
 0x17b   : > { %6518 = vmatmul.mubr.bf16.gmra.mxu1 %v6798_v33  ;;  %v4325_v33 = vld [vmem:[%s10014_s15 + $0x380] sm:$0xff] }
 0x17c   : > { %6519 = vmatprep.mubr.bf16.mxu1 %v6802_v49 }
 0x17d   : > { %4403 = vperm.xlu0 %6656, %v4337_v27   ;;  %v8218_v27 = vpop.permute.xlu0 %1020 }
 0x17e   : > { %4408 = vperm.xlu1 %6657, %v4338_v28   ;;  %10171 = vst [vmem:[#allocation55_spill] sm:$0xff] %v8218_v27  ;;  %v8220_v28 = vpop.permute.xlu1 %1025  ;;  %v5447_v27 = vld [vmem:[%s10014_s15 + $0x508] sm:$0xff] }
 0x17f   : > { %10172 = vst [vmem:[#allocation56_spill] sm:$0xff] %v8220_v28 }
 0x180   : > { %1881 = vmatmul.mubr.bf16.gmra.mxu0 %v6773_v18  ;;  %v6785_v18 = vld [vmem:[%s10000_s1 + $0x168] ss:$12 sps:$4 sm:$0xff]  }
 0x181   : > { %1890 = vmatprep.mubr.bf16.mxu0 %v6775_v21  ;;  %4393 = vperm.xlu0 %6656, %v4335_v34   ;;  %v6787_v21 = vld [vmem:[%s10000_s1 + $0x184] ss:$12 sps:$4 sm:$0xff]   ;;  %v4326_v34 = vld [vmem:[%s10014_s15 + $0x388] sm:$0xff] }
 0x182   : > { %4398 = vperm.xlu1 %6657, %v4336_v41   ;;  %v4724_v41 = vld [vmem:[%s10014_s15 + $0x470] sm:$0xff] }
 0x183   : > { %6520 = vmatmul.mubr.bf16.gmra.mxu1 %v6802_v49  ;;  %v8242_v49 = vpop.permute.xlu1 %935 }
 0x184   : > { %6521 = vmatprep.mubr.bf16.mxu1 %v6806_v8  ;;  %10173 = vst [vmem:[#allocation57_spill] sm:$0xff] %v8242_v49 }
 0x185   : > { %4383 = vperm.xlu0 %6656, %v4333_v45   ;;  %v6789_v45 = vld [vmem:[%s10000_s1 + $0x180] ss:$12 sps:$4 sm:$0xff]  }
 0x186   : > { %4388 = vperm.xlu1 %6657, %v4334_v47   ;;  %v4725_v47 = vld [vmem:[%s10014_s15 + $0x478] sm:$0xff] }
 0x188   : > { %1891 = vmatmul.mubr.bf16.gmra.mxu0 %v6777_v36  ;;  %v6810_v36 = vld [vmem:[%s10000_s1 + $0x218] ss:$12 sps:$4 sm:$0xff]  }
 0x189   : > { %1900 = vmatprep.mubr.bf16.mxu0 %v6779_v43  ;;  %4373 = vperm.xlu0 %6656, %v4331_v55   ;;  %v8234_v43 = vpop.permute.xlu0 %930  ;;  %v6791_v55 = vld [vmem:[%s10000_s1 + $0x19c] ss:$12 sps:$4 sm:$0xff]  }
 0x18a   : > { %4378 = vperm.xlu1 %6657, %v4332_v62   ;;  %v4723_v62 = vld [vmem:[%s10014_s15 + $0x468] sm:$0xff] }
 0x18b   : > { %6522 = vmatmul.mubr.bf16.gmra.mxu1 %v6806_v8  ;;  %v4720_v8 = vld [vmem:[%s10014_s15 + $0x450] sm:$0xff] }
 0x18c   : > { %6523 = vmatprep.mubr.bf16.mxu1 %v6810_v36 }
 0x18d   : > { %4363 = vperm.xlu0 %6656, %v4329_v4   ;;  %v8256_v4 = vpop.permute.xlu0 %1010 }
 0x18e   : > { %4368 = vperm.xlu1 %6657, %v4330_v6   ;;  %10174 = vst [vmem:[#allocation58_spill] sm:$0xff] %v8256_v4  ;;  %v8258_v6 = vpop.permute.xlu1 %1015 }
 0x18f   : > { %10175 = vst [vmem:[#allocation59_spill] sm:$0xff] %v8258_v6 }
 0x190   : > { %1901 = vmatmul.mubr.bf16.gmra.mxu0 %v6781_v56  ;;  %v4722_v56 = vld [vmem:[%s10014_s15 + $0x460] sm:$0xff] }
 0x191   : > { %1910 = vmatprep.mubr.bf16.mxu0 %v6783_v2  ;;  %4353 = vperm.xlu0 %6656, %v4327_v16   ;;  %v6814_v2 = vld [vmem:[%s10000_s1 + $0x230] ss:$12 sps:$4 sm:$0xff]   ;;  %v6793_v16 = vld [vmem:[%s10000_s1 + $0x198] ss:$12 sps:$4 sm:$0xff]  }
 0x192   : > { %4358 = vperm.xlu1 %6657, %v4328_v20   ;;  %v6795_v20 = vld [vmem:[%s10000_s1 + $0x1b4] ss:$12 sps:$4 sm:$0xff]  }
 0x193   : > { %6524 = vmatmul.mubr.bf16.gmra.mxu1 %v6810_v36  ;;  %v8280_v36 = vpop.permute.xlu1 %2687 }
 0x194   : > { %6525 = vmatprep.mubr.bf16.mxu1 %v6814_v2  ;;  %10177 = vst [vmem:[#allocation61_spill] sm:$0xff] %v8280_v36 }
 0x195   : > { %4343 = vperm.xlu0 %6656, %v4325_v33   ;;  %v8275_v33 = vpop.permute.xlu0 %2682 }
 0x196   : > { %4348 = vperm.xlu1 %6657, %v4326_v34   ;;  %10176 = vst [vmem:[#allocation60_spill] sm:$0xff] %v8275_v33  ;;  %v4719_v34 = vld [vmem:[%s10014_s15 + $0x448] sm:$0xff] }
 0x198   : > { %1911 = vmatmul.mubr.bf16.gmra.mxu0 %v6785_v18  ;;  %v4721_v18 = vld [vmem:[%s10014_s15 + $0x458] sm:$0xff] }
 0x199   : > { %1920 = vmatprep.mubr.bf16.mxu0 %v6787_v21  ;;  %4798 = vperm.xlu0 %6656, %v4724_v41   ;;  %v4718_v21 = vld [vmem:[%s10014_s15 + $0x440] sm:$0xff]  ;;  %v4716_v41 = vld [vmem:[%s10014_s15 + $0x430] sm:$0xff] }
 0x19a   : > { %4803 = vperm.xlu1 %6657, %v4725_v47   ;;  %v4717_v47 = vld [vmem:[%s10014_s15 + $0x438] sm:$0xff] }
 0x19b   : > { %6526 = vmatmul.mubr.bf16.gmra.mxu1 %v6814_v2  ;;  %v4714_v2 = vld [vmem:[%s10014_s15 + $0x420] sm:$0xff] }
 0x19d   : > { %4788 = vperm.xlu0 %6656, %v4722_v56   ;;  %v8294_v56 = vpop.permute.xlu0 %2672 }
 0x19e   : > { %4793 = vperm.xlu1 %6657, %v4723_v62   ;;  %10178 = vst [vmem:[#allocation62_spill] sm:$0xff] %v8294_v56  ;;  %v8296_v62 = vpop.permute.xlu1 %2677 }
 0x19f   : > { %10179 = vst [vmem:[#allocation63_spill] sm:$0xff] %v8296_v62 }
 0x1a0   : > { %1921 = vmatmul.mubr.bf16.gmra.mxu0 %v6789_v45  ;;  %v6797_v45 = vld [vmem:[%s10000_s1 + $0x1b0] ss:$12 sps:$4 sm:$0xff]  }
 0x1a1   : > { %1930 = vmatprep.mubr.bf16.mxu0 %v6791_v55  ;;  %4778 = vperm.xlu0 %6656, %v4720_v8   ;;  %v6799_v55 = vld [vmem:[%s10000_s1 + $0x1cc] ss:$12 sps:$4 sm:$0xff]  }
 0x1a2   : > { %4783 = vperm.xlu1 %6657, %v4721_v18   ;;  %v4715_v8 = vld [vmem:[%s10014_s15 + $0x428] sm:$0xff] }
 0x1a3   : > { %v8307_v18 = vpop.f32.mrf.mxu1 }
 0x1a5   : > { %4768 = vperm.xlu0 %6656, %v4718_v21   ;;  %v6801_v21 = vld [vmem:[%s10000_s1 + $0x1c8] ss:$12 sps:$4 sm:$0xff]  }
 0x1a6   : > { %4773 = vperm.xlu1 %6657, %v4719_v34   ;;  %v4713_v34 = vld [vmem:[%s10014_s15 + $0x418] sm:$0xff] }
 0x1a8   : > { %1931 = vmatmul.mubr.bf16.gmra.mxu0 %v6793_v16  ;;  %v4712_v16 = vld [vmem:[%s10014_s15 + $0x410] sm:$0xff] }
 0x1a9   : > { %1940 = vmatprep.mubr.bf16.mxu0 %v6795_v20  ;;  %4758 = vperm.xlu0 %6656, %v4716_v41   ;;  %v8309_v20 = vpop.permute.xlu0 %2662  ;;  %v8317_v41 = vpop.permute.xlu1 %2667 }
 0x1aa   : > { %4763 = vperm.xlu1 %6657, %v4717_v47   ;;  %10180 = vst [vmem:[#allocation64_spill] sm:$0xff] %v8309_v20  ;;  %10181 = vst [vmem:[#allocation65_spill] sm:$0xff] %v8317_v41  ;;  %v8322_v47 = vpop.f32.mrf.mxu1  ;;  %v5060_v20 = vld [vmem:[%s10014_s15 + $0x4a8] sm:$0xff] }
 0x1ad   : > { %4748 = vperm.xlu0 %6656, %v4714_v2   ;;  %v8327_v2 = vpop.f32.mrf.mxu1  ;;  %v8334_v36 = vpop.permute.xlu0 %2652 }
 0x1ae   : > { %4753 = vperm.xlu1 %6657, %v4715_v8   ;;  %v4711_v8 = vld [vmem:[%s10014_s15 + $0x408] sm:$0xff]  ;;  %10183 = vst [vmem:[#allocation67_spill] sm:$0xff] %v8334_v36  ;;  %v8336_v33 = vpop.permute.xlu1 %2657 }
 0x1af   : > { %v8332_v0 = vpop.f32.mrf.mxu1  ;;  %10184 = vst [vmem:[#allocation68_spill] sm:$0xff] %v8336_v33 }
 0x1b0   : > { %1941 = vmatmul.mubr.bf16.gmra.mxu0 %v6797_v45  ;;  %v6803_v45 = vld [vmem:[%s10000_s1 + $0x1e4] ss:$12 sps:$4 sm:$0xff]   ;;  %10182 = vst [vmem:[#allocation66_spill] sm:$0xff] %v8332_v0 }
 0x1b1   : > { %1950 = vmatprep.mubr.bf16.mxu0 %v6799_v55  ;;  %4738 = vperm.xlu0 %6656, %v4712_v16   ;;  %v4710_v55 = vld [vmem:[%s10014_s15 + $0x400] sm:$0xff]  ;;  %v5061_v16 = vld [vmem:[%s10014_s15 + $0x4b0] sm:$0xff]  ;;  %v8359_v41 = vpop.permute.xlu0 %2642 }
 0x1b2   : > { %4743 = vperm.xlu1 %6657, %v4713_v34   ;;  %v8341_v34 = vpop.f32.mrf.mxu1  ;;  %10185 = vst [vmem:[#allocation69_spill] sm:$0xff] %v8359_v41  ;;  %v8364_v33 = vpop.permute.xlu1 %2647  ;;  %v5058_v41 = vld [vmem:[%s10014_s15 + $0x498] sm:$0xff] }
 0x1b3   : > { %10186 = vst [vmem:[#allocation70_spill] sm:$0xff] %v8364_v33 }
 0x1b4   : > { %v8352_v62 = vpop.f32.mrf.mxu1 }
 0x1b5   : > { %4728 = vperm.xlu0 %6656, %v4710_v55   ;;  %v6807_v55 = vld [vmem:[%s10000_s1 + $0x1fc] ss:$12 sps:$4 sm:$0xff]  }
 0x1b6   : > { %4733 = vperm.xlu1 %6657, %v4711_v8   ;;  %v5059_v8 = vld [vmem:[%s10014_s15 + $0x4a0] sm:$0xff]  ;;  %v8357_v56 = vpop.f32.mrf.mxu1  ;;  %v8386_v33 = vpop.permute.xlu1 %2637 }
 0x1b7   : > { %10189 = vst [vmem:[#allocation73_spill] sm:$0xff] %v8386_v33 }
 0x1b8   : > { %1951 = vmatmul.mubr.bf16.gmra.mxu0 %v6801_v21  ;;  %v6805_v21 = vld [vmem:[%s10000_s1 + $0x1e0] ss:$12 sps:$4 sm:$0xff]   ;;  %v8366_v36 = vpop.f32.mrf.mxu1 }
 0x1b9   : > { %1960 = vmatprep.mubr.bf16.mxu0 %v6803_v45  ;;  %v5062_v45 = vld [vmem:[%s10014_s15 + $0x4b8] sm:$0xff]  ;;  %5095 = vperm.xlu0 %6656, %v5061_v16   ;;  %v5057_v16 = vld [vmem:[%s10014_s15 + $0x490] sm:$0xff] }
 0x1ba   : > { %5100 = vperm.xlu1 %6657, %v5062_v45   ;;  %v8371_v45 = vpop.f32.mrf.mxu1 }
 0x1bd   : > { %5085 = vperm.xlu0 %6656, %v5059_v8   ;;  %v8382_v8 = vpop.f32.mrf.mxu1 }
 0x1be   : > { %5090 = vperm.xlu1 %6657, %v5060_v20   ;;  %10187 = vst [vmem:[#allocation71_spill] sm:$0xff] %v8382_v8  ;;  %v8384_v20 = vpop.permute.xlu0 %2632 }
 0x1bf   : > { %10188 = vst [vmem:[#allocation72_spill] sm:$0xff] %v8384_v20  ;;  %v8391_v37 = vpop.f32.mrf.mxu1  ;;  %v8411_v20 = vpop.permute.xlu1 %2627 }
 0x1c0   : > { %1961 = vmatmul.mubr.bf16.gmra.mxu0 %v6805_v21  ;;  %v6809_v21 = vld [vmem:[%s10000_s1 + $0x1f8] ss:$12 sps:$4 sm:$0xff]   ;;  %10192 = vst [vmem:[#allocation76_spill] sm:$0xff] %v8411_v20 }
 0x1c1   : > { %1970 = vmatprep.mubr.bf16.mxu0 %v6807_v55  ;;  %v6811_v55 = vld [vmem:[%s10000_s1 + $0x214] ss:$12 sps:$4 sm:$0xff]   ;;  %5075 = vperm.xlu0 %6656, %v5057_v16   ;;  %v8396_v63 = vpop.f32.mrf.mxu1 }
 0x1c2   : > { %5080 = vperm.xlu1 %6657, %v5058_v41   ;;  %v5254_v41 = vld [vmem:[%s10014_s15 + $0x4f0] sm:$0xff]  ;;  %v8403_v33 = vpop.permute.xlu0 %2622 }
 0x1c3   : > { %v8401_v16 = vpop.f32.mrf.mxu1  ;;  %10191 = vst [vmem:[#allocation75_spill] sm:$0xff] %v8403_v33  ;;  %v5252_v33 = vld [vmem:[%s10014_s15 + $0x4e0] sm:$0xff]  ;;  %v8430_v53 = vpop.permute.xlu1 %2617 }
 0x1c4   : > { %10190 = vst [vmem:[#allocation74_spill] sm:$0xff] %v8401_v16  ;;  %10195 = vst [vmem:[#allocation79_spill] sm:$0xff] %v8430_v53 }
 0x1c5   : > { %5065 = vperm.xlu0 %6656, %v5055_v60   ;;  %v8416_v60 = vpop.f32.mrf.mxu1 }
 0x1c6   : > { %5070 = vperm.xlu1 %6657, %v5056_v57   ;;  %v6815_v57 = vld [vmem:[%s10000_s1 + $0x22c] ss:$12 sps:$4 sm:$0xff]   ;;  %v8428_v24 = vpop.permute.xlu0 %2612 }
 0x1c7   : > { %v8421_v38 = vpop.f32.mrf.mxu1  ;;  %10194 = vst [vmem:[#allocation78_spill] sm:$0xff] %v8428_v24  ;;  %v5249_v24 = vld [vmem:[%s10014_s15 + $0x4c8] sm:$0xff]  ;;  %v8455_v61 = vpop.permute.xlu1 %2767 }
 0x1c8   : > { %1971 = vmatmul.mubr.bf16.gmra.mxu0 %v6809_v21  ;;  %v6813_v21 = vld [vmem:[%s10000_s1 + $0x210] ss:$12 sps:$4 sm:$0xff]   ;;  %10193 = vst [vmem:[#allocation77_spill] sm:$0xff] %v8421_v38  ;;  %10197 = vst [vmem:[#allocation81_spill] sm:$0xff] %v8455_v61 }
 0x1c9   : > { %1980 = vmatprep.mubr.bf16.mxu0 %v6811_v55  ;;  %v5255_v55 = vld [vmem:[%s10014_s15 + $0x4f8] sm:$0xff]  ;;  %5288 = vperm.xlu0 %6656, %v5254_v41   ;;  %v8426_v20 = vpop.f32.mrf.mxu1  ;;  %v5250_v41 = vld [vmem:[%s10014_s15 + $0x4d0] sm:$0xff] }
 0x1ca   : > { %5293 = vperm.xlu1 %6657, %v5255_v55   ;;  %v8450_v53 = vpop.permute.xlu0 %2762 }
 0x1cb   : > { %v8435_v55 = vpop.f32.mrf.mxu1  ;;  %10196 = vst [vmem:[#allocation80_spill] sm:$0xff] %v8450_v53  ;;  %v8472_v61 = vpop.permute.xlu1 %2757 }
 0x1cc   : > { %10200 = vst [vmem:[#allocation83_spill] sm:$0xff] %v8472_v61  ;;  %v5565_v61 = vld [vmem:[%s10014_s15 + $0x530] sm:$0xff] }
 0x1cd   : > { %5278 = vperm.xlu0 %6656, %v5252_v33   ;;  %v8443_v17 = vpop.f32.mrf.mxu1 }
 0x1ce   : > { %5283 = vperm.xlu1 %6657, %v5253_v26   ;;  %v5248_v26 = vld [vmem:[%s10014_s15 + $0x4c0] sm:$0xff]  ;;  %v8470_v28 = vpop.permute.xlu0 %2752 }
 0x1cf   : > { %v8448_v33 = vpop.f32.mrf.mxu1  ;;  %10199 = vst [vmem:[#allocation82_spill] sm:$0xff] %v8470_v28  ;;  %v8497_v9 = vpop.permute.xlu1 %2747 }
 0x1d0   : > { %1981 = vmatmul.mubr.bf16.gmra.mxu0 %v6813_v21  ;;  %v6817_v21 = vld [vmem:[%s10000_s1 + $0x228] ss:$12 sps:$4 sm:$0xff]   ;;  %10203 = vst [vmem:[#allocation86_spill] sm:$0xff] %v8497_v9 }
 0x1d1   : > { %1990 = vmatprep.mubr.bf16.mxu0 %v6815_v57  ;;  %v5251_v57 = vld [vmem:[%s10014_s15 + $0x4d8] sm:$0xff]  ;;  %5268 = vperm.xlu0 %6656, %v5250_v41   ;;  %v8457_v23 = vpop.f32.mrf.mxu1  ;;  %v5448_v41 = vld [vmem:[%s10014_s15 + $0x510] sm:$0xff] }
 0x1d2   : > { %5273 = vperm.xlu1 %6657, %v5251_v57   ;;  %v8492_v31 = vpop.permute.xlu0 %2742 }
 0x1d3   : > { %v8463_v57 = vpop.f32.mrf.mxu1  ;;  %10202 = vst [vmem:[#allocation85_spill] sm:$0xff] %v8492_v31  ;;  %v5563_v31 = vld [vmem:[%s10014_s15 + $0x520] sm:$0xff] }
 0x1d5   : > { %5258 = vperm.xlu0 %6656, %v5248_v26   ;;  %v8468_v53 = vpop.f32.mrf.mxu1 }
 0x1d6   : > { %5263 = vperm.xlu1 %6657, %v5249_v24   ;;  %v5446_v24 = vld [vmem:[%s10014_s15 + $0x500] sm:$0xff] }
 0x1d7   : > { %v8477_v26 = vpop.f32.mrf.mxu1 }
 0x1d8   : > { %1991 = vmatmul.mubr.bf16.gmra.mxu0 %v6817_v21  ;;  %v5449_v21 = vld [vmem:[%s10014_s15 + $0x518] sm:$0xff]  ;;  %10201 = vst [vmem:[#allocation84_spill] sm:$0xff] %v8477_v26 }
 0x1d9   : > { %3251 = vmatprep.mubr.bf16.mxu0 %v10198_v52  ;;  %5462 = vperm.xlu0 %6656, %v5448_v41   ;;  %v8483_v4 = vpop.f32.mrf.mxu1 }
 0x1da   : > { %5467 = vperm.xlu1 %6657, %v5449_v21  }
 0x1db   : > { %v8490_v54 = vpop.f32.mrf.mxu1 }
 0x1dd   : > { %5452 = vperm.xlu0 %6656, %v5446_v24  }
 0x1de   : > { %5457 = vperm.xlu1 %6657, %v5447_v27   ;;  %v8503_v27 = vpop.f32.mrf.mxu1 }
 0x1e0   : > { %v1762_v52 = vpop.f32.mrf.mxu0  ;;  %v8511_v51 = vpop.f32.mrf.mxu1 }
 0x1e1   : > { %v1763_v6 = vadd.f32 %v1762_v52, %v7940_v44  ;;  %v5566_v52 = vld [vmem:[%s10014_s15 + $0x538] sm:$0xff]  ;;  %5579 = vperm.xlu0 %6656, %v5565_v61   ;;  %v8519_v61 = vpop.permute.xlu0 %2732 }
 0x1e2   : > { %v1764_v28 = vpop.f32.mrf.mxu0  ;;  %5584 = vperm.xlu1 %6657, %v5566_v52   ;;  %v8517_v12 = vpop.f32.mrf.mxu1  ;;  %10205 = vst [vmem:[#allocation88_spill] sm:$0xff] %v8519_v61 }
 0x1e3   : > { %v2036_v41 = vadd.f32 %v8307_v18, %v1763_v6  ;;  %v1765_v21 = vadd.f32 %v1764_v28, %v7940_v44  ;;  %v8521_v52 = vpop.permute.xlu1 %2737 }
 0x1e4   : > { %v1766_v29 = vpop.f32.mrf.mxu0  ;;  %10206 = vst [vmem:[#allocation89_spill] sm:$0xff] %v8521_v52 }
 0x1e5   : > { %v8500_v6 = vadd.f32 %v8322_v47, %v1765_v21  ;;  %v1767_v44 = vadd.f32 %v1766_v29, %v7951_v48  ;;  %v2274_v18 = vmul.f32 0.01, %v2036_v41  ;;  %v5564_v29 = vld [vmem:[%s10014_s15 + $0x528] sm:$0xff]  ;;  %5569 = vperm.xlu0 %6656, %v5563_v31  }
 0x1e6   : > { %v8505_v28 = vpop.f32.mrf.mxu0  ;;  %5574 = vperm.xlu1 %6657, %v5564_v29   ;;  %v5680_v31 = vld [vmem:[%s10014_s15 + $0x548] sm:$0xff] }
 0x1e7   : > { %10204 = vst [vmem:[#allocation87_spill] sm:$0xff] %v8500_v6  ;;  %v2040_v24 = vadd.f32 %v8327_v2, %v1767_v44  ;;  %v2370_v44 = vmax.f32 %v2036_v41, %v2274_v18 }
 0x1e8   : > { %v1772_v9 = vpop.f32.mrf.mxu0 }
 0x1e9   : > { %v2276_v47 = vmul.f32 0.01, %v2040_v24  ;;  %v1773_v21 = vadd.f32 %v1772_v9, %v7927_v39  ;;  %v8528_v9 = vpop.f32.mrf.mxu1  ;;  %5683 = vperm.xlu0 %6656, %v5679_v7  }
 0x1ea   : > { %v1774_v2 = vpop.f32.mrf.mxu0  ;;  %5688 = vperm.xlu1 %6657, %v5680_v31  }
 0x1eb   : > { %v2372_v50 = vmax.f32 %v2040_v24, %v2276_v47  ;;  %v2046_v46 = vadd.f32 %v8341_v34, %v1773_v21  ;;  %v1775_v14 = vadd.f32 %v1774_v2, %v7927_v39  ;;  %v8538_v34 = vpop.f32.mrf.mxu1  ;;  %v5753_v24 = vld [vmem:[%s10014_s15 + $0x550] sm:$0xff]  ;;  %v8548_v47 = vpop.permute.xlu0 %2722 }
 0x1ec   : > { %v1776_v6 = vpop.f32.mrf.mxu0  ;;  %10209 = vst [vmem:[#allocation92_spill] sm:$0xff] %v8548_v47  ;;  %v8554_v21 = vpop.permute.xlu1 %2727 }
 0x1ed   : > { %v8533_v61 = vpack.c.bf16 %v2372_v50, %v2370_v44  ;;  %v8536_v41 = vadd.f32 %v8352_v62, %v1775_v14  ;;  %v1777_v39 = vadd.f32 %v1776_v6, %v7929_v40  ;;  %v8546_v29 = vpop.f32.mrf.mxu1  ;;  %v2278_v50 = vmul.f32 0.01, %v2046_v46  ;;  %v5811_v6 = vld [vmem:[%s10014_s15 + $0x558] sm:$0xf]  ;;  %10210 = vst [vmem:[#allocation93_spill] sm:$0xff] %v8554_v21  ;;  %5756 = vperm.xlu0 %6656, %v5753_v24  }
 0x1ee   : > { %v8541_v18 = vpop.f32.mrf.mxu0  ;;  %5814 = vperm.xlu1 %6657, %v5811_v6  }
 0x1ef   : > { %10207 = vst [vmem:[#allocation90_spill] sm:$0xff] %v8533_v61  ;;  %10208 = vst [vmem:[#allocation91_spill] sm:$0xff] %v8536_v41  ;;  %v2050_v14 = vadd.f32 %v8357_v56, %v1777_v39  ;;  %v8557_v2 = vpop.f32.mrf.mxu1  ;;  %v5876_v56 = vld [vmem:[%s10014_s15 + $0x560] sm:$0x3]  ;;  %v2374_v47 = vmax.f32 %v2046_v46, %v2278_v50  ;;  %v8573_v24 = vpop.permute.xlu0 %2712 }
 0x1f0   : > { %v1782_v62 = vpop.f32.mrf.mxu0  ;;  %10212 = vst [vmem:[#allocation95_spill] sm:$0xff] %v8573_v24 }
 0x1f1   : > { %v1783_v7 = vadd.f32 %v1782_v62, %v7902_v30  ;;  %v2280_v44 = vmul.f32 0.01, %v2050_v14  ;;  %v8565_v39 = vpop.f32.mrf.mxu1  ;;  %v5941_v62 = vld [vmem:[%s10014_s15 + $0x568] sm:$0x1]  ;;  %5879 = vperm.xlu0 %6656, %v5876_v56  }
 0x1f2   : > { %v8559_v31 = vpop.f32.mrf.mxu0 }
 0x1f3   : > { %v2056_v52 = vadd.f32 %v8371_v45, %v1783_v7  ;;  %v2376_v61 = vmax.f32 %v2050_v14, %v2280_v44  ;;  %v8571_v42 = vpop.f32.mrf.mxu1  ;;  %v8577_v7 = vpop.permute.xlu1 %2717  ;;  %5944 = vperm.xlu1 %6657, %v5941_v62  }
 0x1f4   : > { %v1786_v21 = vpop.f32.mrf.mxu0  ;;  %10211 = vst [vmem:[#allocation94_spill] sm:$0xff] %v8571_v42  ;;  %10214 = vst [vmem:[#allocation97_spill] sm:$0xff] %v8577_v7 }
 0x1f5   : > { %v1787_v41 = vadd.f32 %v1786_v21, %v7907_v32  ;;  %v8575_v45 = vpack.c.bf16 %v2376_v61, %v2374_v47  ;;  %v2282_v0 = vmul.f32 0.01, %v2056_v52  ;;  %v8580_v50 = vpop.f32.mrf.mxu1 }
 0x1f6   : > { %v1788_v6 = vpop.f32.mrf.mxu0  ;;  %10215 = vst [vmem:[#allocation98_spill] sm:$0xff] %v8580_v50 }
 0x1f7   : > { %10213 = vst [vmem:[#allocation96_spill] sm:$0xff] %v8575_v45  ;;  %v2060_v46 = vadd.f32 %v8391_v37, %v1787_v41  ;;  %v8582_v35 = vpop.f32.mrf.mxu1  ;;  %v2378_v16 = vmax.f32 %v2056_v52, %v2282_v0 }
 0x1f8   : > { %v1792_v14 = vpop.f32.mrf.mxu0  ;;  %10216 = vst [vmem:[#allocation99_spill] sm:$0xff] %v8582_v35 }
 0x1f9   : > { %v2284_v44 = vmul.f32 0.01, %v2060_v46  ;;  %v8584_v24 = vpop.f32.mrf.mxu1 }
 0x1fa   : > { %v1794_v21 = vpop.f32.mrf.mxu0  ;;  %10217 = vst [vmem:[#allocation100_spill] sm:$0xff] %v8584_v24 }
 0x1fb   : > { %v2380_v8 = vmax.f32 %v2060_v46, %v2284_v44  ;;  %v8588_v56 = vpop.f32.mrf.mxu1  ;;  %v6820_v46 = vld [vmem:[#allocation2 + $0x4] ss:$12 sps:$4 sm:$0xff]   ;;  %v1795_v49 = vadd.f32 %v1794_v21, %v7880_v22 }
 0x1fc   : > { %v1796_v61 = vpop.f32.mrf.mxu0  ;;  %10219 = vst [vmem:[#allocation102_spill] sm:$0xff] %v8588_v56  ;;  %3058 = vmatprep.mubr.bf16.mxu1 %v6820_v46 }
 0x1fd   : > { %v8586_v47 = vpack.c.bf16 %v2380_v8, %v2378_v16  ;;  %v8590_v45 = vpop.f32.mrf.mxu1 }
 0x1fe   : > { %v1798_v7 = vpop.f32.mrf.mxu0  ;;  %10220 = vst [vmem:[#allocation103_spill] sm:$0xff] %v8590_v45 }
 0x1ff   : > { %10218 = vst [vmem:[#allocation101_spill] sm:$0xff] %v8586_v47  ;;  %v8592_v41 = vpop.f32.mrf.mxu1 }
 0x200   : > { %v1802_v37 = vpop.f32.mrf.mxu0  ;;  %10221 = vst [vmem:[#allocation104_spill] sm:$0xff] %v8592_v41 }
 0x201   : > { %v8594_v13 = vpop.f32.mrf.mxu1 }
 0x202   : > { %v1804_v62 = vpop.f32.mrf.mxu0  ;;  %10222 = vst [vmem:[#allocation105_spill] sm:$0xff] %v8594_v13 }
 0x203   : > { %v8596_v38 = vpop.f32.mrf.mxu1 }
 0x204   : > { %v1806_v35 = vpop.f32.mrf.mxu0  ;;  %10223 = vst [vmem:[#allocation106_spill] sm:$0xff] %v8596_v38 }
 0x205   : > { %v8598_v52 = vpop.f32.mrf.mxu1 }
 0x206   : > { %v1808_v0 = vpop.f32.mrf.mxu0  ;;  %10224 = vst [vmem:[#allocation107_spill] sm:$0xff] %v8598_v52 }
 0x207   : > { %v8600_v16 = vpop.f32.mrf.mxu1 }
 0x208   : > { %v1812_v8 = vpop.f32.mrf.mxu0  ;;  %10225 = vst [vmem:[#allocation108_spill] sm:$0xff] %v8600_v16  ;;  %v1779_v16 = vadd.f32 %v8541_v18, %v7929_v40  ;;  %v1805_v18 = vadd.f32 %v1804_v62, %v7861_v15 }
 0x209   : > { %v8602_v47 = vpop.f32.mrf.mxu1 }
 0x20a   : > { %v1814_v44 = vpop.f32.mrf.mxu0  ;;  %10226 = vst [vmem:[#allocation109_spill] sm:$0xff] %v8602_v47  ;;  %v1789_v47 = vadd.f32 %v1788_v6, %v7907_v32  ;;  %v8627_v40 = vadd.f32 %v8366_v36, %v1779_v16  ;;  %v8631_v32 = vadd.f32 %v8559_v31, %v7902_v30  ;;  %v1807_v6 = vadd.f32 %v1806_v35, %v7872_v19 }
 0x20b   : > { %v8604_v56 = vpop.f32.mrf.mxu1  ;;  %v8648_v30 = vadd.f32 %v1796_v61, %v7888_v25  ;;  %v8664_v61 = vadd.f32 %v8443_v17, %v1805_v18 }
 0x20c   : > { %v1816_v45 = vpop.f32.mrf.mxu0  ;;  %10227 = vst [vmem:[#allocation110_spill] sm:$0xff] %v8604_v56 }
 0x20d   : > { %v8606_v24 = vpop.f32.mrf.mxu1 }
 0x20e   : > { %v1818_v41 = vpop.f32.mrf.mxu0  ;;  %10228 = vst [vmem:[#allocation111_spill] sm:$0xff] %v8606_v24  ;;  %v8622_v24 = vadd.f32 %v8505_v28, %v7951_v48  ;;  %v8638_v48 = vadd.f32 %v8396_v63, %v1789_v47  ;;  %v8641_v28 = vadd.f32 %v1792_v14, %v7880_v22 }
 0x20f   : > { %v8608_v5 = vpop.f32.mrf.mxu1 }
 0x210   : > { %v1822_v13 = vpop.f32.mrf.mxu0  ;;  %10229 = vst [vmem:[#allocation112_spill] sm:$0xff] %v8608_v5  ;;  %v1799_v5 = vadd.f32 %v1798_v7, %v7888_v25  ;;  %v8644_v7 = vadd.f32 %v8416_v60, %v1795_v49 }
 0x211   : > { %v8610_v50 = vpop.f32.mrf.mxu1 }
 0x212   : > { %v1824_v38 = vpop.f32.mrf.mxu0  ;;  %10230 = vst [vmem:[#allocation113_spill] sm:$0xff] %v8610_v50  ;;  %v1803_v50 = vadd.f32 %v1802_v37, %v7861_v15  ;;  %v1809_v15 = vadd.f32 %v1808_v0, %v7872_v19  ;;  %v8656_v22 = vadd.f32 %v8426_v20, %v1799_v5  ;;  %v8667_v19 = vadd.f32 %v8448_v33, %v1807_v6 }
 0x213   : > { %v8614_v46 = vpop.f32.mrf.mxu1  ;;  %v1825_v60 = vadd.f32 %v1824_v38, %v7809_v59  ;;  %v1823_v20 = vadd.f32 %v1822_v13, %v7809_v59  ;;  %v1815_v33 = vadd.f32 %v1814_v44, %v7848_v10  ;;  %v1817_v59 = vadd.f32 %v1816_v45, %v7850_v11  ;;  %v10231_v44 = vld [vmem:[#allocation84_spill] sm:$0xff] }
 0x214   : > { %v1826_v52 = vpop.f32.mrf.mxu0  ;;  %v8659_v49 = vadd.f32 %v8435_v55, %v1803_v50  ;;  %v8680_v50 = vadd.f32 %v8457_v23, %v1809_v15 }
 0x215   : > { %v8618_v42 = vpop.f32.mrf.mxu1  ;;  %v1827_v14 = vadd.f32 %v1826_v52, %v7828_v3  ;;  %v8711_v18 = vadd.f32 %v10231_v44, %v1817_v59 }
 0x216   : > { %v1828_v56 = vpop.f32.mrf.mxu0 }
 0x217   : > { %v8635_v21 = vpop.f32.mrf.mxu1  ;;  %v1829_v36 = vadd.f32 %v1828_v56, %v7828_v3  ;;  %v8690_v13 = vadd.f32 %v8511_v51, %v1827_v14 }
 0x218   : > { %v1832_v26 = vpop.f32.mrf.mxu0 }
 0x219   : > { %v1833_v35 = vadd.f32 %v1832_v26, %v7807_v58  ;;  %v8653_v63 = vpop.f32.mrf.mxu1  ;;  %v1819_v26 = vadd.f32 %v1818_v41, %v7850_v11  ;;  %v8675_v55 = vadd.f32 %v8517_v12, %v1829_v36  ;;  %v2098_v12 = vadd.f32 %v8503_v27, %v1825_v60  ;;  %v10233_v60 = vld [vmem:[#allocation57_spill] sm:$0xff] }
 0x21a   : > { %v1834_v37 = vpop.f32.mrf.mxu0  ;;  %v2096_v11 = vadd.f32 %v8490_v54, %v1823_v20  ;;  %v2300_v54 = vmul.f32 0.01, %v8690_v13  ;;  %v8725_v20 = vmul.f32 0.01, %v8680_v50 }
 0x21b   : > { %v1835_v31 = vadd.f32 %v1834_v37, %v7807_v58  ;;  %v1813_v58 = vadd.f32 %v1812_v8, %v7848_v10  ;;  %v8671_v5 = vpop.f32.mrf.mxu1  ;;  %v2106_v47 = vadd.f32 %v8528_v9, %v1833_v35  ;;  %v8697_v10 = vadd.f32 %v8483_v4, %v1819_v26  ;;  %v10232_v35 = vld [vmem:[#allocation94_spill] sm:$0xff] }
 0x21c   : > { %v1836_v25 = vpop.f32.mrf.mxu0  ;;  %v2301_v51 = vmul.f32 0.01, %v8675_v55  ;;  %v2299_v6 = vmul.f32 0.01, %v2098_v12 }
 0x21d   : > { %v2108_v3 = vadd.f32 %v8538_v34, %v1835_v31  ;;  %v1837_v38 = vadd.f32 %v1836_v25, %v7823_v1  ;;  %v8685_v41 = vpop.f32.mrf.mxu1  ;;  %v8694_v23 = vadd.f32 %v8463_v57, %v1813_v58  ;;  %v2302_v52 = vmul.f32 0.01, %v2106_v47 }
 0x21e   : > { %v1838_v17 = vpop.f32.mrf.mxu0  ;;  %v2298_v25 = vmul.f32 0.01, %v2096_v11 }
 0x21f   : > { %v1839_v56 = vadd.f32 %v1838_v17, %v7823_v1  ;;  %v2110_v34 = vadd.f32 %v8546_v29, %v1837_v38  ;;  %v8701_v0 = vpop.f32.mrf.mxu1  ;;  %v2303_v27 = vmul.f32 0.01, %v2108_v3  ;;  %v2398_v38 = vmax.f32 %v2106_v47, %v2302_v52 }
 0x220   : > { %v1842_v62 = vpop.f32.mrf.mxu0  ;;  %v2294_v47 = vmul.f32 0.01, %v8694_v23 }
 0x221   : > { %v2112_v1 = vadd.f32 %v8557_v2, %v1839_v56  ;;  %v1843_v9 = vadd.f32 %v1842_v62, %v8234_v43  ;;  %v2304_v45 = vmul.f32 0.01, %v2110_v34  ;;  %v8707_v16 = vpop.f32.mrf.mxu1  ;;  %v2088_v2 = vadd.f32 %v8468_v53, %v1815_v33  ;;  %v10234_v33 = vld [vmem:[#allocation98_spill] sm:$0xff] }
 0x222   : > { %v1844_v29 = vpop.f32.mrf.mxu0  ;;  %v2397_v53 = vmax.f32 %v8675_v55, %v2301_v51  ;;  %v2399_v58 = vmax.f32 %v2108_v3, %v2303_v27  ;;  %v2296_v62 = vmul.f32 0.01, %v8711_v18  ;;  %v2396_v55 = vmax.f32 %v8690_v13, %v2300_v54  ;;  %v10235_v27 = vld [vmem:[#allocation53_spill] sm:$0xff] }
 0x223   : > { %v2305_v8 = vmul.f32 0.01, %v2112_v1  ;;  %v2116_v57 = vadd.f32 %v8565_v39, %v1843_v9  ;;  %v1845_v4 = vadd.f32 %v1844_v29, %v8234_v43  ;;  %v2400_v37 = vmax.f32 %v2110_v34, %v2304_v45  ;;  %v8718_v14 = vpop.f32.mrf.mxu1 }
 0x224   : > { %v1846_v36 = vpop.f32.mrf.mxu0  ;;  %v2297_v43 = vmul.f32 0.01, %v8697_v10  ;;  %v2295_v34 = vmul.f32 0.01, %v2088_v2 }
 0x225   : > { %v2401_v15 = vmax.f32 %v2112_v1, %v2305_v8  ;;  %v8715_v31 = vadd.f32 %v10232_v35, %v1845_v4  ;;  %v1847_v39 = vadd.f32 %v1846_v36, %v10233_v60  ;;  %v2306_v17 = vmul.f32 0.01, %v2116_v57  ;;  %v8728_v59 = vpop.f32.mrf.mxu1 }
 0x226   : > { %v8722_v26 = vpop.f32.mrf.mxu0  ;;  %v2395_v1 = vmax.f32 %v2098_v12, %v2299_v6  ;;  %v2480_v3 = vpack.c.bf16 %v2400_v37, %v2398_v38  ;;  %v2393_v52 = vmax.f32 %v8697_v10, %v2297_v43  ;;  %v2394_v4 = vmax.f32 %v2096_v11, %v2298_v25  ;;  %v10236_v6 = vld [vmem:[#allocation100_spill] sm:$0xff]  ;;  %v10237_v37 = vld [vmem:[#allocation77_spill] sm:$0xff]  ;;  %v10239_v38 = vld [vmem:[#allocation102_spill] sm:$0xff] }
 0x227   : > { %v2120_v56 = vadd.f32 %v10234_v33, %v1847_v39  ;;  %v2481_v45 = vpack.c.bf16 %v2401_v15, %v2399_v58  ;;  %v8733_v8 = vpop.f32.mrf.mxu1  ;;  %v2402_v35 = vmax.f32 %v2116_v57, %v2306_v17  ;;  %v8743_v39 = vadd.f32 %v10237_v37, %v8648_v30 }
 0x228   : > { %v1852_v9 = vpop.f32.mrf.mxu0  ;;  %v2479_v36 = vpack.c.bf16 %v2397_v53, %v2395_v1  ;;  %v2291_v58 = vmul.f32 0.01, %v8664_v61  ;;  %v2292_v10 = vmul.f32 0.01, %v8667_v19  ;;  %v2391_v11 = vmax.f32 %v2088_v2, %v2295_v34  ;;  %v10240_v1 = vld [vmem:[#allocation54_spill] sm:$0xff] }
 0x229   : > { %v2308_v51 = vmul.f32 0.01, %v2120_v56  ;;  %v1853_v29 = vadd.f32 %v1852_v9, %v10235_v27  ;;  %3026 = vmatprep.subr.bf16.mxu1 %v2481_v45  ;;  %v8739_v54 = vpop.f32.mrf.mxu1  ;;  %v2392_v57 = vmax.f32 %v8711_v18, %v2296_v62  ;;  %v2478_v25 = vpack.c.bf16 %v2396_v55, %v2394_v4  ;;  %v10241_v18 = vld [vmem:[#allocation71_spill] sm:$0xff]  ;;  %v10242_v45 = vld [vmem:[#allocation74_spill] sm:$0xff] }
 0x22a   : > { %v1854_v44 = vpop.f32.mrf.mxu0  ;;  %3027 = vmatpush1.bf16.msra.mxu1 %v2480_v3  ;;  %v2289_v30 = vmul.f32 0.01, %v8656_v22  ;;  %v2477_v34 = vpack.c.bf16 %v2393_v52, %v2391_v11  ;;  %v2058_v62 = vadd.f32 %v10241_v18, %v8631_v32  ;;  %v2066_v55 = vadd.f32 %v10242_v45, %v8641_v28  ;;  %v10243_v4 = vld [vmem:[#allocation103_spill] sm:$0xff]  ;;  %v10247_v45 = vld [vmem:[#allocation50_spill] sm:$0xff] }
 0x22b   : > { %v2404_v12 = vmax.f32 %v2120_v56, %v2308_v51  ;;  %v2126_v15 = vadd.f32 %v10236_v6, %v1853_v29  ;;  %v1855_v13 = vadd.f32 %v1854_v44, %v10235_v27  ;;  %3028 = vmatprep.subr.bf16.mxu1 %v2479_v36  ;;  %v8753_v33 = vpop.f32.mrf.mxu1  ;;  %v2389_v56 = vmax.f32 %v8680_v50, %v8725_v20 }
 0x22c   : > { %v1856_v43 = vpop.f32.mrf.mxu0  ;;  %v2290_v3 = vmul.f32 0.01, %v8659_v49  ;;  %v2390_v51 = vmax.f32 %v8694_v23, %v2294_v47  ;;  %v2287_v50 = vmul.f32 0.01, %v8644_v7  ;;  %v2387_v20 = vmax.f32 %v8664_v61, %v2291_v58 }
 0x22d   : > { %v8748_v53 = vpack.c.bf16 %v2404_v12, %v2402_v35  ;;  %v8751_v17 = vadd.f32 %v10239_v38, %v1855_v13  ;;  %v1857_v9 = vadd.f32 %v1856_v43, %v10240_v1  ;;  %v8767_v27 = vpop.f32.mrf.mxu1  ;;  %v2310_v29 = vmul.f32 0.01, %v2126_v15  ;;  %v10244_v35 = vld [vmem:[#allocation49_spill] sm:$0xff] }
 0x22e   : > { %v8759_v2 = vpop.f32.mrf.mxu0  ;;  %3029 = vmatpush1.bf16.msra.mxu1 %v2478_v25  ;;  %v2288_v32 = vmul.f32 0.01, %v8743_v39  ;;  %v2388_v28 = vmax.f32 %v8667_v19, %v2292_v10  ;;  %v2476_v36 = vpack.c.bf16 %v2392_v57, %v2390_v51  ;;  %v2285_v47 = vmul.f32 0.01, %v8638_v48  ;;  %v10245_v43 = vld [vmem:[#allocation105_spill] sm:$0xff] }
 0x22f   : > { %10238 = vst [vmem:[#allocation84_spill] sm:$0xff] %v8748_v53  ;;  %v2130_v52 = vadd.f32 %v10243_v4, %v1857_v9  ;;  %3030 = vmatprep.subr.bf16.mxu1 %v2477_v34  ;;  %v8775_v23 = vpop.f32.mrf.mxu1  ;;  %v2385_v6 = vmax.f32 %v8656_v22, %v2289_v30  ;;  %v2475_v37 = vpack.c.bf16 %v2389_v56, %v2387_v20  ;;  %v2286_v58 = vmul.f32 0.01, %v2066_v55  ;;  %v10246_v22 = vld [vmem:[#allocation66_spill] sm:$0xff] }
 0x230   : > { %v1862_v44 = vpop.f32.mrf.mxu0  ;;  %v2386_v11 = vmax.f32 %v8659_v49, %v2290_v3  ;;  %v2283_v10 = vmul.f32 0.01, %v2058_v62  ;;  %v2383_v57 = vmax.f32 %v8644_v7, %v2287_v50  ;;  %v2406_v38 = vmax.f32 %v2126_v15, %v2310_v29 }
 0x231   : > { %v1863_v12 = vadd.f32 %v1862_v44, %v10244_v35  ;;  %v2312_v13 = vmul.f32 0.01, %v2130_v52  ;;  %v8783_v19 = vpop.f32.mrf.mxu1  ;;  %v2042_v30 = vadd.f32 %v10246_v22, %v8622_v24  ;;  %v2384_v56 = vmax.f32 %v8743_v39, %v2288_v32  ;;  %v10250_v39 = vld [vmem:[#allocation91_spill] sm:$0xff] }
 0x232   : > { %v8779_v61 = vpop.f32.mrf.mxu0  ;;  %3031 = vmatpush1.bf16.msra.mxu1 %v2476_v36  ;;  %v2474_v18 = vpack.c.bf16 %v2388_v28, %v2386_v11  ;;  %v2281_v51 = vmul.f32 0.01, %v8627_v40  ;;  %v2381_v20 = vmax.f32 %v8638_v48, %v2285_v47  ;;  %v2473_v15 = vpack.c.bf16 %v2385_v6, %v2383_v57  ;;  %v10252_v57 = vld [vmem:[#allocation87_spill] sm:$0xff] }
 0x233   : > { %v2136_v25 = vadd.f32 %v10245_v43, %v1863_v12  ;;  %v2408_v9 = vmax.f32 %v2130_v52, %v2312_v13  ;;  %3032 = vmatprep.subr.bf16.mxu1 %v2475_v37  ;;  %v8790_v3 = vpop.f32.mrf.mxu1  ;;  %v2382_v50 = vmax.f32 %v2066_v55, %v2286_v58  ;;  %v10249_v52 = vld [vmem:[#allocation107_spill] sm:$0xff]  ;;  %v2279_v32 = vmul.f32 0.01, %v10250_v39 }
 0x234   : > { %v1866_v34 = vpop.f32.mrf.mxu0  ;;  %v2379_v28 = vmax.f32 %v2058_v62, %v2283_v10  ;;  %v2277_v48 = vmul.f32 0.01, %v2042_v30  ;;  %v2377_v47 = vmax.f32 %v8627_v40, %v2281_v51 }
 0x235   : > { %v1867_v49 = vadd.f32 %v1866_v34, %v10247_v45  ;;  %v8794_v4 = vpack.c.bf16 %v2408_v9, %v2406_v38  ;;  %v2314_v29 = vmul.f32 0.01, %v2136_v25  ;;  %v8797_v24 = vpop.f32.mrf.mxu1  ;;  %v2472_v12 = vpack.c.bf16 %v2384_v56, %v2382_v50 }
 0x236   : > { %v1868_v7 = vpop.f32.mrf.mxu0  ;;  %3033 = vmatpush1.bf16.msra.mxu1 %v2474_v18  ;;  %v2471_v55 = vpack.c.bf16 %v2381_v20, %v2379_v28  ;;  %v2275_v38 = vmul.f32 0.01, %v10252_v57  ;;  %v2375_v62 = vmax.f32 %v10250_v39, %v2279_v32  ;;  %v2373_v22 = vmax.f32 %v2042_v30, %v2277_v48  ;;  %v10253_v18 = vld [vmem:[#allocation101_spill] sm:$0xff]  ;;  %v10256_v39 = vld [vmem:[#allocation90_spill] sm:$0xff] }
 0x237   : > { %10248 = vst [vmem:[#allocation94_spill] sm:$0xff] %v8794_v4  ;;  %v2140_v44 = vadd.f32 %v10249_v52, %v1867_v49  ;;  %3034 = vmatprep.subr.bf16.mxu1 %v2473_v15  ;;  %v8800_v37 = vpop.f32.mrf.mxu1  ;;  %v2410_v58 = vmax.f32 %v2136_v25, %v2314_v29  ;;  %v10255_v29 = vld [vmem:[#allocation96_spill] sm:$0xff] }
 0x238   : > { %v1872_v36 = vpop.f32.mrf.mxu0  ;;  %10251 = vst [vmem:[#allocation57_spill] sm:$0xff] %v8800_v37  ;;  %v2469_v40 = vpack.c.bf16 %v2377_v47, %v2375_v62  ;;  %v2371_v49 = vmax.f32 %v10252_v57, %v2275_v38  ;;  %v1859_v62 = vadd.f32 %v8759_v2, %v10240_v1  ;;  %v10263_v37 = vld [vmem:[#allocation41_spill] sm:$0xff]  ;;  %v8846_v1 = vadd.f32 %v8779_v61, %v10244_v35 }
 0x239   : > { %v2316_v13 = vmul.f32 0.01, %v2140_v44  ;;  %v8803_v43 = vpop.f32.mrf.mxu1  ;;  %v10270_v61 = vld [vmem:[#allocation29_spill] sm:$0xff] }
 0x23a   : > { %v1874_v6 = vpop.f32.mrf.mxu0  ;;  %3035 = vmatpush1.bf16.msra.mxu1 %v2472_v12  ;;  %v2467_v50 = vpack.c.bf16 %v2373_v22, %v2371_v49  ;;  %v1869_v22 = vadd.f32 %v1868_v7, %v10247_v45  ;;  %v10266_v45 = vld [vmem:[#allocation42_spill] sm:$0xff] }
 0x23b   : > { %v2412_v11 = vmax.f32 %v2140_v44, %v2316_v13  ;;  %3036 = vmatprep.subr.bf16.mxu1 %v2471_v55  ;;  %v8809_v34 = vpop.f32.mrf.mxu1 }
 0x23c   : > { %v1876_v10 = vpop.f32.mrf.mxu0 }
 0x23d   : > { %v8807_v9 = vpack.c.bf16 %v2412_v11, %v2410_v58  ;;  %v8812_v25 = vpop.f32.mrf.mxu1 }
 0x23e   : > { %v1878_v56 = vpop.f32.mrf.mxu0  ;;  %3037 = vmatpush1.bf16.msra.mxu1 %v10253_v18 }
 0x23f   : > { %3038 = vmatprep.subr.bf16.mxu1 %v2469_v40  ;;  %v8815_v20 = vpop.f32.mrf.mxu1  ;;  %v10261_v40 = vld [vmem:[#allocation45_spill] sm:$0xff] }
 0x240   : > { %v1882_v51 = vpop.f32.mrf.mxu0  ;;  %10254 = vst [vmem:[#allocation98_spill] sm:$0xff] %v8815_v20  ;;  %v1875_v18 = vadd.f32 %v1874_v6, %v10261_v40  ;;  %v8854_v6 = vadd.f32 %v1872_v36, %v10261_v40  ;;  %v10272_v36 = vld [vmem:[#allocation113_spill] sm:$0xff] }
 0x241   : > { %v8818_v44 = vpop.f32.mrf.mxu1  ;;  %v1883_v20 = vadd.f32 %v1882_v51, %v10263_v37 }
 0x242   : > { %v1884_v15 = vpop.f32.mrf.mxu0  ;;  %3039 = vmatpush1.bf16.msra.mxu1 %v10255_v29  ;;  %v10262_v29 = vld [vmem:[#allocation46_spill] sm:$0xff] }
 0x243   : > { %3040 = vmatprep.subr.bf16.mxu1 %v2467_v50  ;;  %v8821_v28 = vpop.f32.mrf.mxu1  ;;  %v8835_v50 = vadd.f32 %v8722_v26, %v10233_v60  ;;  %v1885_v2 = vadd.f32 %v1884_v15, %v10263_v37  ;;  %v10267_v60 = vld [vmem:[#allocation108_spill] sm:$0xff]  ;;  %v8861_v53 = vadd.f32 %v1876_v10, %v10262_v29  ;;  %v8870_v40 = vadd.f32 %v10272_v36, %v1883_v20 }
 0x244   : > { %v1886_v52 = vpop.f32.mrf.mxu0  ;;  %10257 = vst [vmem:[#allocation53_spill] sm:$0xff] %v8821_v28  ;;  %v8851_v26 = vadd.f32 %v10267_v60, %v1869_v22 }
 0x245   : > { %v8823_v48 = vpop.f32.mrf.mxu1  ;;  %v1887_v7 = vadd.f32 %v1886_v52, %v10266_v45  ;;  %v10271_v52 = vld [vmem:[#allocation112_spill] sm:$0xff]  ;;  %v8877_v10 = vadd.f32 %v8614_v46, %v1885_v2 }
 0x246   : > { %v1888_v30 = vpop.f32.mrf.mxu0  ;;  %3041 = vmatpush1.bf16.msra.mxu1 %v10256_v39  ;;  %10258 = vst [vmem:[#allocation100_spill] sm:$0xff] %v8823_v48  ;;  %v1879_v39 = vadd.f32 %v1878_v56, %v10262_v29  ;;  %v10268_v56 = vld [vmem:[#allocation110_spill] sm:$0xff] }
 0x247   : > { %v8825_v58 = vpop.f32.mrf.mxu1  ;;  %v8857_v51 = vadd.f32 %v10268_v56, %v1875_v18  ;;  %v1889_v35 = vadd.f32 %v1888_v30, %v10266_v45  ;;  %v10273_v18 = vld [vmem:[#allocation33_spill] sm:$0xff]  ;;  %v8880_v30 = vadd.f32 %v8618_v42, %v1887_v7 }
 0x248   : > { %v1892_v32 = vpop.f32.mrf.mxu0  ;;  %10259 = vst [vmem:[#allocation77_spill] sm:$0xff] %v8825_v58  ;;  %v8867_v22 = vadd.f32 %v10271_v52, %v1879_v39  ;;  %v10275_v39 = vld [vmem:[#allocation38_spill] sm:$0xff] }
 0x249   : > { %v8827_v38 = vpop.f32.mrf.mxu1  ;;  %v8889_v52 = vadd.f32 %v8635_v21, %v1889_v35 }
 0x24a   : > { %v1894_v12 = vpop.f32.mrf.mxu0  ;;  %10260 = vst [vmem:[#allocation102_spill] sm:$0xff] %v8827_v38  ;;  %v10265_v38 = vld [vmem:[#allocation104_spill] sm:$0xff] }
 0x24b   : > { %v8839_v28 = vpop.f32.mrf.mxu1  ;;  %v8842_v58 = vadd.f32 %v10265_v38, %v1859_v62 }
 0x24c   : > { %v1896_v13 = vpop.f32.mrf.mxu0  ;;  %10264 = vst [vmem:[#allocation54_spill] sm:$0xff] %v8839_v28  ;;  %v10269_v28 = vld [vmem:[#allocation34_spill] sm:$0xff] }
 0x24d   : > { %v8874_v4 = vpop.f32.mrf.mxu1 }
 0x24e   : > { %v1898_v47 = vpop.f32.mrf.mxu0 }
 0x24f   : > { %v1899_v45 = vadd.f32 %v1898_v47, %v10275_v39  ;;  %v1897_v47 = vadd.f32 %v1896_v13, %v10275_v39  ;;  %v8900_v7 = vpop.f32.mrf.mxu1 }
 0x250   : > { %v1902_v55 = vpop.f32.mrf.mxu0 }
 0x251   : > { %v1903_v20 = vadd.f32 %v1902_v55, %v10273_v18 }
 0x252   : > { %v1904_v11 = vpop.f32.mrf.mxu0 }
 0x253   : > { %v1905_v60 = vadd.f32 %v1904_v11, %v10273_v18 }
 0x254   : > { %v1906_v57 = vpop.f32.mrf.mxu0 }
 0x255   : > { %v2178_v55 = vadd.f32 %v8718_v14, %v1905_v60  ;;  %v2176_v14 = vadd.f32 %v8707_v16, %v1903_v20  ;;  %v8918_v16 = vpop.f32.mrf.mxu1 }
 0x256   : > { %v1908_v49 = vpop.f32.mrf.mxu0 }
 0x257   : > { %v1909_v38 = vadd.f32 %v1908_v49, %v10269_v28  ;;  %v1907_v49 = vadd.f32 %v1906_v57, %v10269_v28  ;;  %v10276_v28 = vld [vmem:[#allocation30_spill] sm:$0xff] }
 0x258   : > { %v1912_v48 = vpop.f32.mrf.mxu0 }
 0x259   : > { %v1913_v37 = vadd.f32 %v1912_v48, %v10270_v61  ;;  %v10274_v48 = vld [vmem:[#allocation37_spill] sm:$0xff] }
 0x25a   : > { %v1914_v62 = vpop.f32.mrf.mxu0  ;;  %v1893_v29 = vadd.f32 %v1892_v32, %v10274_v48  ;;  %v1895_v46 = vadd.f32 %v1894_v12, %v10274_v48  ;;  %v8906_v12 = vadd.f32 %v8701_v0, %v1899_v45  ;;  %v8915_v0 = vadd.f32 %v8685_v41, %v1897_v47  ;;  %v10279_v45 = vld [vmem:[#allocation59_spill] sm:$0xff] }
 0x25b   : > { %v1915_v15 = vadd.f32 %v1914_v62, %v10270_v61  ;;  %v2182_v62 = vadd.f32 %v8733_v8, %v1909_v38  ;;  %v2186_v42 = vadd.f32 %v8739_v54, %v1913_v37  ;;  %v8897_v8 = vadd.f32 %v8728_v59, %v1907_v49  ;;  %v10277_v38 = vld [vmem:[#allocation58_spill] sm:$0xff] }
 0x25c   : > { %v1916_v56 = vpop.f32.mrf.mxu0  ;;  %v8903_v21 = vadd.f32 %v8653_v63, %v1893_v29  ;;  %v2168_v60 = vadd.f32 %v8671_v5, %v1895_v46  ;;  %v2329_v20 = vmul.f32 0.01, %v8906_v12 }
 0x25d   : > { %v2188_v11 = vadd.f32 %v8753_v33, %v1915_v15  ;;  %v1917_v57 = vadd.f32 %v1916_v56, %v10276_v28  ;;  %v2333_v35 = vmul.f32 0.01, %v2182_v62  ;;  %v2332_v49 = vmul.f32 0.01, %v8897_v8 }
 0x25e   : > { %v1918_v61 = vpop.f32.mrf.mxu0 }
 0x25f   : > { %v1919_v32 = vadd.f32 %v1918_v61, %v10276_v28  ;;  %v2190_v33 = vadd.f32 %v8767_v27, %v1917_v57  ;;  %v2335_v59 = vmul.f32 0.01, %v2188_v11  ;;  %v2334_v27 = vmul.f32 0.01, %v2186_v42 }
 0x260   : > { %v1922_v2 = vpop.f32.mrf.mxu0  ;;  %v2330_v28 = vmul.f32 0.01, %v2176_v14  ;;  %v2429_v5 = vmax.f32 %v2182_v62, %v2333_v35  ;;  %v2325_v61 = vmul.f32 0.01, %v8889_v52  ;;  %v10280_v35 = vld [vmem:[#allocation55_spill] sm:$0xff] }
 0x261   : > { %v2192_v54 = vadd.f32 %v8775_v23, %v1919_v32  ;;  %v1923_v13 = vadd.f32 %v1922_v2, %v10277_v38  ;;  %v2336_v37 = vmul.f32 0.01, %v2190_v33  ;;  %v2331_v23 = vmul.f32 0.01, %v2178_v55 }
 0x262   : > { %v1924_v15 = vpop.f32.mrf.mxu0  ;;  %v2431_v57 = vmax.f32 %v2188_v11, %v2335_v59  ;;  %v2430_v46 = vmax.f32 %v2186_v42, %v2334_v27  ;;  %v2328_v2 = vmul.f32 0.01, %v8915_v0  ;;  %v2425_v42 = vmax.f32 %v8906_v12, %v2329_v20 }
 0x263   : > { %v2337_v36 = vmul.f32 0.01, %v2192_v54  ;;  %v2196_v18 = vadd.f32 %v8783_v19, %v1923_v13  ;;  %v1925_v63 = vadd.f32 %v1924_v15, %v10277_v38  ;;  %v2432_v48 = vmax.f32 %v2190_v33, %v2336_v37  ;;  %v8930_v13 = vpop.f32.mrf.mxu1 }
 0x264   : > { %v1926_v56 = vpop.f32.mrf.mxu0  ;;  %v2327_v33 = vmul.f32 0.01, %v2168_v60  ;;  %v2428_v37 = vmax.f32 %v8897_v8, %v2332_v49  ;;  %v2326_v15 = vmul.f32 0.01, %v8903_v21  ;;  %v2426_v27 = vmax.f32 %v2176_v14, %v2330_v28  ;;  %v10281_v8 = vld [vmem:[#allocation111_spill] sm:$0xff] }
 0x265   : > { %v2433_v29 = vmax.f32 %v2192_v54, %v2337_v36  ;;  %v8921_v39 = vadd.f32 %v8790_v3, %v1925_v63  ;;  %v1927_v19 = vadd.f32 %v1926_v56, %v10279_v45  ;;  %v2338_v32 = vmul.f32 0.01, %v2196_v18 }
 0x266   : > { %v8925_v41 = vpop.f32.mrf.mxu0  ;;  %v2427_v3 = vmax.f32 %v2178_v55, %v2331_v23  ;;  %v2496_v62 = vpack.c.bf16 %v2432_v48, %v2430_v46  ;;  %v8940_v49 = vadd.f32 %v10281_v8, %v8861_v53  ;;  %v2323_v48 = vmul.f32 0.01, %v8877_v10 }
 0x267   : > { %10278 = vst [vmem:[#allocation71_spill] sm:$0xff] %v8921_v39  ;;  %v2200_v47 = vadd.f32 %v8797_v24, %v1927_v19  ;;  %v2497_v38 = vpack.c.bf16 %v2433_v29, %v2431_v57  ;;  %v2434_v63 = vmax.f32 %v2196_v18, %v2338_v32  ;;  %v2324_v29 = vmul.f32 0.01, %v8880_v30  ;;  %v8944_v19 = vpop.f32.mrf.mxu1  ;;  %v10284_v57 = vld [vmem:[#allocation56_spill] sm:$0xff] }
 0x268   : > { %v1932_v54 = vpop.f32.mrf.mxu0  ;;  %v2495_v36 = vpack.c.bf16 %v2429_v5, %v2427_v3  ;;  %v2423_v12 = vmax.f32 %v2168_v60, %v2327_v33  ;;  %v2424_v18 = vmax.f32 %v8915_v0, %v2328_v2  ;;  %v2494_v20 = vpack.c.bf16 %v2428_v37, %v2426_v27  ;;  %v10286_v0 = vld [vmem:[#allocation109_spill] sm:$0xff] }
 0x269   : > { %v2340_v11 = vmul.f32 0.01, %v2200_v47  ;;  %v1933_v59 = vadd.f32 %v1932_v54, %v10280_v35  ;;  %3042 = vmatprep.subr.bf16.mxu1 %v2497_v38  ;;  %v2321_v53 = vmul.f32 0.01, %v8867_v22  ;;  %v2421_v5 = vmax.f32 %v8889_v52, %v2325_v61 }
 0x26a   : > { %v1934_v24 = vpop.f32.mrf.mxu0  ;;  %3043 = vmatpush2.bf16.msra.mxu1 %v2496_v62  ;;  %v2493_v60 = vpack.c.bf16 %v2425_v42, %v2423_v12  ;;  %v2146_v2 = vadd.f32 %v10286_v0, %v8854_v6  ;;  %v2322_v3 = vmul.f32 0.01, %v8870_v40  ;;  %v2319_v54 = vmul.f32 0.01, %v8857_v51  ;;  %v8966_v62 = vpop.f32.mrf.mxu1 }
 0x26b   : > { %v2436_v55 = vmax.f32 %v2200_v47, %v2340_v11  ;;  %v2206_v23 = vadd.f32 %v8803_v43, %v1933_v59  ;;  %v1935_v56 = vadd.f32 %v1934_v24, %v10280_v35  ;;  %3044 = vmatprep.subr.bf16.mxu1 %v2495_v36  ;;  %v10285_v47 = vld [vmem:[#allocation106_spill] sm:$0xff]  ;;  %v2419_v52 = vmax.f32 %v8877_v10, %v2323_v48  ;;  %v10287_v35 = vld [vmem:[#allocation51_spill] sm:$0xff] }
 0x26c   : > { %v1936_v14 = vpop.f32.mrf.mxu0  ;;  %v2138_v33 = vadd.f32 %v10285_v47, %v8846_v1  ;;  %v2320_v1 = vmul.f32 0.01, %v8940_v49  ;;  %v2420_v6 = vmax.f32 %v8880_v30, %v2324_v29  ;;  %v2418_v24 = vmax.f32 %v8870_v40, %v2322_v3  ;;  %v10289_v48 = vld [vmem:[#allocation99_spill] sm:$0xff] }
 0x26d   : > { %v8947_v43 = vpack.c.bf16 %v2436_v55, %v2434_v63  ;;  %v8950_v28 = vadd.f32 %v8809_v34, %v1935_v56  ;;  %v1937_v46 = vadd.f32 %v1936_v14, %v10284_v57  ;;  %v2422_v34 = vmax.f32 %v8903_v21, %v2326_v15 }
 0x26e   : > { %v8955_v32 = vpop.f32.mrf.mxu0  ;;  %3045 = vmatpush2.bf16.msra.mxu1 %v2494_v20  ;;  %v2342_v61 = vmul.f32 0.01, %v2206_v23  ;;  %v2317_v21 = vmul.f32 0.01, %v8851_v26  ;;  %v2417_v15 = vmax.f32 %v8867_v22, %v2321_v53  ;;  %v2491_v27 = vpack.c.bf16 %v2421_v5, %v2419_v52  ;;  %v8982_v22 = vpop.f32.mrf.mxu1 }
 0x26f   : > { %10282 = vst [vmem:[#allocation74_spill] sm:$0xff] %v8947_v43  ;;  %10283 = vst [vmem:[#allocation103_spill] sm:$0xff] %v8950_v28  ;;  %v2210_v38 = vadd.f32 %v8812_v25, %v1937_v46  ;;  %3046 = vmatprep.subr.bf16.mxu1 %v2493_v60  ;;  %v2492_v11 = vpack.c.bf16 %v2424_v18, %v2422_v34  ;;  %v2318_v25 = vmul.f32 0.01, %v2146_v2  ;;  %v2315_v63 = vmul.f32 0.01, %v2138_v33 }
 0x270   : > { %v1942_v37 = vpop.f32.mrf.mxu0  ;;  %v2415_v30 = vmax.f32 %v8857_v51, %v2319_v54  ;;  %v2438_v55 = vmax.f32 %v2206_v23, %v2342_v61  ;;  %v2122_v29 = vadd.f32 %v10289_v48, %v8835_v50  ;;  %v2416_v12 = vmax.f32 %v8940_v49, %v2320_v1  ;;  %v8996_v50 = vpop.f32.mrf.mxu1  ;;  %v6829_v43 = vld [vmem:[#allocation2 + $0x48] ss:$12 sps:$4 sm:$0xff]  }
 0x271   : > { %v1943_v59 = vadd.f32 %v1942_v37, %v10287_v35  ;;  %v2344_v42 = vmul.f32 0.01, %v2210_v38  ;;  %v2490_v40 = vpack.c.bf16 %v2420_v6, %v2418_v24  ;;  %v2413_v14 = vmax.f32 %v8851_v26, %v2317_v21 }
 0x272   : > { %v8973_v10 = vpop.f32.mrf.mxu0  ;;  %3047 = vmatpush2.bf16.msra.mxu1 %v2492_v11  ;;  %v2489_v23 = vpack.c.bf16 %v2417_v15, %v2415_v30  ;;  %v2414_v20 = vmax.f32 %v2146_v2, %v2318_v25  ;;  %v2311_v53 = vmul.f32 0.01, %v8751_v17  ;;  %v2411_v5 = vmax.f32 %v2138_v33, %v2315_v63  ;;  %v9001_v54 = vpop.f32.mrf.mxu1  ;;  %v10291_v11 = vld [vmem:[#allocation94_spill] sm:$0xff]  ;;  %v6818_v15 = vld [vmem:[#allocation2] ss:$12 sps:$4 sm:$0xff]  }
 0x273   : > { %v8977_v36 = vadd.f32 %v8818_v44, %v1943_v59  ;;  %v2440_v56 = vmax.f32 %v2210_v38, %v2344_v42  ;;  %3048 = vmatprep.subr.bf16.mxu1 %v2491_v27  ;;  %v2313_v44 = vmul.f32 0.01, %v8842_v58  ;;  %v2309_v60 = vmul.f32 0.01, %v2122_v29  ;;  %v10292_v42 = vld [vmem:[#allocation84_spill] sm:$0xff] }
 0x274   : > { %v8980_v8 = vpop.f32.mrf.mxu0  ;;  %v2488_v49 = vpack.c.bf16 %v2416_v12, %v2414_v20  ;;  %v2487_v0 = vpack.c.bf16 %v2413_v14, %v2411_v5  ;;  %v2307_v3 = vmul.f32 0.01, %v8715_v31  ;;  %v2407_v2 = vmax.f32 %v8751_v17, %v2311_v53  ;;  %v9007_v37 = vpop.f32.mrf.mxu1  ;;  %v6827_v20 = vld [vmem:[#allocation2 + $0x4c] ss:$12 sps:$4 sm:$0xff]  }
 0x275   : > { %10288 = vst [vmem:[#allocation49_spill] sm:$0xff] %v8977_v36  ;;  %v8989_v18 = vpack.c.bf16 %v2440_v56, %v2438_v55  ;;  %v2409_v47 = vmax.f32 %v8842_v58, %v2313_v44  ;;  %v2405_v33 = vmax.f32 %v2122_v29, %v2309_v60  ;;  %v6823_v55 = vld [vmem:[#allocation2 + $0x18] ss:$12 sps:$4 sm:$0xff]   ;;  %v6824_v56 = vld [vmem:[#allocation2 + $0x34] ss:$12 sps:$4 sm:$0xff]  }
 0x276   : > { %v8991_v51 = vpop.f32.mrf.mxu0  ;;  %3049 = vmatpush2.bf16.msra.mxu1 %v2490_v40  ;;  %v2403_v38 = vmax.f32 %v8715_v31, %v2307_v3  ;;  %v9012_v59 = vpop.f32.mrf.mxu1  ;;  %v6832_v36 = vld [vmem:[#allocation2 + $0x64] ss:$12 sps:$4 sm:$0xff]  }
 0x277   : > { %10290 = vst [vmem:[#allocation105_spill] sm:$0xff] %v8989_v18  ;;  %3050 = vmatprep.subr.bf16.mxu1 %v2489_v23  ;;  %v2485_v61 = vpack.c.bf16 %v2409_v47, %v2407_v2  ;;  %v6826_v23 = vld [vmem:[#allocation2 + $0x30] ss:$12 sps:$4 sm:$0xff]   ;;  %v10294_v47 = vld [vmem:[#allocation31_spill] sm:$0xff]  ;;  %v9019_v2 = vadd.f32 %v8955_v32, %v10284_v57 }
 0x278   : > { %v8994_v46 = vpop.f32.mrf.mxu0  ;;  %v2483_v6 = vpack.c.bf16 %v2405_v33, %v2403_v38  ;;  %v2257_v27 = vpop.f32.mrf.mxu1  ;;  %v10295_v33 = vld [vmem:[#allocation35_spill] sm:$0xff] }
 0x279   : > { %v10301_v18 = vld [vmem:[#allocation43_spill] sm:$0xff] }
 0x27a   : > { %v1954_v26 = vpop.f32.mrf.mxu0  ;;  %3051 = vmatpush2.bf16.msra.mxu1 %v2488_v49  ;;  %v2259_v63 = vpop.f32.mrf.mxu1  ;;  %v10293_v49 = vld [vmem:[#allocation36_spill] sm:$0xff] }
 0x27b   : > { %3052 = vmatprep.subr.bf16.mxu1 %v2487_v0 }
 0x27c   : > { %v1956_v34 = vpop.f32.mrf.mxu0  ;;  %v2261_v29 = vpop.f32.mrf.mxu1 }
 0x27e   : > { %v1958_v52 = vpop.f32.mrf.mxu0  ;;  %3053 = vmatpush2.bf16.msra.mxu1 %v8807_v9  ;;  %v6821_v9 = vld [vmem:[#allocation2 + $0x1c] ss:$12 sps:$4 sm:$0xff]   ;;  %v2265_v44 = vpop.f32.mrf.mxu1 }
 0x27f   : > { %3054 = vmatprep.subr.bf16.mxu1 %v2485_v61 }
 0x280   : > { %v9005_v58 = vpop.f32.mrf.mxu0  ;;  %v2267_v53 = vpop.f32.mrf.mxu1 }
 0x282   : > { %v1964_v1 = vpop.f32.mrf.mxu0  ;;  %3055 = vmatpush2.bf16.msra.mxu1 %v10291_v11  ;;  %v10296_v11 = vld [vmem:[#allocation52_spill] sm:$0xff]  ;;  %v2269_v57 = vpop.f32.mrf.mxu1 }
 0x283   : > { %3056 = vmatprep.subr.bf16.mxu1 %v2483_v6  ;;  %v9025_v6 = vadd.f32 %v8973_v10, %v10287_v35 }
 0x284   : > { %v9010_v17 = vpop.f32.mrf.mxu0 }
 0x286   : > { %v1968_v21 = vpop.f32.mrf.mxu0  ;;  %3057 = vmatpush2.bf16.msra.mxu1 %v10292_v42  ;;  %v10297_v42 = vld [vmem:[#allocation47_spill] sm:$0xff] }
 0x288   : > { %v1972_v31 = vpop.f32.mrf.mxu0 }
 0x289   : > { %3059 = vmatmul.mubr.bf16.vlgmr.msra.gmra.mxu1 %v6818_v15  ;;  %v9029_v15 = vadd.f32 %v8991_v51, %v10296_v11 }
 0x28a   : > { %v1974_v25 = vpop.f32.mrf.mxu0  ;;  %3068 = vmatprep.mubr.bf16.mxu1 %v6821_v9  ;;  %v9032_v9 = vadd.f32 %v1954_v26, %v10297_v42 }
 0x28c   : > { %v1976_v24 = vpop.f32.mrf.mxu0 }
 0x28e   : > { %v1978_v30 = vpop.f32.mrf.mxu0 }
 0x290   : > { %v1982_v48 = vpop.f32.mrf.mxu0 }
 0x291   : > { %3069 = vmatmul.mubr.bf16.gmra.mxu1 %v6823_v55  ;;  %v1983_v10 = vadd.f32 %v1982_v48, %v10295_v33 }
 0x292   : > { %v1984_v12 = vpop.f32.mrf.mxu0  ;;  %3078 = vmatprep.mubr.bf16.mxu1 %v6824_v56  ;;  %v10298_v56 = vld [vmem:[#allocation48_spill] sm:$0xff] }
 0x293   : > { %v1985_v61 = vadd.f32 %v1984_v12, %v10295_v33  ;;  %v9036_v12 = vadd.f32 %v1956_v34, %v10298_v56  ;;  %v1959_v35 = vadd.f32 %v1958_v52, %v10298_v56 }
 0x294   : > { %v1986_v40 = vpop.f32.mrf.mxu0 }
 0x295   : > { %v1987_v55 = vadd.f32 %v1986_v40, %v10293_v49  ;;  %v1965_v40 = vadd.f32 %v1964_v1, %v10301_v18  ;;  %v2258_v28 = vadd.f32 %v2257_v27, %v1985_v61 }
 0x296   : > { %v1988_v14 = vpop.f32.mrf.mxu0 }
 0x297   : > { %v1989_v60 = vadd.f32 %v1988_v14, %v10293_v49  ;;  %v10299_v14 = vld [vmem:[#allocation40_spill] sm:$0xff]  ;;  %v10302_v49 = vld [vmem:[#allocation39_spill] sm:$0xff]  ;;  %v2260_v52 = vadd.f32 %v2259_v63, %v1987_v55  ;;  %v2363_v63 = vmul.f32 0.01, %v2258_v28 }
 0x298   : > { %v1992_v5 = vpop.f32.mrf.mxu0  ;;  %v1975_v39 = vadd.f32 %v1974_v25, %v10302_v49  ;;  %v1973_v1 = vadd.f32 %v1972_v31, %v10302_v49  ;;  %v2256_v25 = vadd.f32 %v9012_v59, %v1983_v10  ;;  %v6830_v10 = vld [vmem:[#allocation2 + $0x60] ss:$12 sps:$4 sm:$0xff]  }
 0x299   : > { %v1993_v0 = vadd.f32 %v1992_v5, %v10294_v47  ;;  %3079 = vmatmul.mubr.bf16.gmra.mxu1 %v6826_v23  ;;  %v1979_v23 = vadd.f32 %v1978_v30, %v10299_v14  ;;  %v10303_v30 = vld [vmem:[#allocation44_spill] sm:$0xff] }
 0x29a   : > { %v1994_v3 = vpop.f32.mrf.mxu0  ;;  %3088 = vmatprep.mubr.bf16.mxu1 %v6827_v20  ;;  %v2262_v20 = vadd.f32 %v2261_v29, %v1989_v60  ;;  %v1969_v29 = vadd.f32 %v1968_v21, %v10303_v30  ;;  %v2271_v60 = vpop.f32.mrf.mxu1  ;;  %v1967_v21 = vadd.f32 %v9010_v17, %v10303_v30  ;;  %v2246_v17 = vadd.f32 %v8982_v22, %v1973_v1  ;;  %v10304_v30 = vld [vmem:[#allocation54_spill] sm:$0xff] }
 0x29b   : > { %v1995_v38 = vadd.f32 %v1994_v3, %v10294_v47  ;;  %v2266_v51 = vadd.f32 %v2265_v44, %v1993_v0  ;;  %v10300_v47 = vld [vmem:[#allocation32_spill] sm:$0xff]  ;;  %v2252_v44 = vadd.f32 %v9007_v37, %v1979_v23  ;;  %v1929_v1 = vadd.f32 %v8925_v41, %v10279_v45 }
 0x29c   : > { %v1996_v32 = vpop.f32.mrf.mxu0  ;;  %v2365_v0 = vmul.f32 0.01, %v2262_v20  ;;  %v9054_v37 = vadd.f32 %v8966_v62, %v1969_v29 }
 0x29d   : > { %v2268_v5 = vadd.f32 %v2267_v53, %v1995_v38  ;;  %v1997_v3 = vadd.f32 %v1996_v32, %v10300_v47  ;;  %v1977_v53 = vadd.f32 %v1976_v24, %v10299_v14  ;;  %v2366_v27 = vmul.f32 0.01, %v2266_v51 }
 0x29e   : > { %v1998_v26 = vpop.f32.mrf.mxu0  ;;  %v2248_v24 = vadd.f32 %v8996_v50, %v1975_v39  ;;  %v2364_v32 = vmul.f32 0.01, %v2260_v52  ;;  %v2361_v56 = vmul.f32 0.01, %v2252_v44  ;;  %v2461_v59 = vmax.f32 %v2262_v20, %v2365_v0 }
 0x29f   : > { %v1999_v34 = vadd.f32 %v1998_v26, %v10300_v47  ;;  %v2270_v48 = vadd.f32 %v2269_v57, %v1997_v3  ;;  %v2367_v33 = vmul.f32 0.01, %v2268_v5  ;;  %v2250_v57 = vadd.f32 %v9001_v54, %v1977_v53  ;;  %v6835_v54 = vld [vmem:[#allocation2 + $0x7c] ss:$12 sps:$4 sm:$0xff]  }
 0x2a0   : > { %v2362_v39 = vmul.f32 0.01, %v2256_v25  ;;  %v2462_v50 = vmax.f32 %v2266_v51, %v2366_v27  ;;  %v2359_v62 = vmul.f32 0.01, %v2248_v24  ;;  %v2459_v47 = vmax.f32 %v2258_v28, %v2363_v63 }
 0x2a1   : > { %v2272_v38 = vadd.f32 %v2271_v60, %v1999_v34  ;;  %v2368_v61 = vmul.f32 0.01, %v2270_v48  ;;  %3089 = vmatmul.mubr.bf16.gmra.mxu1 %v6829_v43  ;;  %v2463_v14 = vmax.f32 %v2268_v5, %v2367_v33  ;;  %v1963_v43 = vadd.f32 %v9005_v58, %v10301_v18 }
 0x2a2   : > { %3098 = vmatprep.mubr.bf16.mxu1 %v6832_v36  ;;  %v2238_v36 = vadd.f32 %v8930_v13, %v1965_v40  ;;  %v2240_v26 = vadd.f32 %v8944_v19, %v1967_v21  ;;  %v2360_v49 = vmul.f32 0.01, %v2250_v57  ;;  %v2460_v20 = vmax.f32 %v2260_v52, %v2364_v32  ;;  %v10305_v52 = vld [vmem:[#allocation77_spill] sm:$0xff] }
 0x2a3   : > { %v2369_v55 = vmul.f32 0.01, %v2272_v38  ;;  %v2464_v31 = vmax.f32 %v2270_v48, %v2368_v61  ;;  %v2232_v34 = vadd.f32 %v8900_v7, %v1959_v35  ;;  %v2357_v18 = vmul.f32 0.01, %v9054_v37  ;;  %v10308_v61 = vld [vmem:[#allocation100_spill] sm:$0xff] }
 0x2a4   : > { %v2457_v58 = vmax.f32 %v2252_v44, %v2361_v56  ;;  %v2511_v22 = vpack.c.bf16 %v2461_v59, %v2459_v47  ;;  %v1953_v51 = vadd.f32 %v8994_v46, %v10297_v42  ;;  %v2236_v13 = vadd.f32 %v8918_v16, %v1963_v43 }
 0x2a5   : > { %v2465_v23 = vmax.f32 %v2272_v38, %v2369_v55  ;;  %v2512_v5 = vpack.c.bf16 %v2464_v31, %v2462_v50  ;;  %v2358_v28 = vmul.f32 0.01, %v2246_v17  ;;  %v2458_v40 = vmax.f32 %v2256_v25, %v2362_v39  ;;  %v6833_v38 = vld [vmem:[#allocation2 + $0x78] ss:$12 sps:$4 sm:$0xff]  }
 0x2a6   : > { %v1947_v19 = vadd.f32 %v8980_v8, %v10296_v11  ;;  %v2228_v7 = vadd.f32 %v10304_v30, %v9032_v9  ;;  %v2355_v35 = vmul.f32 0.01, %v2238_v36  ;;  %v2455_v29 = vmax.f32 %v2248_v24, %v2359_v62  ;;  %v10306_v11 = vld [vmem:[#allocation102_spill] sm:$0xff] }
 0x2a7   : > { %v2513_v3 = vpack.c.bf16 %v2465_v23, %v2463_v14  ;;  %v2230_v53 = vadd.f32 %v8874_v4, %v9036_v12  ;;  %v2356_v46 = vmul.f32 0.01, %v2240_v26  ;;  %v2456_v42 = vmax.f32 %v2250_v57, %v2360_v49  ;;  %v10307_v4 = vld [vmem:[#allocation53_spill] sm:$0xff] }
 0x2a8   : > { %v2510_v16 = vpack.c.bf16 %v2460_v20, %v2458_v40  ;;  %v2222_v60 = vadd.f32 %v10305_v52, %v9029_v15  ;;  %v2353_v48 = vmul.f32 0.01, %v2232_v34  ;;  %v2453_v44 = vmax.f32 %v9054_v37, %v2357_v18  ;;  %v6838_v15 = vld [vmem:[#allocation2 + $0x94] ss:$12 sps:$4 sm:$0xff]   ;;  %v10309_v37 = vld [vmem:[#allocation98_spill] sm:$0xff] }
 0x2a9   : > { %3219 = vmatprep.subr.bf16.mxu0 %v2513_v3  ;;  %3099 = vmatmul.mubr.bf16.gmra.mxu1 %v6830_v10  ;;  %v2509_v8 = vpack.c.bf16 %v2457_v58, %v2455_v29  ;;  %v2226_v0 = vadd.f32 %v10306_v11, %v1953_v51  ;;  %v2354_v9 = vmul.f32 0.01, %v2236_v13  ;;  %v2454_v33 = vmax.f32 %v2246_v17, %v2358_v28  ;;  %v10310_v17 = vld [vmem:[#allocation57_spill] sm:$0xff]  ;;  %v6841_v20 = vld [vmem:[#allocation2 + $0xac] ss:$12 sps:$4 sm:$0xff]  }
 0x2aa   : > { %3220 = vmatpush1.bf16.msra.mxu0 %v2512_v5  ;;  %3108 = vmatprep.mubr.bf16.mxu1 %v6835_v54  ;;  %v2218_v12 = vadd.f32 %v10307_v4, %v9025_v6  ;;  %v2351_v25 = vmul.f32 0.01, %v2228_v7  ;;  %v2451_v27 = vmax.f32 %v2238_v36, %v2355_v35  ;;  %v2220_v21 = vadd.f32 %v10308_v61, %v1947_v19  ;;  %v6836_v3 = vld [vmem:[#allocation2 + $0x90] ss:$12 sps:$4 sm:$0xff]   ;;  %v10312_v54 = vld [vmem:[#allocation103_spill] sm:$0xff] }
 0x2ab   : > { %3221 = vmatprep.subr.bf16.mxu0 %v2511_v22  ;;  %v2352_v24 = vmul.f32 0.01, %v2230_v53  ;;  %v2452_v63 = vmax.f32 %v2240_v26, %v2356_v46  ;;  %v2508_v55 = vpack.c.bf16 %v2456_v42, %v2454_v33  ;;  %v2212_v57 = vadd.f32 %v10309_v37, %v9019_v2  ;;  %v10311_v2 = vld [vmem:[#allocation49_spill] sm:$0xff]  ;;  %v10315_v52 = vld [vmem:[#allocation74_spill] sm:$0xff]  ;;  %v6865_v61 = vld [vmem:[#allocation2 + $0x80] ss:$12 sps:$4 sm:$0xff]  }
 0x2ac   : > { %v2349_v32 = vmul.f32 0.01, %v2222_v60  ;;  %v2449_v31 = vmax.f32 %v2232_v34, %v2353_v48  ;;  %v2507_v56 = vpack.c.bf16 %v2453_v44, %v2451_v27  ;;  %v2350_v59 = vmul.f32 0.01, %v2226_v0  ;;  %v6839_v35 = vld [vmem:[#allocation2 + $0xa8] ss:$12 sps:$4 sm:$0xff]  }
 0x2ad   : > { %v2450_v45 = vmax.f32 %v2236_v13, %v2354_v9  ;;  %v2347_v41 = vmul.f32 0.01, %v2218_v12  ;;  %v2447_v6 = vmax.f32 %v2228_v7, %v2351_v25  ;;  %v2348_v14 = vmul.f32 0.01, %v2220_v21  ;;  %v10313_v13 = vld [vmem:[#allocation71_spill] sm:$0xff]  ;;  %v10314_v42 = vld [vmem:[#allocation105_spill] sm:$0xff] }
 0x2ae   : > { %3222 = vmatpush1.bf16.msra.mxu0 %v2510_v16  ;;  %v2448_v23 = vmax.f32 %v2230_v53, %v2352_v24  ;;  %v2202_v39 = vadd.f32 %v10310_v17, %v1929_v1  ;;  %v2345_v50 = vmul.f32 0.01, %v2212_v57  ;;  %v2445_v10 = vmax.f32 %v2222_v60, %v2349_v32  ;;  %v6844_v53 = vld [vmem:[#allocation2 + $0xc4] ss:$12 sps:$4 sm:$0xff]   ;;  %v6845_v16 = vld [vmem:[#allocation2 + $0x8] ss:$12 sps:$4 sm:$0xff]  }
 0x2af   : > { %3223 = vmatprep.subr.bf16.mxu0 %v2509_v8  ;;  %v2506_v43 = vpack.c.bf16 %v2452_v63, %v2450_v45  ;;  %v2505_v36 = vpack.c.bf16 %v2449_v31, %v2447_v6  ;;  %v2346_v62 = vmul.f32 0.01, %v10311_v2  ;;  %v2446_v47 = vmax.f32 %v2226_v0, %v2350_v59  ;;  %v6842_v60 = vld [vmem:[#allocation2 + $0xc0] ss:$12 sps:$4 sm:$0xff]   ;;  %v6848_v48 = vld [vmem:[#allocation2 + $0xdc] ss:$12 sps:$4 sm:$0xff]  }
 0x2b0   : > { %v2343_v26 = vmul.f32 0.01, %v10312_v54  ;;  %v2443_v49 = vmax.f32 %v2218_v12, %v2347_v41  ;;  %v2444_v5 = vmax.f32 %v2220_v21, %v2348_v14  ;;  %v2341_v18 = vmul.f32 0.01, %v2202_v39  ;;  %v6849_v8 = vld [vmem:[#allocation2 + $0x20] ss:$12 sps:$4 sm:$0xff]  }
 0x2b1   : > { %3109 = vmatmul.mubr.bf16.gmra.mxu1 %v6833_v38  ;;  %v2504_v34 = vpack.c.bf16 %v2448_v23, %v2446_v47  ;;  %v2441_v58 = vmax.f32 %v2212_v57, %v2345_v50  ;;  %v2442_v51 = vmax.f32 %v10311_v2, %v2346_v62  ;;  %v2339_v28 = vmul.f32 0.01, %v10313_v13  ;;  %v6846_v11 = vld [vmem:[#allocation2 + $0xd8] ss:$12 sps:$4 sm:$0xff]   ;;  %v6852_v0 = vld [vmem:[#allocation2 + $0xf4] ss:$12 sps:$4 sm:$0xff]  }
 0x2b2   : > { %3224 = vmatpush1.bf16.msra.mxu0 %v2508_v55  ;;  %3118 = vmatprep.mubr.bf16.mxu1 %v6838_v15  ;;  %v2503_v22 = vpack.c.bf16 %v2445_v10, %v2443_v49  ;;  %v2439_v40 = vmax.f32 %v10312_v54, %v2343_v26  ;;  %v2437_v30 = vmax.f32 %v2202_v39, %v2341_v18  ;;  %v10316_v44 = vmov 0   ;;  %v6853_v9 = vld [vmem:[#allocation2 + $0x38] ss:$12 sps:$4 sm:$0xff]   ;;  %v6850_v33 = vld [vmem:[#allocation2 + $0xf0] ss:$12 sps:$4 sm:$0xff]  }
 0x2b3   : > { %3225 = vmatprep.subr.bf16.mxu0 %v2507_v56  ;;  %v2502_v19 = vpack.c.bf16 %v2444_v5, %v2442_v51  ;;  %v2435_v29 = vmax.f32 %v10313_v13, %v2339_v28  ;;  %v6856_v38 = vld [vmem:[#allocation2 + $0x10c] ss:$12 sps:$4 sm:$0xff]   ;;  %v6857_v1 = vld [vmem:[#allocation2 + $0x50] ss:$12 sps:$4 sm:$0xff]   ;;  %v6854_v4 = vld [vmem:[#allocation2 + $0x108] ss:$12 sps:$4 sm:$0xff]  }
 0x2b4   : > { %v2501_v7 = vpack.c.bf16 %v2441_v58, %v2439_v40  ;;  %v6860_v12 = vld [vmem:[#allocation2 + $0x124] ss:$12 sps:$4 sm:$0xff]   ;;  %v6861_v25 = vld [vmem:[#allocation2 + $0x68] ss:$12 sps:$4 sm:$0xff]   ;;  %v6858_v27 = vld [vmem:[#allocation2 + $0x120] ss:$12 sps:$4 sm:$0xff]  }
 0x2b5   : > { %v2499_v46 = vpack.c.bf16 %v2437_v30, %v2435_v29  ;;  %v6864_v15 = vld [vmem:[#allocation2 + $0x13c] ss:$12 sps:$4 sm:$0xff]   ;;  %v6862_v21 = vld [vmem:[#allocation2 + $0x138] ss:$12 sps:$4 sm:$0xff]   ;;  %v6868_v24 = vld [vmem:[#allocation2 + $0x154] ss:$12 sps:$4 sm:$0xff]  }
 0x2b6   : > { %3226 = vmatpush1.bf16.msra.mxu0 %v2506_v43  ;;  %v6869_v63 = vld [vmem:[#allocation2 + $0x98] ss:$12 sps:$4 sm:$0xff]   ;;  %v6866_v55 = vld [vmem:[#allocation2 + $0x150] ss:$12 sps:$4 sm:$0xff]   ;;  %v6870_v32 = vld [vmem:[#allocation2 + $0x168] ss:$12 sps:$4 sm:$0xff]  }
 0x2b7   : > { %3227 = vmatprep.subr.bf16.mxu0 %v2505_v36  ;;  %v6872_v37 = vld [vmem:[#allocation2 + $0x16c] ss:$12 sps:$4 sm:$0xff]   ;;  %v6873_v57 = vld [vmem:[#allocation2 + $0xb0] ss:$12 sps:$4 sm:$0xff]   ;;  %v6874_v31 = vld [vmem:[#allocation2 + $0xc8] ss:$12 sps:$4 sm:$0xff]  }
 0x2b8   : > { %v6875_v56 = vld [vmem:[#allocation2 + $0xe0] ss:$12 sps:$4 sm:$0xff]   ;;  %v6876_v59 = vld [vmem:[#allocation2 + $0xf8] ss:$12 sps:$4 sm:$0xff]   ;;  %v6877_v45 = vld [vmem:[#allocation2 + $0x110] ss:$12 sps:$4 sm:$0xff]  }
 0x2b9   : > { %3119 = vmatmul.mubr.bf16.gmra.mxu1 %v6836_v3  ;;  %v6878_v41 = vld [vmem:[#allocation2 + $0x128] ss:$12 sps:$4 sm:$0xff]   ;;  %v6879_v6 = vld [vmem:[#allocation2 + $0x140] ss:$12 sps:$4 sm:$0xff]   ;;  %v6880_v14 = vld [vmem:[#allocation2 + $0x158] ss:$12 sps:$4 sm:$0xff]  }
 0x2ba   : > { %3228 = vmatpush1.bf16.msra.mxu0 %v2504_v34  ;;  %3128 = vmatprep.mubr.bf16.mxu1 %v6841_v20  ;;  %v6881_v23 = vld [vmem:[#allocation2 + $0x170] ss:$12 sps:$4 sm:$0xff]  }
 0x2bb   : > { %3229 = vmatprep.subr.bf16.mxu0 %v2503_v22 }
 0x2be   : > { %3230 = vmatpush1.bf16.msra.mxu0 %v2502_v19 }
 0x2bf   : > { %3231 = vmatprep.subr.bf16.mxu0 %v2501_v7 }
 0x2c1   : > { %3129 = vmatmul.mubr.bf16.gmra.mxu1 %v6839_v35 }
 0x2c2   : > { %3232 = vmatpush1.bf16.msra.mxu0 %v10314_v42  ;;  %3138 = vmatprep.mubr.bf16.mxu1 %v6844_v53 }
 0x2c3   : > { %3233 = vmatprep.subr.bf16.mxu0 %v2499_v46 }
 0x2c6   : > { %3234 = vmatpush1.bf16.msra.mxu0 %v10315_v52 }
 0x2c9   : > { %3252 = vmatmul.mubr.bf16.vlgmr.msra.gmra.mxu0 %v6845_v16  ;;  %3139 = vmatmul.mubr.bf16.gmra.mxu1 %v6842_v60  ;;  %v10317_v16 = vld [vmem:[#allocation78_spill] sm:$0xff] }
 0x2ca   : > { %3261 = vmatprep.mubr.bf16.mxu0 %v10316_v44  ;;  %3148 = vmatprep.mubr.bf16.mxu1 %v6848_v48 }
 0x2d1   : > { %3262 = vmatmul.mubr.bf16.gmra.mxu0 %v6849_v8  ;;  %3149 = vmatmul.mubr.bf16.gmra.mxu1 %v6846_v11 }
 0x2d2   : > { %3271 = vmatprep.mubr.bf16.mxu0 %v10316_v44  ;;  %3158 = vmatprep.mubr.bf16.mxu1 %v6852_v0 }
 0x2d9   : > { %3272 = vmatmul.mubr.bf16.gmra.mxu0 %v6853_v9  ;;  %3159 = vmatmul.mubr.bf16.gmra.mxu1 %v6850_v33  ;;  %v10318_v33 = vld [vmem:[#allocation79_spill] sm:$0xff] }
 0x2da   : > { %3281 = vmatprep.mubr.bf16.mxu0 %v10316_v44  ;;  %3168 = vmatprep.mubr.bf16.mxu1 %v6856_v38 }
 0x2e1   : > { %3282 = vmatmul.mubr.bf16.gmra.mxu0 %v6857_v1  ;;  %3169 = vmatmul.mubr.bf16.gmra.mxu1 %v6854_v4 }
 0x2e2   : > { %3291 = vmatprep.mubr.bf16.mxu0 %v10316_v44  ;;  %3178 = vmatprep.mubr.bf16.mxu1 %v6860_v12 }
 0x2e9   : > { %3292 = vmatmul.mubr.bf16.gmra.mxu0 %v6861_v25  ;;  %3179 = vmatmul.mubr.bf16.gmra.mxu1 %v6858_v27 }
 0x2ea   : > { %3301 = vmatprep.mubr.bf16.mxu0 %v10316_v44  ;;  %3188 = vmatprep.mubr.bf16.mxu1 %v6864_v15 }
 0x2f1   : > { %3302 = vmatmul.mubr.bf16.gmra.mxu0 %v6865_v61  ;;  %3189 = vmatmul.mubr.bf16.gmra.mxu1 %v6862_v21  ;;  %v10320_v21 = vld [vmem:[#allocation75_spill] sm:$0xff] }
 0x2f2   : > { %3311 = vmatprep.mubr.bf16.mxu0 %v10316_v44  ;;  %3198 = vmatprep.mubr.bf16.mxu1 %v6868_v24 }
 0x2f9   : > { %3312 = vmatmul.mubr.bf16.gmra.mxu0 %v6869_v63  ;;  %3199 = vmatmul.mubr.bf16.gmra.mxu1 %v6866_v55 }
 0x2fa   : > { %3321 = vmatprep.mubr.bf16.mxu0 %v10316_v44  ;;  %3208 = vmatprep.mubr.bf16.mxu1 %v6872_v37 }
 0x301   : > { %3322 = vmatmul.mubr.bf16.gmra.mxu0 %v6873_v57  ;;  %3209 = vmatmul.mubr.bf16.gmra.mxu1 %v6870_v32 }
 0x302   : > { %3331 = vmatprep.mubr.bf16.mxu0 %v10316_v44 }
 0x309   : > { %3332 = vmatmul.mubr.bf16.gmra.mxu0 %v6874_v31 }
 0x30a   : > { %3341 = vmatprep.mubr.bf16.mxu0 %v10316_v44 }
 0x311   : > { %3342 = vmatmul.mubr.bf16.gmra.mxu0 %v6875_v56 }
 0x312   : > { %3351 = vmatprep.mubr.bf16.mxu0 %v10316_v44 }
 0x319   : > { %3352 = vmatmul.mubr.bf16.gmra.mxu0 %v6876_v59 }
 0x31a   : > { %3361 = vmatprep.mubr.bf16.mxu0 %v10316_v44 }
 0x321   : > { %3362 = vmatmul.mubr.bf16.gmra.mxu0 %v6877_v45  ;;  %v10322_v45 = vld [vmem:[#allocation76_spill] sm:$0xff] }
 0x322   : > { %3371 = vmatprep.mubr.bf16.mxu0 %v10316_v44 }
 0x329   : > { %3372 = vmatmul.mubr.bf16.gmra.mxu0 %v6878_v41 }
 0x32a   : > { %3381 = vmatprep.mubr.bf16.mxu0 %v10316_v44 }
 0x331   : > { %3382 = vmatmul.mubr.bf16.gmra.mxu0 %v6879_v6 }
 0x332   : > { %3391 = vmatprep.mubr.bf16.mxu0 %v10316_v44 }
 0x339   : > { %3392 = vmatmul.mubr.bf16.gmra.mxu0 %v6880_v14 }
 0x33a   : > { %3401 = vmatprep.mubr.bf16.mxu0 %v10316_v44 }
 0x341   : > { %3402 = vmatmul.mubr.bf16.gmra.mxu0 %v6881_v23 }
 0x349   : > { %v3060_v43 = vpop.f32.mrf.mxu1 }
 0x34a   : > { %v3061_v52 = vadd.f32 %v3060_v43, %v10317_v16 }
 0x34b   : > { %v3062_v17 = vpop.f32.mrf.mxu1 }
 0x34c   : > { %v3063_v8 = vadd.f32 %v3062_v17, %v10317_v16  ;;  %v10325_v16 = vld [vmem:[#allocation72_spill] sm:$0xff] }
 0x34d   : > { %v3064_v39 = vpop.f32.mrf.mxu1 }
 0x34e   : > { %v3065_v38 = vadd.f32 %v3064_v39, %v10318_v33 }
 0x34f   : > { %v9108_v50 = vpop.f32.mrf.mxu1 }
 0x351   : > { %v3070_v10 = vpop.f32.mrf.mxu1 }
 0x352   : > { %v3071_v24 = vadd.f32 %v3070_v10, %v10320_v21 }
 0x353   : > { %v3072_v36 = vpop.f32.mrf.mxu1 }
 0x354   : > { %v3073_v37 = vadd.f32 %v3072_v36, %v10320_v21 }
 0x355   : > { %v3074_v2 = vpop.f32.mrf.mxu1 }
 0x356   : > { %v3075_v41 = vadd.f32 %v3074_v2, %v10322_v45 }
 0x357   : > { %v9110_v62 = vpop.f32.mrf.mxu1 }
 0x359   : > { %v3080_v47 = vpop.f32.mrf.mxu1 }
 0x35a   : > { %v3081_v36 = vadd.f32 %v3080_v47, %v10325_v16 }
 0x35b   : > { %v9112_v3 = vpop.f32.mrf.mxu1 }
 0x35d   : > { %v9114_v54 = vpop.f32.mrf.mxu1 }
 0x35f   : > { %v9116_v26 = vpop.f32.mrf.mxu1 }
 0x361   : > { %v9118_v49 = vpop.f32.mrf.mxu1 }
 0x363   : > { %v9120_v20 = vpop.f32.mrf.mxu1 }
 0x365   : > { %v9122_v5 = vpop.f32.mrf.mxu1 }
 0x367   : > { %v9124_v34 = vpop.f32.mrf.mxu1 }
 0x369   : > { %v9126_v18 = vpop.f32.mrf.mxu1 }
 0x36b   : > { %v9128_v58 = vpop.f32.mrf.mxu1 }
 0x36d   : > { %v9130_v22 = vpop.f32.mrf.mxu1 }
 0x36f   : > { %v9132_v51 = vpop.f32.mrf.mxu1 }
 0x371   : > { %v9134_v13 = vpop.f32.mrf.mxu1 }
 0x373   : > { %v9136_v28 = vpop.f32.mrf.mxu1 }
 0x375   : > { %v9138_v40 = vpop.f32.mrf.mxu1 }
 0x377   : > { %v9140_v19 = vpop.f32.mrf.mxu1 }
 0x379   : > { %v9142_v30 = vpop.f32.mrf.mxu1 }
 0x37b   : > { %v9144_v7 = vpop.f32.mrf.mxu1 }
 0x37d   : > { %v9146_v35 = vpop.f32.mrf.mxu1 }
 0x37f   : > { %v9148_v29 = vpop.f32.mrf.mxu1 }
 0x381   : > { %v9150_v53 = vpop.f32.mrf.mxu1 }
 0x383   : > { %v9152_v46 = vpop.f32.mrf.mxu1 }
 0x385   : > { %v9154_v42 = vpop.f32.mrf.mxu1 }
 0x387   : > { %v9157_v60 = vpop.f32.mrf.mxu1 }
 0x389   : > { %v3253_v48 = vpop.f32.mrf.mxu0  ;;  %v9160_v11 = vpop.f32.mrf.mxu1 }
 0x38a   : > { %v3254_v0 = vadd.f32 %v3253_v48, %v3061_v52 }
 0x38b   : > { %v3255_v9 = vpop.f32.mrf.mxu0  ;;  %v9163_v1 = vpop.f32.mrf.mxu1 }
 0x38c   : > { %v9165_v4 = vadd.f32 %v3255_v9, %v3063_v8  ;;  %v3412_v25 = vmul.f32 0.01, %v3254_v0 }
 0x38d   : > { %v3257_v12 = vpop.f32.mrf.mxu0  ;;  %v9167_v15 = vpop.f32.mrf.mxu1 }
 0x38e   : > { %10319 = vst [vmem:[#allocation66_spill] sm:$0xff] %v9165_v4  ;;  %v3258_v27 = vadd.f32 %v3257_v12, %v3065_v38  ;;  %v3476_v57 = vmax.f32 %v3254_v0, %v3412_v25  ;;  %v3083_v4 = vadd.f32 %v9112_v3, %v10325_v16  ;;  %v10343_v16 = vld [vmem:[#allocation64_spill] sm:$0xff] }
 0x38f   : > { %v9169_v61 = vpop.f32.mrf.mxu0  ;;  %v9173_v56 = vpop.f32.mrf.mxu1 }
 0x390   : > { %v3414_v63 = vmul.f32 0.01, %v3258_v27  ;;  %10321 = vst [vmem:[#allocation50_spill] sm:$0xff] %v9173_v56 }
 0x391   : > { %v3263_v55 = vpop.f32.mrf.mxu0  ;;  %v9180_v39 = vpop.f32.mrf.mxu1 }
 0x392   : > { %v3478_v32 = vmax.f32 %v3258_v27, %v3414_v63  ;;  %v3264_v31 = vadd.f32 %v3263_v55, %v3071_v24 }
 0x393   : > { %v3265_v59 = vpop.f32.mrf.mxu0  ;;  %v9185_v38 = vpop.f32.mrf.mxu1 }
 0x394   : > { %v9176_v6 = vpack.c.bf16 %v3478_v32, %v3476_v57  ;;  %v9178_v14 = vadd.f32 %v3265_v59, %v3073_v37  ;;  %v3416_v43 = vmul.f32 0.01, %v3264_v31 }
 0x395   : > { %v3267_v23 = vpop.f32.mrf.mxu0  ;;  %v9193_v27 = vpop.f32.mrf.mxu1 }
 0x396   : > { %10323 = vst [vmem:[#allocation107_spill] sm:$0xff] %v9176_v6  ;;  %10324 = vst [vmem:[#allocation91_spill] sm:$0xff] %v9178_v14  ;;  %v3268_v17 = vadd.f32 %v3267_v23, %v3075_v41  ;;  %v3480_v8 = vmax.f32 %v3264_v31, %v3416_v43  ;;  %v6884_v23 = vld [vmem:[#allocation5 + $0x4] ss:$8 sps:$4 sm:$0xff]   ;;  %v2703_v6 = vpop.permute.xlu0 %2702  ;;  %v10336_v14 = vld [vmem:[#allocation73_spill] sm:$0xff] }
 0x397   : > { %v3269_v10 = vpop.f32.mrf.mxu0  ;;  %v9199_v47 = vpop.f32.mrf.mxu1  ;;  %3988 = vmatprep.mubr.bf16.mxu1 %v6884_v23 }
 0x398   : > { %v3418_v52 = vmul.f32 0.01, %v3268_v17 }
 0x399   : > { %v3273_v48 = vpop.f32.mrf.mxu0  ;;  %v9205_v37 = vpop.f32.mrf.mxu1 }
 0x39a   : > { %v3482_v0 = vmax.f32 %v3268_v17, %v3418_v52  ;;  %v9183_v9 = vadd.f32 %v3273_v48, %v3081_v36 }
 0x39b   : > { %v9187_v2 = vpop.f32.mrf.mxu0  ;;  %v9211_v31 = vpop.f32.mrf.mxu1 }
 0x39c   : > { %10326 = vst [vmem:[#allocation87_spill] sm:$0xff] %v9183_v9  ;;  %v9189_v12 = vpack.c.bf16 %v3482_v0, %v3480_v8  ;;  %10330 = vst [vmem:[#allocation45_spill] sm:$0xff] %v9211_v31  ;;  %v2708_v31 = vpop.permute.xlu1 %2707  ;;  %v3087_v9 = vadd.f32 %v9116_v26, %v10336_v14 }
 0x39d   : > { %v9191_v25 = vpop.f32.mrf.mxu0  ;;  %v9217_v43 = vpop.f32.mrf.mxu1 }
 0x39e   : > { %10327 = vst [vmem:[#allocation101_spill] sm:$0xff] %v9189_v12  ;;  %10332 = vst [vmem:[#allocation41_spill] sm:$0xff] %v9217_v43  ;;  %v3067_v43 = vadd.f32 %v9108_v50, %v10318_v33  ;;  %v10339_v33 = vld [vmem:[#allocation70_spill] sm:$0xff] }
 0x39f   : > { %v9195_v21 = vpop.f32.mrf.mxu0  ;;  %v9223_v52 = vpop.f32.mrf.mxu1 }
 0x3a0   : > { %10333 = vst [vmem:[#allocation104_spill] sm:$0xff] %v9223_v52  ;;  %v3077_v52 = vadd.f32 %v9110_v62, %v10322_v45  ;;  %v3097_v62 = vadd.f32 %v9124_v34, %v10339_v33  ;;  %v10340_v45 = vld [vmem:[#allocation67_spill] sm:$0xff]  ;;  %v3113_v34 = vadd.f32 %v9136_v28, %v10343_v16 }
 0x3a1   : > { %v9197_v24 = vpop.f32.mrf.mxu0  ;;  %v9229_v0 = vpop.f32.mrf.mxu1  ;;  %v3103_v26 = vadd.f32 %v9128_v58, %v10340_v45 }
 0x3a2   : > { %10328 = vst [vmem:[#allocation96_spill] sm:$0xff] %v9197_v24  ;;  %10334 = vst [vmem:[#allocation42_spill] sm:$0xff] %v9229_v0  ;;  %v3085_v0 = vadd.f32 %v9114_v54, %v10336_v14  ;;  %v10337_v24 = vld [vmem:[#allocation69_spill] sm:$0xff]  ;;  %v9259_v54 = vadd.f32 %v9126_v18, %v10340_v45  ;;  %v10342_v14 = vld [vmem:[#allocation68_spill] sm:$0xff]  ;;  %v2693_v45 = vpop.permute.xlu0 %2692  ;;  %v9287_v28 = vadd.f32 %v3269_v10, %v3077_v52 }
 0x3a3   : > { %v9201_v63 = vpop.f32.mrf.mxu0  ;;  %v9237_v23 = vpop.f32.mrf.mxu1  ;;  %v3093_v50 = vadd.f32 %v9120_v20, %v10337_v24  ;;  %v3107_v20 = vadd.f32 %v9132_v51, %v10342_v14  ;;  %v3141_v10 = vadd.f32 %v9160_v11, %v2693_v45  ;;  %v9306_v52 = vadd.f32 %v9169_v61, %v3067_v43 }
 0x3a4   : > { %10335 = vst [vmem:[#allocation108_spill] sm:$0xff] %v9237_v23  ;;  %v3095_v23 = vadd.f32 %v9122_v5, %v10339_v33  ;;  %10341 = vst [vmem:[#allocation34_spill] sm:$0xff] %v9259_v54  ;;  %v9271_v5 = vadd.f32 %v9134_v13, %v10343_v16  ;;  %v9289_v16 = vpop.permute.xlu1 %2697 }
 0x3a5   : > { %v9203_v55 = vpop.f32.mrf.mxu0  ;;  %v9279_v33 = vpop.f32.mrf.mxu1 }
 0x3a6   : > { %10345 = vst [vmem:[#allocation29_spill] sm:$0xff] %v9279_v33 }
 0x3a7   : > { %v9207_v57 = vpop.f32.mrf.mxu0 }
 0x3a9   : > { %v9209_v32 = vpop.f32.mrf.mxu0 }
 0x3aa   : > { %10329 = vst [vmem:[#allocation90_spill] sm:$0xff] %v9209_v32  ;;  %v9249_v32 = vadd.f32 %v9118_v49, %v10337_v24  ;;  %v9265_v49 = vadd.f32 %v9130_v22, %v10342_v14  ;;  %v10344_v24 = vld [vmem:[#allocation65_spill] sm:$0xff]  ;;  %v10347_v14 = vld [vmem:[#allocation63_spill] sm:$0xff] }
 0x3ab   : > { %v9213_v59 = vpop.f32.mrf.mxu0  ;;  %v3115_v18 = vadd.f32 %v9138_v40, %v10344_v24  ;;  %v3117_v58 = vadd.f32 %v9140_v19, %v10344_v24  ;;  %v3125_v54 = vadd.f32 %v9146_v35, %v10347_v14  ;;  %v3127_v40 = vadd.f32 %v9148_v29, %v10347_v14  ;;  %v10348_v19 = vld [vmem:[#allocation60_spill] sm:$0xff] }
 0x3ac   : > { %10338 = vst [vmem:[#allocation110_spill] sm:$0xff] %v9249_v32  ;;  %v10346_v32 = vld [vmem:[#allocation62_spill] sm:$0xff]  ;;  %v3131_v24 = vadd.f32 %v9150_v53, %v10348_v19  ;;  %v3133_v33 = vadd.f32 %v9152_v46, %v10348_v19  ;;  %v3145_v29 = vadd.f32 %v9167_v15, %v9289_v16  ;;  %v9309_v53 = vadd.f32 %v9180_v39, %v2703_v6 }
 0x3ad   : > { %v9215_v41 = vpop.f32.mrf.mxu0  ;;  %v3121_v51 = vadd.f32 %v9142_v30, %v10346_v32  ;;  %v3123_v13 = vadd.f32 %v9144_v7, %v10346_v32  ;;  %v10349_v30 = vld [vmem:[#allocation61_spill] sm:$0xff]  ;;  %v3143_v32 = vadd.f32 %v9163_v1, %v2693_v45  ;;  %v9312_v46 = vadd.f32 %v9185_v38, %v2703_v6  ;;  %v10350_v45 = vld [vmem:[#allocation95_spill] sm:$0xff] }
 0x3ae   : > { %10331 = vst [vmem:[#allocation46_spill] sm:$0xff] %v9215_v41  ;;  %v3135_v41 = vadd.f32 %v9154_v42, %v10349_v30  ;;  %v3137_v35 = vadd.f32 %v9157_v60, %v10349_v30  ;;  %v9315_v42 = vadd.f32 %v9193_v27, %v2708_v31  ;;  %v9317_v60 = vpop.f32.mrf.mxu1  ;;  %v9320_v1 = vadd.f32 %v9199_v47, %v2708_v31 }
 0x3af   : > { %v9219_v17 = vpop.f32.mrf.mxu0  ;;  %v9323_v15 = vmul.f32 0.01, %v9287_v28  ;;  %v9327_v39 = vadd.f32 %v9205_v37, %v10350_v45  ;;  %v9330_v6 = vadd.f32 %v9187_v2, %v3083_v4  ;;  %v9333_v38 = vadd.f32 %v9191_v25, %v3085_v0 }
 0x3b0   : > { %v9336_v47 = vadd.f32 %v9195_v21, %v3087_v9  ;;  %v9339_v31 = vadd.f32 %v9201_v63, %v3093_v50  ;;  %v9345_v37 = vadd.f32 %v9207_v57, %v3097_v62  ;;  %v9347_v4 = vpop.f32.mrf.mxu1  ;;  %v9358_v50 = vadd.f32 %v9219_v17, %v3107_v20 }
 0x3b1   : > { %v9221_v36 = vpop.f32.mrf.mxu0 }
 0x3b2   : > { %v3304_v17 = vadd.f32 %v9221_v36, %v9271_v5  ;;  %v3431_v36 = vmul.f32 0.01, %v9358_v50 }
 0x3b3   : > { %v9225_v48 = vpop.f32.mrf.mxu0 }
 0x3b5   : > { %v9227_v8 = vpop.f32.mrf.mxu0 }
 0x3b7   : > { %v9231_v44 = vpop.f32.mrf.mxu0 }
 0x3b8   : > { %v9350_v2 = vadd.f32 %v9231_v44, %v3117_v58  ;;  %v9363_v58 = vadd.f32 %v9227_v8, %v3115_v18 }
 0x3b9   : > { %v9233_v56 = vpop.f32.mrf.mxu0 }
 0x3bb   : > { %v3315_v12 = vpop.f32.mrf.mxu0 }
 0x3bd   : > { %v3317_v3 = vpop.f32.mrf.mxu0 }
 0x3be   : > { %v3318_v25 = vadd.f32 %v3317_v3, %v3125_v54  ;;  %v9360_v54 = vpop.f32.mrf.mxu1 }
 0x3bf   : > { %v3319_v22 = vpop.f32.mrf.mxu0 }
 0x3c0   : > { %v3320_v61 = vadd.f32 %v3319_v22, %v3127_v40  ;;  %v3316_v22 = vadd.f32 %v3315_v12, %v3123_v13  ;;  %v9342_v40 = vadd.f32 %v9203_v55, %v3095_v23  ;;  %v9353_v12 = vadd.f32 %v9213_v59, %v3103_v26 }
 0x3c1   : > { %v3323_v7 = vpop.f32.mrf.mxu0  ;;  %v3306_v55 = vadd.f32 %v9225_v48, %v3113_v34  ;;  %v3435_v59 = vmul.f32 0.01, %v9350_v2  ;;  %v3438_v26 = vmul.f32 0.01, %v3318_v25 }
 0x3c2   : > { %v3324_v27 = vadd.f32 %v3323_v7, %v3131_v24  ;;  %v3439_v9 = vmul.f32 0.01, %v3320_v61  ;;  %v3437_v44 = vmul.f32 0.01, %v3316_v22 }
 0x3c3   : > { %v3325_v11 = vpop.f32.mrf.mxu0  ;;  %v3433_v20 = vmul.f32 0.01, %v3306_v55  ;;  %v3499_v5 = vmax.f32 %v9350_v2, %v3435_v59  ;;  %v3427_v2 = vmul.f32 0.01, %v9345_v37 }
 0x3c4   : > { %v3326_v43 = vadd.f32 %v3325_v11, %v3133_v33  ;;  %v3440_v57 = vmul.f32 0.01, %v3324_v27  ;;  %v3503_v34 = vmax.f32 %v3320_v61, %v3439_v9 }
 0x3c5   : > { %v3327_v14 = vpop.f32.mrf.mxu0 }
 0x3c6   : > { %v3328_v33 = vadd.f32 %v3327_v14, %v3135_v41  ;;  %v3441_v21 = vmul.f32 0.01, %v3326_v43  ;;  %v3314_v41 = vadd.f32 %v9233_v56, %v3121_v51  ;;  %v3504_v7 = vmax.f32 %v3324_v27, %v3440_v57  ;;  %v9370_v14 = vpop.f32.mrf.mxu1 }
 0x3c7   : > { %v3329_v0 = vpop.f32.mrf.mxu0 }
 0x3c8   : > { %v3442_v19 = vmul.f32 0.01, %v3328_v33  ;;  %v3330_v63 = vadd.f32 %v3329_v0, %v3137_v35  ;;  %v3505_v56 = vmax.f32 %v3326_v43, %v3441_v21  ;;  %v3436_v30 = vmul.f32 0.01, %v3314_v41  ;;  %v10354_v21 = vld [vmem:[#allocation90_spill] sm:$0xff] }
 0x3c9   : > { %v3333_v23 = vpop.f32.mrf.mxu0  ;;  %v3502_v43 = vmax.f32 %v3318_v25, %v3438_v26  ;;  %v3497_v25 = vmax.f32 %v3306_v55, %v3433_v20  ;;  %v10356_v20 = vld [vmem:[#allocation110_spill] sm:$0xff] }
 0x3ca   : > { %v3443_v62 = vmul.f32 0.01, %v3330_v63  ;;  %v3334_v3 = vadd.f32 %v3333_v23, %v3141_v10  ;;  %v3506_v13 = vmax.f32 %v3328_v33, %v3442_v19  ;;  %v3501_v10 = vmax.f32 %v3316_v22, %v3437_v44  ;;  %v10352_v33 = vld [vmem:[#allocation46_spill] sm:$0xff] }
 0x3cb   : > { %v3335_v48 = vpop.f32.mrf.mxu0  ;;  %v9374_v61 = vadd.f32 %v10352_v33, %v9265_v49  ;;  %v10353_v22 = vld [vmem:[#allocation34_spill] sm:$0xff]  ;;  %v3432_v49 = vmul.f32 0.01, %v3304_v17  ;;  %v3500_v57 = vmax.f32 %v3314_v41, %v3436_v30  ;;  %v3495_v41 = vmax.f32 %v9358_v50, %v3431_v36 }
 0x3cc   : > { %v3507_v51 = vmax.f32 %v3330_v63, %v3443_v62  ;;  %v9366_v24 = vadd.f32 %v3335_v48, %v3143_v32  ;;  %v3444_v8 = vmul.f32 0.01, %v3334_v3  ;;  %v3434_v32 = vmul.f32 0.01, %v9363_v58 }
 0x3cd   : > { %v3337_v35 = vpop.f32.mrf.mxu0  ;;  %v3554_v0 = vpack.c.bf16 %v3506_v13, %v3504_v7  ;;  %v3294_v19 = vadd.f32 %v10354_v21, %v10353_v22  ;;  %v3429_v63 = vmul.f32 0.01, %v9353_v12  ;;  %v3430_v59 = vmul.f32 0.01, %v9374_v61  ;;  %v9387_v13 = vpop.f32.mrf.mxu1 }
 0x3ce   : > { %10351 = vst [vmem:[#allocation112_spill] sm:$0xff] %v9366_v24  ;;  %v3338_v18 = vadd.f32 %v3337_v35, %v3145_v29  ;;  %v3555_v11 = vpack.c.bf16 %v3507_v51, %v3505_v56  ;;  %v3553_v29 = vpack.c.bf16 %v3503_v34, %v3501_v10  ;;  %v3508_v44 = vmax.f32 %v3334_v3, %v3444_v8 }
 0x3cf   : > { %v9377_v9 = vpop.f32.mrf.mxu0  ;;  %v3498_v48 = vmax.f32 %v9363_v58, %v3434_v32  ;;  %v3552_v34 = vpack.c.bf16 %v3502_v43, %v3500_v57  ;;  %v3551_v3 = vpack.c.bf16 %v3499_v5, %v3497_v25  ;;  %v3425_v7 = vmul.f32 0.01, %v9339_v31  ;;  %v9403_v43 = vpop.f32.mrf.mxu1 }
 0x3d0   : > { %v3446_v27 = vmul.f32 0.01, %v3338_v18  ;;  %3956 = vmatprep.subr.bf16.mxu1 %v3555_v11  ;;  %v3428_v35 = vmul.f32 0.01, %v3294_v19  ;;  %v3496_v10 = vmax.f32 %v3304_v17, %v3432_v49  ;;  %v3423_v58 = vmul.f32 0.01, %v9336_v47 }
 0x3d1   : > { %v3343_v23 = vpop.f32.mrf.mxu0  ;;  %3957 = vmatpush1.bf16.msra.mxu1 %v3554_v0  ;;  %v3491_v33 = vmax.f32 %v9345_v37, %v3427_v2  ;;  %v3494_v32 = vmax.f32 %v9374_v61, %v3430_v59 }
 0x3d2   : > { %v3510_v62 = vmax.f32 %v3338_v18, %v3446_v27  ;;  %v3344_v26 = vadd.f32 %v3343_v23, %v9309_v53  ;;  %3958 = vmatprep.subr.bf16.mxu1 %v3553_v29  ;;  %v10357_v53 = vld [vmem:[#allocation96_spill] sm:$0xff]  ;;  %v3493_v18 = vmax.f32 %v9353_v12, %v3429_v63  ;;  %v3550_v0 = vpack.c.bf16 %v3498_v48, %v3496_v10  ;;  %v10360_v48 = vld [vmem:[#allocation87_spill] sm:$0xff] }
 0x3d3   : > { %v3345_v56 = vpop.f32.mrf.mxu0  ;;  %v3284_v30 = vadd.f32 %v10357_v53, %v10356_v20  ;;  %v3421_v12 = vmul.f32 0.01, %v9330_v6  ;;  %v3492_v21 = vmax.f32 %v3294_v19, %v3428_v35  ;;  %v3422_v23 = vmul.f32 0.01, %v9333_v38 }
 0x3d4   : > { %v9391_v51 = vpack.c.bf16 %v3510_v62, %v3508_v44  ;;  %v3346_v55 = vadd.f32 %v3345_v56, %v9312_v46  ;;  %v3448_v11 = vmul.f32 0.01, %v3344_v26  ;;  %v3426_v46 = vmul.f32 0.01, %v9342_v40  ;;  %v9414_v62 = vpop.f32.mrf.mxu1 }
 0x3d5   : > { %v3347_v8 = vpop.f32.mrf.mxu0  ;;  %3959 = vmatpush1.bf16.msra.mxu1 %v3552_v34  ;;  %v3549_v29 = vpack.c.bf16 %v3495_v41, %v3493_v18  ;;  %v3424_v22 = vmul.f32 0.01, %v3284_v30  ;;  %v3548_v44 = vpack.c.bf16 %v3494_v32, %v3492_v21  ;;  %v10361_v41 = vld [vmem:[#allocation91_spill] sm:$0xff]  ;;  %v3486_v20 = vmax.f32 %v9333_v38, %v3422_v23 }
 0x3d6   : > { %10355 = vst [vmem:[#allocation113_spill] sm:$0xff] %v9391_v51  ;;  %v3348_v50 = vadd.f32 %v3347_v8, %v9315_v42  ;;  %3960 = vmatprep.subr.bf16.mxu1 %v3551_v3  ;;  %v3449_v36 = vmul.f32 0.01, %v3346_v55  ;;  %v3489_v42 = vmax.f32 %v9339_v31, %v3425_v7  ;;  %v3512_v37 = vmax.f32 %v3344_v26, %v3448_v11  ;;  %v9428_v53 = vpop.f32.mrf.mxu1  ;;  %v10377_v51 = vld [vmem:[#allocation86_spill] sm:$0xff] }
 0x3d7   : > { %v3349_v17 = vpop.f32.mrf.mxu0  ;;  %v3490_v25 = vmax.f32 %v9342_v40, %v3426_v46  ;;  %v3488_v34 = vmax.f32 %v3284_v30, %v3424_v22  ;;  %v3485_v40 = vmax.f32 %v9330_v6, %v3421_v12  ;;  %v3415_v35 = vmul.f32 0.01, %v9306_v52  ;;  %v10363_v6 = vld [vmem:[#allocation66_spill] sm:$0xff]  ;;  %v10365_v22 = vld [vmem:[#allocation107_spill] sm:$0xff] }
 0x3d8   : > { %v3450_v5 = vmul.f32 0.01, %v3348_v50  ;;  %v3350_v27 = vadd.f32 %v3349_v17, %v9320_v1  ;;  %v3487_v1 = vmax.f32 %v9336_v47, %v3423_v58  ;;  %v3513_v19 = vmax.f32 %v3346_v55, %v3449_v36 }
 0x3d9   : > { %v3353_v63 = vpop.f32.mrf.mxu0  ;;  %3961 = vmatpush1.bf16.msra.mxu1 %v3550_v0  ;;  %v3547_v59 = vpack.c.bf16 %v3491_v33, %v3489_v42  ;;  %v3417_v47 = vmul.f32 0.01, %v10361_v41  ;;  %v3546_v55 = vpack.c.bf16 %v3490_v25, %v3488_v34  ;;  %v3483_v30 = vmax.f32 %v9287_v28, %v9323_v15  ;;  %v10366_v34 = vld [vmem:[#allocation45_spill] sm:$0xff] }
 0x3da   : > { %v3514_v49 = vmax.f32 %v3348_v50, %v3450_v5  ;;  %v3451_v61 = vmul.f32 0.01, %v3350_v27  ;;  %v9409_v57 = vadd.f32 %v3353_v63, %v9327_v39  ;;  %3962 = vmatprep.subr.bf16.mxu1 %v3549_v29  ;;  %v3420_v39 = vmul.f32 0.01, %v10360_v48  ;;  %v3196_v50 = vpop.f32.mrf.mxu1 }
 0x3db   : > { %v9416_v31 = vpop.f32.mrf.mxu0  ;;  %v3545_v10 = vpack.c.bf16 %v3487_v1, %v3485_v40  ;;  %v3413_v18 = vmul.f32 0.01, %v10363_v6  ;;  %v3481_v38 = vmax.f32 %v10361_v41, %v3417_v47  ;;  %v3479_v33 = vmax.f32 %v9306_v52, %v3415_v35  ;;  %v10367_v47 = vld [vmem:[#allocation83_spill] sm:$0xff]  ;;  %v10369_v35 = vld [vmem:[#allocation97_spill] sm:$0xff] }
 0x3dc   : > { %10358 = vst [vmem:[#allocation33_spill] sm:$0xff] %v9409_v57  ;;  %v9418_v2 = vpack.c.bf16 %v3514_v49, %v3512_v37  ;;  %v3515_v26 = vmax.f32 %v3350_v27, %v3451_v61  ;;  %v3484_v8 = vmax.f32 %v10360_v48, %v3420_v39  ;;  %v3200_v15 = vpop.f32.mrf.mxu1  ;;  %v10364_v27 = vld [vmem:[#allocation101_spill] sm:$0xff]  ;;  %v9458_v41 = vadd.f32 %v10366_v34, %v10350_v45  ;;  %v10376_v34 = vld [vmem:[#allocation88_spill] sm:$0xff] }
 0x3dd   : > { %v9421_v56 = vpop.f32.mrf.mxu0  ;;  %3963 = vmatpush1.bf16.msra.mxu1 %v3548_v44  ;;  %v3543_v32 = vpack.c.bf16 %v3483_v30, %v3481_v38  ;;  %v3477_v28 = vmax.f32 %v10363_v6, %v3413_v18  ;;  %v10370_v30 = vld [vmem:[#allocation104_spill] sm:$0xff]  ;;  %v10373_v38 = vld [vmem:[#allocation93_spill] sm:$0xff] }
 0x3de   : > { %10359 = vst [vmem:[#allocation37_spill] sm:$0xff] %v9418_v2  ;;  %3964 = vmatprep.subr.bf16.mxu1 %v3547_v59  ;;  %v9425_v3 = vpack.c.bf16 %v3515_v26, %v3513_v19  ;;  %v3544_v11 = vpack.c.bf16 %v3486_v20, %v3484_v8  ;;  %v3202_v29 = vpop.f32.mrf.mxu1  ;;  %v10368_v20 = vld [vmem:[#allocation80_spill] sm:$0xff]  ;;  %v3197_v2 = vadd.f32 %v3196_v50, %v10377_v51  ;;  %v10378_v57 = vld [vmem:[#allocation85_spill] sm:$0xff] }
 0x3df   : > { %v9430_v7 = vpop.f32.mrf.mxu0  ;;  %v3541_v36 = vpack.c.bf16 %v3479_v33, %v3477_v28  ;;  %v10371_v8 = vld [vmem:[#allocation92_spill] sm:$0xff]  ;;  %v10374_v28 = vld [vmem:[#allocation82_spill] sm:$0xff] }
 0x3e0   : > { %10362 = vst [vmem:[#allocation38_spill] sm:$0xff] %v9425_v3  ;;  %v3204_v42 = vpop.f32.mrf.mxu1  ;;  %v10372_v6 = vld [vmem:[#allocation108_spill] sm:$0xff] }
 0x3e1   : > { %v9436_v58 = vpop.f32.mrf.mxu0  ;;  %3965 = vmatpush1.bf16.msra.mxu1 %v3546_v55  ;;  %v9468_v18 = vadd.f32 %v10372_v6, %v10371_v8  ;;  %v3205_v6 = vadd.f32 %v3204_v42, %v10367_v47 }
 0x3e2   : > { %3966 = vmatprep.subr.bf16.mxu1 %v3545_v10  ;;  %v3206_v37 = vpop.f32.mrf.mxu1  ;;  %v9464_v10 = vadd.f32 %v10370_v30, %v10369_v35  ;;  %v3181_v30 = vadd.f32 %v9347_v4, %v10376_v34 }
 0x3e3   : > { %v9440_v46 = vpop.f32.mrf.mxu0  ;;  %v3207_v40 = vadd.f32 %v3206_v37, %v10367_v47  ;;  %v10379_v47 = vld [vmem:[#allocation89_spill] sm:$0xff] }
 0x3e4   : > { %v3210_v23 = vpop.f32.mrf.mxu1 }
 0x3e5   : > { %v9443_v0 = vpop.f32.mrf.mxu0  ;;  %3967 = vmatpush1.bf16.msra.mxu1 %v3544_v11  ;;  %v3177_v11 = vadd.f32 %v9317_v60, %v10373_v38  ;;  %v3211_v33 = vadd.f32 %v3210_v23, %v10368_v20  ;;  %v3183_v60 = vadd.f32 %v9360_v54, %v10376_v34  ;;  %v3195_v54 = vadd.f32 %v9428_v53, %v10377_v51 }
 0x3e6   : > { %3968 = vmatprep.subr.bf16.mxu1 %v3543_v32  ;;  %v3212_v44 = vpop.f32.mrf.mxu1 }
 0x3e7   : > { %v9446_v17 = vpop.f32.mrf.mxu0  ;;  %v3213_v55 = vadd.f32 %v3212_v44, %v10368_v20 }
 0x3e8   : > { %v3214_v59 = vpop.f32.mrf.mxu1 }
 0x3e9   : > { %v9448_v5 = vpop.f32.mrf.mxu0  ;;  %3969 = vmatpush1.bf16.msra.mxu1 %v10364_v27  ;;  %v10375_v27 = vld [vmem:[#allocation81_spill] sm:$0xff] }
 0x3ea   : > { %3970 = vmatprep.subr.bf16.mxu1 %v3541_v36  ;;  %v3216_v32 = vpop.f32.mrf.mxu1  ;;  %v3203_v36 = vadd.f32 %v3202_v29, %v10374_v28 }
 0x3eb   : > { %v9451_v12 = vpop.f32.mrf.mxu0  ;;  %v3217_v23 = vadd.f32 %v3216_v32, %v10375_v27 }
 0x3ed   : > { %v9453_v52 = vpop.f32.mrf.mxu0  ;;  %3971 = vmatpush1.bf16.msra.mxu1 %v10365_v22  ;;  %v3215_v22 = vadd.f32 %v3214_v59, %v10375_v27  ;;  %v3193_v59 = vadd.f32 %v9414_v62, %v10378_v57  ;;  %v3191_v62 = vadd.f32 %v9403_v43, %v10378_v57 }
 0x3ef   : > { %v3379_v21 = vpop.f32.mrf.mxu0 }
 0x3f1   : > { %v3383_v63 = vpop.f32.mrf.mxu0 }
 0x3f2   : > { %v3384_v51 = vadd.f32 %v3383_v63, %v3191_v62 }
 0x3f3   : > { %v3385_v49 = vpop.f32.mrf.mxu0 }
 0x3f4   : > { %v3386_v32 = vadd.f32 %v3385_v49, %v3193_v59 }
 0x3f5   : > { %v3387_v61 = vpop.f32.mrf.mxu0 }
 0x3f6   : > { %v3465_v43 = vmul.f32 0.01, %v3386_v32 }
 0x3f7   : > { %v3389_v1 = vpop.f32.mrf.mxu0 }
 0x3f9   : > { %v3393_v25 = vpop.f32.mrf.mxu0 }
 0x3fb   : > { %v3395_v19 = vpop.f32.mrf.mxu0 }
 0x3fc   : > { %v3396_v20 = vadd.f32 %v3395_v19, %v3203_v36 }
 0x3fd   : > { %v3397_v26 = vpop.f32.mrf.mxu0 }
 0x3fe   : > { %v3398_v4 = vadd.f32 %v3397_v26, %v3205_v6  ;;  %v3388_v26 = vadd.f32 %v3387_v61, %v3195_v54 }
 0x3ff   : > { %v3399_v48 = vpop.f32.mrf.mxu0 }
 0x400   : > { %v3400_v37 = vadd.f32 %v3399_v48, %v3207_v40  ;;  %v3201_v48 = vadd.f32 %v3200_v15, %v10374_v28  ;;  %v3390_v40 = vadd.f32 %v3389_v1, %v3197_v2  ;;  %v3469_v15 = vmul.f32 0.01, %v3396_v20 }
 0x401   : > { %v3403_v39 = vpop.f32.mrf.mxu0  ;;  %v3470_v28 = vmul.f32 0.01, %v3398_v4  ;;  %v3466_v61 = vmul.f32 0.01, %v3388_v26 }
 0x402   : > { %v3404_v3 = vadd.f32 %v3403_v39, %v3211_v33  ;;  %v3471_v50 = vmul.f32 0.01, %v3400_v37  ;;  %v3187_v33 = vadd.f32 %v9387_v13, %v10379_v47  ;;  %v3394_v19 = vadd.f32 %v3393_v25, %v3201_v48 }
 0x403   : > { %v3405_v45 = vpop.f32.mrf.mxu0  ;;  %v3467_v27 = vmul.f32 0.01, %v3390_v40  ;;  %v3185_v13 = vadd.f32 %v9370_v14, %v10379_v47  ;;  %v3533_v57 = vmax.f32 %v3396_v20, %v3469_v15  ;;  %v3534_v59 = vmax.f32 %v3398_v4, %v3470_v28  ;;  %v10380_v14 = vld [vmem:[#allocation29_spill] sm:$0xff]  ;;  %v10381_v20 = vld [vmem:[#allocation42_spill] sm:$0xff] }
 0x404   : > { %v3406_v44 = vadd.f32 %v3405_v45, %v3213_v55  ;;  %v3380_v1 = vadd.f32 %v3379_v21, %v3187_v33  ;;  %v3468_v53 = vmul.f32 0.01, %v3394_v19  ;;  %v3175_v63 = vadd.f32 %v10380_v14, %v10373_v38  ;;  %v10382_v47 = vld [vmem:[#allocation41_spill] sm:$0xff] }
 0x405   : > { %v3407_v24 = vpop.f32.mrf.mxu0  ;;  %v3378_v21 = vadd.f32 %v9453_v52, %v3185_v13  ;;  %v3531_v48 = vmax.f32 %v3390_v40, %v3467_v27  ;;  %v3171_v52 = vadd.f32 %v10381_v20, %v10371_v8  ;;  %v3366_v4 = vadd.f32 %v9440_v46, %v9468_v18  ;;  %v6887_v14 = vld [vmem:[#allocation5 + $0x14] ss:$8 sps:$4 sm:$0xff]   ;;  %v6891_v20 = vld [vmem:[#allocation5 + $0x30] ss:$8 sps:$4 sm:$0xff]  }
 0x406   : > { %v3408_v29 = vadd.f32 %v3407_v24, %v3215_v22  ;;  %v3473_v45 = vmul.f32 0.01, %v3406_v44  ;;  %v3472_v24 = vmul.f32 0.01, %v3404_v3  ;;  %v3535_v22 = vmax.f32 %v3400_v37, %v3471_v50 }
 0x407   : > { %v3409_v55 = vpop.f32.mrf.mxu0  ;;  %v3370_v37 = vadd.f32 %v9446_v17, %v3177_v11  ;;  %v3529_v17 = vmax.f32 %v3386_v32, %v3465_v43  ;;  %v3368_v11 = vadd.f32 %v9443_v0, %v3175_v63  ;;  %v3462_v40 = vmul.f32 0.01, %v3378_v21  ;;  %v6885_v63 = vld [vmem:[#allocation5 + $0x10] ss:$8 sps:$4 sm:$0xff]  }
 0x408   : > { %v3474_v42 = vmul.f32 0.01, %v3408_v29  ;;  %v3410_v39 = vadd.f32 %v3409_v55, %v3217_v23  ;;  %v3537_v34 = vmax.f32 %v3406_v44, %v3473_v45  ;;  %v3536_v25 = vmax.f32 %v3404_v3, %v3472_v24 }
 0x409   : > { %v3376_v23 = vadd.f32 %v9451_v12, %v3183_v60  ;;  %v3463_v44 = vmul.f32 0.01, %v3380_v1  ;;  %v3569_v55 = vpack.c.bf16 %v3535_v22, %v3533_v57  ;;  %v3374_v3 = vadd.f32 %v9448_v5, %v3181_v30 }
 0x40a   : > { %v3475_v2 = vmul.f32 0.01, %v3410_v39  ;;  %v3538_v36 = vmax.f32 %v3408_v29, %v3474_v42  ;;  %v3464_v12 = vmul.f32 0.01, %v3384_v51  ;;  %v3532_v60 = vmax.f32 %v3394_v19, %v3468_v53 }
 0x40b   : > { %v3461_v50 = vmul.f32 0.01, %v3376_v23  ;;  %v3530_v45 = vmax.f32 %v3388_v26, %v3466_v61  ;;  %v3360_v5 = vadd.f32 %v9430_v7, %v9464_v10  ;;  %v3459_v38 = vmul.f32 0.01, %v3370_v37 }
 0x40c   : > { %v3539_v6 = vmax.f32 %v3410_v39, %v3475_v2  ;;  %v3570_v29 = vpack.c.bf16 %v3538_v36, %v3536_v25  ;;  %v3568_v42 = vpack.c.bf16 %v3534_v59, %v3532_v60  ;;  %v3527_v30 = vmax.f32 %v3380_v1, %v3463_v44  ;;  %v10387_v44 = vld [vmem:[#allocation37_spill] sm:$0xff] }
 0x40d   : > { %v3567_v39 = vpack.c.bf16 %v3531_v48, %v3529_v17  ;;  %v3165_v8 = vadd.f32 %v10382_v47, %v10369_v35  ;;  %v3364_v33 = vadd.f32 %v9436_v58, %v3171_v52  ;;  %v3460_v46 = vmul.f32 0.01, %v3374_v3  ;;  %v10383_v58 = vld [vmem:[#allocation50_spill] sm:$0xff]  ;;  %v6882_v48 = vld [vmem:[#allocation5] ss:$8 sps:$4 sm:$0xff]  }
 0x40e   : > { %v3571_v49 = vpack.c.bf16 %v3539_v6, %v3537_v34  ;;  %v3528_v18 = vmax.f32 %v3384_v51, %v3464_v12  ;;  %v3356_v0 = vadd.f32 %v9416_v31, %v9458_v41  ;;  %v3457_v54 = vmul.f32 0.01, %v3366_v4  ;;  %v10384_v6 = vld [vmem:[#allocation33_spill] sm:$0xff]  ;;  %v6888_v12 = vld [vmem:[#allocation5 + $0x20] ss:$8 sps:$4 sm:$0xff]  }
 0x40f   : > { %v3525_v19 = vmax.f32 %v3376_v23, %v3461_v50  ;;  %v3358_v24 = vadd.f32 %v9421_v56, %v3165_v8  ;;  %v3458_v7 = vmul.f32 0.01, %v3368_v11  ;;  %v3526_v10 = vmax.f32 %v3378_v21, %v3462_v40  ;;  %v6893_v60 = vld [vmem:[#allocation5 + $0x34] ss:$8 sps:$4 sm:$0xff]   ;;  %v6896_v52 = vld [vmem:[#allocation5 + $0x44] ss:$8 sps:$4 sm:$0xff]  }
 0x410   : > { %3972 = vmatprep.subr.bf16.mxu1 %v3571_v49  ;;  %v3566_v62 = vpack.c.bf16 %v3530_v45, %v3528_v18  ;;  %v3455_v32 = vmul.f32 0.01, %v3360_v5  ;;  %v3523_v15 = vmax.f32 %v3370_v37, %v3459_v38  ;;  %v3456_v35 = vmul.f32 0.01, %v3364_v33  ;;  %v10385_v49 = vld [vmem:[#allocation112_spill] sm:$0xff] }
 0x411   : > { %3973 = vmatpush2.bf16.msra.mxu1 %v3570_v29  ;;  %v3565_v2 = vpack.c.bf16 %v3527_v30, %v3525_v19  ;;  %v3524_v1 = vmax.f32 %v3374_v3, %v3460_v46  ;;  %v3147_v26 = vadd.f32 %v10383_v58, %v9289_v16  ;;  %v3453_v28 = vmul.f32 0.01, %v3356_v0  ;;  %v10386_v29 = vld [vmem:[#allocation38_spill] sm:$0xff]  ;;  %v6890_v3 = vld [vmem:[#allocation5 + $0x24] ss:$8 sps:$4 sm:$0xff]  }
 0x412   : > { %3974 = vmatprep.subr.bf16.mxu1 %v3569_v55  ;;  %v3521_v36 = vmax.f32 %v3366_v4, %v3457_v54  ;;  %v3454_v31 = vmul.f32 0.01, %v3358_v24  ;;  %v3522_v41 = vmax.f32 %v3368_v11, %v3458_v7  ;;  %v3519_v22 = vmax.f32 %v3360_v5, %v3455_v32  ;;  %v10388_v55 = vld [vmem:[#allocation113_spill] sm:$0xff]  ;;  %v6894_v4 = vld [vmem:[#allocation5 + $0x40] ss:$8 sps:$4 sm:$0xff]  }
 0x413   : > { %v3564_v27 = vpack.c.bf16 %v3526_v10, %v3524_v1  ;;  %v3340_v56 = vadd.f32 %v9377_v9, %v3147_v26  ;;  %v3452_v13 = vmul.f32 0.01, %v10384_v6  ;;  %v3520_v51 = vmax.f32 %v3364_v33, %v3456_v35  ;;  %v6899_v50 = vld [vmem:[#allocation5 + $0x54] ss:$8 sps:$4 sm:$0xff]   ;;  %v6897_v17 = vld [vmem:[#allocation5 + $0x50] ss:$8 sps:$4 sm:$0xff]  }
 0x414   : > { %v3563_v34 = vpack.c.bf16 %v3523_v15, %v3521_v36  ;;  %v3517_v53 = vmax.f32 %v3356_v0, %v3453_v28  ;;  %v3518_v25 = vmax.f32 %v3358_v24, %v3454_v31  ;;  %v3445_v21 = vmul.f32 0.01, %v10385_v49  ;;  %v6902_v11 = vld [vmem:[#allocation5 + $0x64] ss:$8 sps:$4 sm:$0xff]   ;;  %v6900_v40 = vld [vmem:[#allocation5 + $0x60] ss:$8 sps:$4 sm:$0xff]   ;;  %v9523_v15 = vpop.permute.xlu0 %3708 }
 0x415   : > { %3975 = vmatpush2.bf16.msra.mxu1 %v3568_v42  ;;  %v3562_v23 = vpack.c.bf16 %v3522_v41, %v3520_v51  ;;  %v3447_v43 = vmul.f32 0.01, %v3340_v56  ;;  %v3516_v57 = vmax.f32 %v10384_v6, %v3452_v13  ;;  %v6905_v45 = vld [vmem:[#allocation5 + $0x74] ss:$8 sps:$4 sm:$0xff]   ;;  %v6903_v42 = vld [vmem:[#allocation5 + $0x70] ss:$8 sps:$4 sm:$0xff]  }
 0x416   : > { %3976 = vmatprep.subr.bf16.mxu1 %v3567_v39  ;;  %v3561_v16 = vpack.c.bf16 %v3519_v22, %v3517_v53  ;;  %v3509_v59 = vmax.f32 %v10385_v49, %v3445_v21  ;;  %v6908_v5 = vld [vmem:[#allocation5 + $0x84] ss:$8 sps:$4 sm:$0xff]   ;;  %v6906_v38 = vld [vmem:[#allocation5 + $0x80] ss:$8 sps:$4 sm:$0xff]   ;;  %v6911_v30 = vld [vmem:[#allocation5 + $0x94] ss:$8 sps:$4 sm:$0xff]  }
 0x417   : > { %v3560_v61 = vpack.c.bf16 %v3518_v25, %v3516_v57  ;;  %v3511_v9 = vmax.f32 %v3340_v56, %v3447_v43  ;;  %v6909_v39 = vld [vmem:[#allocation5 + $0x90] ss:$8 sps:$4 sm:$0xff]   ;;  %v6914_v47 = vld [vmem:[#allocation5 + $0xa4] ss:$8 sps:$4 sm:$0xff]   ;;  %v6912_v8 = vld [vmem:[#allocation5 + $0xa0] ss:$8 sps:$4 sm:$0xff]  }
 0x418   : > { %v6917_v33 = vld [vmem:[#allocation5 + $0xb4] ss:$8 sps:$4 sm:$0xff]   ;;  %v6915_v46 = vld [vmem:[#allocation5 + $0xb0] ss:$8 sps:$4 sm:$0xff]   ;;  %v6920_v18 = vld [vmem:[#allocation5 + $0xc4] ss:$8 sps:$4 sm:$0xff]   ;;  %v9527_v35 = vpop.permute.xlu0 %3698 }
 0x419   : > { %3977 = vmatpush2.bf16.msra.mxu1 %v3566_v62  ;;  %v3557_v37 = vpack.c.bf16 %v3511_v9, %v3509_v59  ;;  %v6918_v0 = vld [vmem:[#allocation5 + $0xc0] ss:$8 sps:$4 sm:$0xff]   ;;  %v6923_v54 = vld [vmem:[#allocation5 + $0xd4] ss:$8 sps:$4 sm:$0xff]   ;;  %v6921_v19 = vld [vmem:[#allocation5 + $0xd0] ss:$8 sps:$4 sm:$0xff]  }
 0x41a   : > { %3978 = vmatprep.subr.bf16.mxu1 %v3565_v2  ;;  %v6926_v24 = vld [vmem:[#allocation5 + $0xe4] ss:$8 sps:$4 sm:$0xff]   ;;  %v6924_v7 = vld [vmem:[#allocation5 + $0xe0] ss:$8 sps:$4 sm:$0xff]   ;;  %v6929_v10 = vld [vmem:[#allocation5 + $0xf4] ss:$8 sps:$4 sm:$0xff]   ;;  %v9525_v2 = vpop.permute.xlu1 %3713 }
 0x41b   : > { %v6927_v62 = vld [vmem:[#allocation5 + $0xf0] ss:$8 sps:$4 sm:$0xff]   ;;  %v10389_v32 = vmov 0  }
 0x41c   : > { %v9531_v58 = vpop.permute.xlu0 %3688 }
 0x41d   : > { %3979 = vmatpush2.bf16.msra.mxu1 %v3564_v27 }
 0x41e   : > { %3980 = vmatprep.subr.bf16.mxu1 %v3563_v34  ;;  %v9529_v1 = vpop.permute.xlu1 %3703 }
 0x420   : > { %v9535_v28 = vpop.permute.xlu0 %3678 }
 0x421   : > { %3981 = vmatpush2.bf16.msra.mxu1 %v3562_v23 }
 0x422   : > { %3982 = vmatprep.subr.bf16.mxu1 %v3561_v16  ;;  %v9533_v26 = vpop.permute.xlu1 %3693 }
 0x424   : > { %v9539_v31 = vpop.permute.xlu0 %3668 }
 0x425   : > { %3983 = vmatpush2.bf16.msra.mxu1 %v3560_v61 }
 0x426   : > { %3984 = vmatprep.subr.bf16.mxu1 %v10386_v29  ;;  %v9537_v36 = vpop.permute.xlu1 %3683 }
 0x428   : > { %v9543_v27 = vpop.permute.xlu0 %3658 }
 0x429   : > { %3985 = vmatpush2.bf16.msra.mxu1 %v10387_v44 }
 0x42a   : > { %3986 = vmatprep.subr.bf16.mxu1 %v3557_v37  ;;  %v9541_v41 = vpop.permute.xlu1 %3673 }
 0x42c   : > { %v3649_v22 = vpop.permute.xlu0 %3648 }
 0x42d   : > { %3987 = vmatpush2.bf16.msra.mxu1 %v10388_v55 }
 0x42e   : > { %v9545_v56 = vpop.permute.xlu1 %3663 }
 0x430   : > { %3989 = vmatmul.mubr.bf16.vlgmr.msra.gmra.mxu1 %v6882_v48  ;;  %v3639_v6 = vpop.permute.xlu0 %3638 }
 0x431   : > { %3998 = vmatprep.mubr.bf16.mxu1 %v6887_v14 }
 0x432   : > { %v3654_v34 = vpop.permute.xlu1 %3653 }
 0x436   : > { %v3644_v23 = vpop.permute.xlu1 %3643 }
 0x438   : > { %3999 = vmatmul.mubr.bf16.gmra.mxu1 %v6885_v63 }
 0x439   : > { %4008 = vmatprep.mubr.bf16.mxu1 %v6890_v3 }
 0x440   : > { %4009 = vmatmul.mubr.bf16.gmra.mxu1 %v6888_v12 }
 0x441   : > { %4018 = vmatprep.mubr.bf16.mxu1 %v6893_v60 }
 0x448   : > { %4019 = vmatmul.mubr.bf16.gmra.mxu1 %v6891_v20 }
 0x449   : > { %4028 = vmatprep.mubr.bf16.mxu1 %v6896_v52 }
 0x450   : > { %4029 = vmatmul.mubr.bf16.gmra.mxu1 %v6894_v4 }
 0x451   : > { %4038 = vmatprep.mubr.bf16.mxu1 %v6899_v50 }
 0x458   : > { %4039 = vmatmul.mubr.bf16.gmra.mxu1 %v6897_v17 }
 0x459   : > { %4048 = vmatprep.mubr.bf16.mxu1 %v6902_v11 }
 0x460   : > { %4049 = vmatmul.mubr.bf16.gmra.mxu1 %v6900_v40 }
 0x461   : > { %4058 = vmatprep.mubr.bf16.mxu1 %v6905_v45 }
 0x468   : > { %4059 = vmatmul.mubr.bf16.gmra.mxu1 %v6903_v42 }
 0x469   : > { %4068 = vmatprep.mubr.bf16.mxu1 %v6908_v5 }
 0x470   : > { %4069 = vmatmul.mubr.bf16.gmra.mxu1 %v6906_v38 }
 0x471   : > { %4078 = vmatprep.mubr.bf16.mxu1 %v6911_v30 }
 0x478   : > { %4079 = vmatmul.mubr.bf16.gmra.mxu1 %v6909_v39 }
 0x479   : > { %4088 = vmatprep.mubr.bf16.mxu1 %v6914_v47 }
 0x480   : > { %4089 = vmatmul.mubr.bf16.gmra.mxu1 %v6912_v8 }
 0x481   : > { %4098 = vmatprep.mubr.bf16.mxu1 %v6917_v33 }
 0x488   : > { %4099 = vmatmul.mubr.bf16.gmra.mxu1 %v6915_v46 }
 0x489   : > { %4108 = vmatprep.mubr.bf16.mxu1 %v6920_v18  ;;  %v9557_v18 = vpop.permute.xlu0 %3788 }
 0x48a   : > { %10391 = vst [vmem:[#allocation58_spill] sm:$0xff] %v9557_v18 }
 0x490   : > { %4109 = vmatmul.mubr.bf16.gmra.mxu1 %v6918_v0 }
 0x491   : > { %4118 = vmatprep.mubr.bf16.mxu1 %v6923_v54 }
 0x498   : > { %4119 = vmatmul.mubr.bf16.gmra.mxu1 %v6921_v19  ;;  %v9561_v19 = vpop.permute.xlu1 %3793 }
 0x499   : > { %4128 = vmatprep.mubr.bf16.mxu1 %v6926_v24  ;;  %10392 = vst [vmem:[#allocation59_spill] sm:$0xff] %v9561_v19 }
 0x4a0   : > { %4129 = vmatmul.mubr.bf16.gmra.mxu1 %v6924_v7  ;;  %v9563_v7 = vpop.permute.xlu0 %3778 }
 0x4a1   : > { %4138 = vmatprep.mubr.bf16.mxu1 %v6929_v10  ;;  %10393 = vst [vmem:[#allocation55_spill] sm:$0xff] %v9563_v7 }
 0x4a8   : > { %4139 = vmatmul.mubr.bf16.gmra.mxu1 %v6927_v62 }
 0x4a9   : > { %5159 = vmatprep.mubr.bf16.mxu1 %v10389_v32 }
 0x4f0   : > { %v3990_v13 = vpop.f32.mrf.mxu1 }
 0x4f1   : > { %v3991_v51 = vadd.f32 %v3990_v13, %v3639_v6 }
 0x4f2   : > { %v3992_v53 = vpop.f32.mrf.mxu1 }
 0x4f3   : > { %v3993_v25 = vadd.f32 %v3992_v53, %v3639_v6  ;;  %v4149_v16 = vmul.f32 0.01, %v3991_v51  ;;  %v9567_v6 = vpop.permute.xlu0 %3768  ;;  %v6932_v53 = vld [vmem:[#allocation7 + $0x4] ss:$8 sps:$4 sm:$0xff]  }
 0x4f4   : > { %v3994_v43 = vpop.f32.mrf.mxu1  ;;  %10395 = vst [vmem:[#allocation56_spill] sm:$0xff] %v9567_v6  ;;  %4533 = vmatprep.mubr.bf16.mxu0 %v6932_v53 }
 0x4f5   : > { %v3995_v57 = vadd.f32 %v3994_v43, %v3644_v23  ;;  %v4150_v21 = vmul.f32 0.01, %v3993_v25  ;;  %v4213_v29 = vmax.f32 %v3991_v51, %v4149_v16 }
 0x4f6   : > { %v3996_v49 = vpop.f32.mrf.mxu1 }
 0x4f7   : > { %v4151_v61 = vmul.f32 0.01, %v3995_v57  ;;  %v3997_v9 = vadd.f32 %v3996_v49, %v3644_v23  ;;  %v4214_v14 = vmax.f32 %v3993_v25, %v4150_v21  ;;  %v9571_v43 = vpop.permute.xlu0 %3758 }
 0x4f8   : > { %v4000_v59 = vpop.f32.mrf.mxu1  ;;  %10397 = vst [vmem:[#allocation109_spill] sm:$0xff] %v9571_v43 }
 0x4f9   : > { %v4215_v37 = vmax.f32 %v3995_v57, %v4151_v61  ;;  %v4152_v44 = vmul.f32 0.01, %v3997_v9  ;;  %v4001_v48 = vadd.f32 %v4000_v59, %v3649_v22 }
 0x4fa   : > { %v4002_v55 = vpop.f32.mrf.mxu1 }
 0x4fb   : > { %v9547_v63 = vpack.c.bf16 %v4215_v37, %v4213_v29  ;;  %v4216_v3 = vmax.f32 %v3997_v9, %v4152_v44  ;;  %v4003_v12 = vadd.f32 %v4002_v55, %v3649_v22  ;;  %v4153_v20 = vmul.f32 0.01, %v4001_v48  ;;  %v9565_v22 = vpop.permute.xlu1 %3783  ;;  %v9575_v61 = vpop.permute.xlu0 %3748 }
 0x4fc   : > { %v4004_v60 = vpop.f32.mrf.mxu1  ;;  %10394 = vst [vmem:[#allocation111_spill] sm:$0xff] %v9565_v22  ;;  %10399 = vst [vmem:[#allocation99_spill] sm:$0xff] %v9575_v61 }
 0x4fd   : > { %10390 = vst [vmem:[#allocation30_spill] sm:$0xff] %v9547_v63  ;;  %v4005_v52 = vadd.f32 %v4004_v60, %v3654_v34  ;;  %v9549_v4 = vpack.c.bf16 %v4216_v3, %v4214_v14  ;;  %v4154_v17 = vmul.f32 0.01, %v4003_v12  ;;  %v4217_v42 = vmax.f32 %v4001_v48, %v4153_v20 }
 0x4fe   : > { %v4006_v50 = vpop.f32.mrf.mxu1 }
 0x4ff   : > { %v4155_v11 = vmul.f32 0.01, %v4005_v52  ;;  %v4007_v40 = vadd.f32 %v4006_v50, %v3654_v34  ;;  %v4218_v39 = vmax.f32 %v4003_v12, %v4154_v17  ;;  %v9569_v25 = vpop.permute.xlu1 %3773  ;;  %v9579_v44 = vpop.permute.xlu0 %3738 }
 0x500   : > { %v9551_v45 = vpop.f32.mrf.mxu1  ;;  %10396 = vst [vmem:[#allocation106_spill] sm:$0xff] %v9569_v25  ;;  %10401 = vst [vmem:[#allocation84_spill] sm:$0xff] %v9579_v44 }
 0x501   : > { %v4219_v5 = vmax.f32 %v4005_v52, %v4155_v11  ;;  %v4156_v38 = vmul.f32 0.01, %v4007_v40 }
 0x502   : > { %v4012_v30 = vpop.f32.mrf.mxu1 }
 0x503   : > { %v9553_v47 = vpack.c.bf16 %v4219_v5, %v4217_v42  ;;  %v4220_v8 = vmax.f32 %v4007_v40, %v4156_v38  ;;  %v9573_v49 = vpop.permute.xlu1 %3763  ;;  %v9589_v20 = vpop.permute.xlu0 %3728  ;;  %v9595_v17 = vadd.f32 %v4012_v30, %v9543_v27 }
 0x504   : > { %v4014_v33 = vpop.f32.mrf.mxu1  ;;  %10398 = vst [vmem:[#allocation51_spill] sm:$0xff] %v9573_v49 }
 0x505   : > { %v9555_v46 = vpack.c.bf16 %v4220_v8, %v4218_v39  ;;  %v9598_v11 = vadd.f32 %v4014_v33, %v9545_v56 }
 0x506   : > { %v4016_v0 = vpop.f32.mrf.mxu1 }
 0x507   : > { %v9577_v29 = vpop.permute.xlu1 %3753  ;;  %v9584_v3 = vadd.f32 %v4016_v0, %v9545_v56 }
 0x508   : > { %v9559_v54 = vpop.f32.mrf.mxu1  ;;  %10400 = vst [vmem:[#allocation94_spill] sm:$0xff] %v9577_v29 }
 0x509   : > { %v9603_v5 = vmul.f32 0.01, %v9584_v3 }
 0x50a   : > { %v4022_v24 = vpop.f32.mrf.mxu1 }
 0x50b   : > { %v9581_v14 = vpop.permute.xlu1 %3743  ;;  %v9606_v38 = vadd.f32 %v4022_v24, %v9539_v31 }
 0x50c   : > { %v4024_v10 = vpop.f32.mrf.mxu1  ;;  %10402 = vst [vmem:[#allocation36_spill] sm:$0xff] %v9581_v14 }
 0x50d   : > { %v9609_v39 = vadd.f32 %v4024_v10, %v9541_v41 }
 0x50e   : > { %v4026_v62 = vpop.f32.mrf.mxu1 }
 0x50f   : > { %v9587_v60 = vadd.f32 %v4026_v62, %v9541_v41 }
 0x510   : > { %v4030_v34 = vpop.f32.mrf.mxu1 }
 0x511   : > { %v9613_v0 = vmul.f32 0.01, %v9587_v60  ;;  %v9623_v24 = vadd.f32 %v4030_v34, %v9535_v28 }
 0x512   : > { %v4032_v13 = vpop.f32.mrf.mxu1 }
 0x513   : > { %v9592_v52 = vadd.f32 %v4032_v13, %v9535_v28  ;;  %v9620_v13 = vpop.permute.xlu1 %3733 }
 0x514   : > { %v4034_v51 = vpop.f32.mrf.mxu1 }
 0x515   : > { %v9626_v41 = vmul.f32 0.01, %v9592_v52 }
 0x516   : > { %v4036_v23 = vpop.f32.mrf.mxu1 }
 0x517   : > { %v9616_v56 = vadd.f32 %v4036_v23, %v9537_v36 }
 0x518   : > { %v4040_v16 = vpop.f32.mrf.mxu1 }
 0x51a   : > { %v4042_v57 = vpop.f32.mrf.mxu1 }
 0x51b   : > { %v4043_v28 = vadd.f32 %v4042_v57, %v9531_v58 }
 0x51c   : > { %v4044_v21 = vpop.f32.mrf.mxu1 }
 0x51d   : > { %v9640_v61 = vadd.f32 %v4044_v21, %v9533_v26  ;;  %v4170_v6 = vmul.f32 0.01, %v4043_v28 }
 0x51e   : > { %v4046_v9 = vpop.f32.mrf.mxu1 }
 0x51f   : > { %v4171_v21 = vmul.f32 0.01, %v9640_v61 }
 0x520   : > { %v4050_v59 = vpop.f32.mrf.mxu1 }
 0x521   : > { %v4051_v34 = vadd.f32 %v4050_v59, %v9527_v35  ;;  %v4041_v59 = vadd.f32 %v4040_v16, %v9531_v58 }
 0x522   : > { %v4052_v37 = vpop.f32.mrf.mxu1 }
 0x523   : > { %v4053_v33 = vadd.f32 %v4052_v37, %v9527_v35  ;;  %v3724_v35 = vpop.permute.xlu1 %3723  ;;  %v4173_v25 = vmul.f32 0.01, %v4051_v34  ;;  %v4169_v16 = vmul.f32 0.01, %v4041_v59 }
 0x524   : > { %v4054_v48 = vpop.f32.mrf.mxu1 }
 0x525   : > { %v4055_v10 = vadd.f32 %v4054_v48, %v9529_v1 }
 0x526   : > { %v4056_v55 = vpop.f32.mrf.mxu1 }
 0x527   : > { %v4057_v40 = vadd.f32 %v4056_v55, %v9529_v1  ;;  %v4174_v1 = vmul.f32 0.01, %v4053_v33 }
 0x528   : > { %v4060_v12 = vpop.f32.mrf.mxu1 }
 0x529   : > { %v4061_v8 = vadd.f32 %v4060_v12, %v9523_v15  ;;  %v4176_v55 = vmul.f32 0.01, %v4057_v40  ;;  %v4238_v18 = vmax.f32 %v4053_v33, %v4174_v1 }
 0x52a   : > { %v4062_v50 = vpop.f32.mrf.mxu1 }
 0x52b   : > { %v4063_v42 = vadd.f32 %v4062_v50, %v9523_v15  ;;  %v4047_v15 = vadd.f32 %v4046_v9, %v9533_v26  ;;  %v3719_v50 = vpop.permute.xlu0 %3718  ;;  %v4177_v32 = vmul.f32 0.01, %v4061_v8  ;;  %v9637_v9 = vmul.f32 0.01, %v9616_v56 }
 0x52c   : > { %v4064_v30 = vpop.f32.mrf.mxu1 }
 0x52d   : > { %v4065_v62 = vadd.f32 %v4064_v30, %v9525_v2  ;;  %v4178_v23 = vmul.f32 0.01, %v4063_v42  ;;  %v9632_v30 = vadd.f32 %v4034_v51, %v9537_v36  ;;  %v4240_v51 = vmax.f32 %v4057_v40, %v4176_v55 }
 0x52e   : > { %v4066_v53 = vpop.f32.mrf.mxu1  ;;  %v4241_v19 = vmax.f32 %v4061_v8, %v4177_v32  ;;  %v4234_v32 = vmax.f32 %v4043_v28, %v4170_v6  ;;  %v4237_v8 = vmax.f32 %v4051_v34, %v4173_v25  ;;  %v4165_v28 = vmul.f32 0.01, %v9623_v24 }
 0x52f   : > { %v4179_v12 = vmul.f32 0.01, %v4065_v62  ;;  %v4067_v37 = vadd.f32 %v4066_v53, %v9525_v2  ;;  %v4172_v2 = vmul.f32 0.01, %v4047_v15  ;;  %v4175_v53 = vmul.f32 0.01, %v4055_v10 }
 0x530   : > { %v4070_v44 = vpop.f32.mrf.mxu1  ;;  %v4242_v43 = vmax.f32 %v4063_v42, %v4178_v23  ;;  %v4167_v58 = vmul.f32 0.01, %v9632_v30  ;;  %v4233_v34 = vmax.f32 %v4041_v59, %v4169_v16  ;;  %v4158_v59 = vmul.f32 0.01, %v9595_v17 }
 0x531   : > { %v4180_v48 = vmul.f32 0.01, %v4067_v37  ;;  %v4071_v14 = vadd.f32 %v4070_v44, %v3719_v50  ;;  %v4243_v29 = vmax.f32 %v4065_v62, %v4179_v12  ;;  %v4236_v63 = vmax.f32 %v4047_v15, %v4172_v2 }
 0x532   : > { %v4072_v36 = vpop.f32.mrf.mxu1  ;;  %v4239_v62 = vmax.f32 %v4055_v10, %v4175_v53  ;;  %v4222_v16 = vmax.f32 %v9595_v17, %v4158_v59 }
 0x533   : > { %v4244_v57 = vmax.f32 %v4067_v37, %v4180_v48  ;;  %v4073_v49 = vadd.f32 %v4072_v36, %v3719_v50  ;;  %v4181_v44 = vmul.f32 0.01, %v4071_v14  ;;  %v4291_v12 = vpack.c.bf16 %v4243_v29, %v4241_v19 }
 0x534   : > { %v4074_v7 = vpop.f32.mrf.mxu1  ;;  %v4290_v37 = vpack.c.bf16 %v4240_v51, %v4238_v18  ;;  %v4232_v19 = vmax.f32 %v9616_v56, %v9637_v9  ;;  %v4235_v29 = vmax.f32 %v9640_v61, %v4171_v21  ;;  %v4289_v10 = vpack.c.bf16 %v4239_v62, %v4237_v8 }
 0x535   : > { %v4075_v22 = vadd.f32 %v4074_v7, %v3724_v35  ;;  %v4292_v26 = vpack.c.bf16 %v4244_v57, %v4242_v43  ;;  %v4182_v42 = vmul.f32 0.01, %v4073_v49  ;;  %v4245_v7 = vmax.f32 %v4071_v14, %v4181_v44 }
 0x536   : > { %v4076_v40 = vpop.f32.mrf.mxu1  ;;  %v4288_v1 = vpack.c.bf16 %v4236_v63, %v4234_v32  ;;  %v4162_v14 = vmul.f32 0.01, %v9606_v38  ;;  %v4230_v61 = vmax.f32 %v9592_v52, %v9626_v41  ;;  %v4287_v53 = vpack.c.bf16 %v4235_v29, %v4233_v34 }
 0x537   : > { %v4183_v55 = vmul.f32 0.01, %v4075_v22  ;;  %v4077_v23 = vadd.f32 %v4076_v40, %v3724_v35  ;;  %4501 = vmatprep.subr.bf16.mxu0 %v4292_v26  ;;  %v4246_v48 = vmax.f32 %v4073_v49, %v4182_v42  ;;  %v4011_v41 = vadd.f32 %v9551_v45, %v9543_v27 }
 0x538   : > { %v4080_v33 = vpop.f32.mrf.mxu1  ;;  %4502 = vmatpush1.bf16.msra.mxu0 %v4291_v12  ;;  %v4286_v52 = vpack.c.bf16 %v4232_v19, %v4230_v61  ;;  %v4229_v26 = vmax.f32 %v9623_v24, %v4165_v28  ;;  %v4224_v12 = vmax.f32 %v9584_v3, %v9603_v5  ;;  %v10404_v61 = vld [vmem:[#allocation111_spill] sm:$0xff] }
 0x539   : > { %v4247_v43 = vmax.f32 %v4075_v22, %v4183_v55  ;;  %v4184_v50 = vmul.f32 0.01, %v4077_v23  ;;  %v4081_v15 = vadd.f32 %v4080_v33, %v9589_v20  ;;  %4503 = vmatprep.subr.bf16.mxu0 %v4290_v37  ;;  %v4021_v22 = vadd.f32 %v9559_v54, %v9539_v31 }
 0x53a   : > { %v4082_v18 = vpop.f32.mrf.mxu1  ;;  %v4228_v31 = vmax.f32 %v9587_v60, %v9613_v0  ;;  %v4231_v54 = vmax.f32 %v9632_v30, %v4167_v58  ;;  %v4226_v60 = vmax.f32 %v9606_v38, %v4162_v14  ;;  %v4157_v38 = vmul.f32 0.01, %v4011_v41 }
 0x53b   : > { %v9649_v2 = vpack.c.bf16 %v4247_v43, %v4245_v7  ;;  %v4248_v6 = vmax.f32 %v4077_v23, %v4184_v50  ;;  %v4083_v25 = vadd.f32 %v4082_v18, %v9589_v20  ;;  %v4185_v63 = vmul.f32 0.01, %v4081_v15 }
 0x53c   : > { %v4084_v56 = vpop.f32.mrf.mxu1  ;;  %4504 = vmatpush1.bf16.msra.mxu0 %v4289_v10  ;;  %v4163_v20 = vmul.f32 0.01, %v9609_v39  ;;  %v4161_v44 = vmul.f32 0.01, %v4021_v22  ;;  %v4285_v45 = vpack.c.bf16 %v4231_v54, %v4229_v26  ;;  %v4284_v23 = vpack.c.bf16 %v4228_v31, %v4226_v60  ;;  %v10403_v10 = vld [vmem:[#allocation30_spill] sm:$0xff]  ;;  %v10406_v31 = vld [vmem:[#allocation55_spill] sm:$0xff] }
 0x53d   : > { %v4085_v49 = vadd.f32 %v4084_v56, %v9620_v13  ;;  %4505 = vmatprep.subr.bf16.mxu0 %v4288_v1  ;;  %v9659_v9 = vpack.c.bf16 %v4248_v6, %v4246_v48  ;;  %v4186_v51 = vmul.f32 0.01, %v4083_v25  ;;  %v4249_v0 = vmax.f32 %v4081_v15, %v4185_v63 }
 0x53e   : > { %v4086_v36 = vpop.f32.mrf.mxu1  ;;  %v4227_v27 = vmax.f32 %v9609_v39, %v4163_v20  ;;  %v4225_v37 = vmax.f32 %v4021_v22, %v4161_v44  ;;  %v4282_v8 = vpack.c.bf16 %v4224_v12, %v4222_v16  ;;  %v4221_v33 = vmax.f32 %v4011_v41, %v4157_v38 }
 0x53f   : > { %v4187_v57 = vmul.f32 0.01, %v4085_v49  ;;  %v4087_v35 = vadd.f32 %v4086_v36, %v9620_v13  ;;  %v4159_v13 = vmul.f32 0.01, %v9598_v11  ;;  %v4250_v24 = vmax.f32 %v4083_v25, %v4186_v51  ;;  %v10408_v51 = vld [vmem:[#allocation106_spill] sm:$0xff] }
 0x540   : > { %v9670_v21 = vpop.f32.mrf.mxu1  ;;  %4506 = vmatpush1.bf16.msra.mxu0 %v4287_v53  ;;  %v4283_v5 = vpack.c.bf16 %v4227_v27, %v4225_v37  ;;  %v10407_v53 = vld [vmem:[#allocation59_spill] sm:$0xff] }
 0x541   : > { %v4251_v30 = vmax.f32 %v4085_v49, %v4187_v57  ;;  %v4188_v62 = vmul.f32 0.01, %v4087_v35  ;;  %4507 = vmatprep.subr.bf16.mxu0 %v4286_v52  ;;  %v4223_v3 = vmax.f32 %v9598_v11, %v4159_v13  ;;  %v10410_v27 = vld [vmem:[#allocation51_spill] sm:$0xff] }
 0x542   : > { %v9677_v40 = vpop.f32.mrf.mxu1 }
 0x543   : > { %v9679_v42 = vpack.c.bf16 %v4251_v30, %v4249_v0  ;;  %v4252_v55 = vmax.f32 %v4087_v35, %v4188_v62  ;;  %v4281_v43 = vpack.c.bf16 %v4223_v3, %v4221_v33  ;;  %v10409_v30 = vld [vmem:[#allocation56_spill] sm:$0xff] }
 0x544   : > { %v9681_v58 = vpop.f32.mrf.mxu1  ;;  %4508 = vmatpush1.bf16.msra.mxu0 %v4285_v45 }
 0x545   : > { %4509 = vmatprep.subr.bf16.mxu0 %v4284_v23  ;;  %v9684_v32 = vpack.c.bf16 %v4252_v55, %v4250_v24 }
 0x546   : > { %v9687_v39 = vpop.f32.mrf.mxu1 }
 0x548   : > { %v9689_v7 = vpop.f32.mrf.mxu1  ;;  %4510 = vmatpush1.bf16.msra.mxu0 %v4283_v5 }
 0x549   : > { %4511 = vmatprep.subr.bf16.mxu0 %v4282_v8 }
 0x54a   : > { %v9691_v50 = vpop.f32.mrf.mxu1 }
 0x54c   : > { %v9693_v15 = vpop.f32.mrf.mxu1  ;;  %4512 = vmatpush1.bf16.msra.mxu0 %v4281_v43  ;;  %v10411_v43 = vld [vmem:[#allocation109_spill] sm:$0xff] }
 0x54d   : > { %4513 = vmatprep.subr.bf16.mxu0 %v9555_v46 }
 0x54e   : > { %v4106_v17 = vpop.f32.mrf.mxu1 }
 0x550   : > { %v4110_v19 = vpop.f32.mrf.mxu1  ;;  %4514 = vmatpush1.bf16.msra.mxu0 %v9553_v47  ;;  %v10405_v47 = vld [vmem:[#allocation58_spill] sm:$0xff] }
 0x551   : > { %4515 = vmatprep.subr.bf16.mxu0 %v9549_v4 }
 0x552   : > { %v4112_v11 = vpop.f32.mrf.mxu1 }
 0x554   : > { %v4114_v29 = vpop.f32.mrf.mxu1  ;;  %4516 = vmatpush1.bf16.msra.mxu0 %v10403_v10  ;;  %v4113_v10 = vadd.f32 %v4112_v11, %v10411_v43  ;;  %v10413_v11 = vld [vmem:[#allocation99_spill] sm:$0xff] }
 0x556   : > { %v4116_v18 = vpop.f32.mrf.mxu1 }
 0x557   : > { %v4117_v45 = vadd.f32 %v4116_v18, %v10410_v27 }
 0x558   : > { %v4120_v1 = vpop.f32.mrf.mxu1 }
 0x559   : > { %v4121_v5 = vadd.f32 %v4120_v1, %v10409_v30  ;;  %v4111_v1 = vadd.f32 %v4110_v19, %v10411_v43 }
 0x55a   : > { %v4122_v48 = vpop.f32.mrf.mxu1 }
 0x55b   : > { %v4123_v62 = vadd.f32 %v4122_v48, %v10409_v30 }
 0x55c   : > { %v4124_v6 = vpop.f32.mrf.mxu1 }
 0x55d   : > { %v4125_v24 = vadd.f32 %v4124_v6, %v10408_v51 }
 0x55e   : > { %v4126_v25 = vpop.f32.mrf.mxu1 }
 0x55f   : > { %v4127_v57 = vadd.f32 %v4126_v25, %v10408_v51  ;;  %v4202_v25 = vmul.f32 0.01, %v4123_v62  ;;  %v4203_v18 = vmul.f32 0.01, %v4125_v24 }
 0x560   : > { %v4130_v22 = vpop.f32.mrf.mxu1 }
 0x561   : > { %v4131_v60 = vadd.f32 %v4130_v22, %v10406_v31  ;;  %v4204_v38 = vmul.f32 0.01, %v4127_v57 }
 0x562   : > { %v4132_v14 = vpop.f32.mrf.mxu1 }
 0x563   : > { %v4133_v54 = vadd.f32 %v4132_v14, %v10406_v31  ;;  %v4205_v8 = vmul.f32 0.01, %v4131_v60  ;;  %v4115_v14 = vadd.f32 %v4114_v29, %v10410_v27  ;;  %v4266_v31 = vmax.f32 %v4123_v62, %v4202_v25  ;;  %v6930_v25 = vld [vmem:[#allocation7] ss:$8 sps:$4 sm:$0xff]  }
 0x564   : > { %v4134_v28 = vpop.f32.mrf.mxu1 }
 0x565   : > { %v4135_v35 = vadd.f32 %v4134_v28, %v10404_v61  ;;  %v4206_v13 = vmul.f32 0.01, %v4133_v54 }
 0x566   : > { %v4136_v34 = vpop.f32.mrf.mxu1 }
 0x567   : > { %v4137_v63 = vadd.f32 %v4136_v34, %v10404_v61  ;;  %v4207_v55 = vmul.f32 0.01, %v4135_v35  ;;  %v4270_v48 = vmax.f32 %v4133_v54, %v4206_v13  ;;  %v10412_v34 = vld [vmem:[#allocation94_spill] sm:$0xff]  ;;  %v4268_v61 = vmax.f32 %v4127_v57, %v4204_v38 }
 0x568   : > { %v4140_v46 = vpop.f32.mrf.mxu1  ;;  %v4105_v29 = vadd.f32 %v9693_v15, %v10412_v34  ;;  %v4199_v54 = vmul.f32 0.01, %v4115_v14 }
 0x569   : > { %v4141_v4 = vadd.f32 %v4140_v46, %v10405_v47  ;;  %v4208_v41 = vmul.f32 0.01, %v4137_v63  ;;  %v4271_v28 = vmax.f32 %v4135_v35, %v4207_v55  ;;  %v4107_v46 = vadd.f32 %v4106_v17, %v10412_v34  ;;  %v6950_v34 = vld [vmem:[#allocation7 + $0x64] ss:$8 sps:$4 sm:$0xff]  }
 0x56a   : > { %v4142_v56 = vpop.f32.mrf.mxu1  ;;  %v4267_v17 = vmax.f32 %v4125_v24, %v4203_v18  ;;  %v4304_v35 = vpack.c.bf16 %v4268_v61, %v4266_v31  ;;  %v6936_v18 = vld [vmem:[#allocation7 + $0x20] ss:$8 sps:$4 sm:$0xff]   ;;  %v6951_v61 = vld [vmem:[#allocation7 + $0x70] ss:$8 sps:$4 sm:$0xff]  }
 0x56b   : > { %v4143_v49 = vadd.f32 %v4142_v56, %v10405_v47  ;;  %v4209_v0 = vmul.f32 0.01, %v4141_v4  ;;  %v4272_v37 = vmax.f32 %v4137_v63, %v4208_v41  ;;  %v4200_v56 = vmul.f32 0.01, %v4117_v45 }
 0x56c   : > { %v4144_v20 = vpop.f32.mrf.mxu1  ;;  %v4201_v47 = vmul.f32 0.01, %v4121_v5  ;;  %v4196_v57 = vmul.f32 0.01, %v4107_v46  ;;  %v4197_v41 = vmul.f32 0.01, %v4111_v1 }
 0x56d   : > { %v4145_v36 = vadd.f32 %v4144_v20, %v10407_v53  ;;  %v4210_v59 = vmul.f32 0.01, %v4143_v49  ;;  %v4273_v33 = vmax.f32 %v4141_v4, %v4209_v0  ;;  %v4306_v63 = vpack.c.bf16 %v4272_v37, %v4270_v48  ;;  %v6935_v48 = vld [vmem:[#allocation7 + $0x14] ss:$8 sps:$4 sm:$0xff]  }
 0x56e   : > { %v4146_v52 = vpop.f32.mrf.mxu1  ;;  %v4103_v4 = vadd.f32 %v9691_v50, %v10413_v11  ;;  %v4198_v20 = vmul.f32 0.01, %v4113_v10  ;;  %v4264_v19 = vmax.f32 %v4117_v45, %v4200_v56  ;;  %v4265_v50 = vmax.f32 %v4121_v5, %v4201_v47  ;;  %v6953_v56 = vld [vmem:[#allocation7 + $0x74] ss:$8 sps:$4 sm:$0xff]   ;;  %v9737_v47 = vpop.permute.xlu1 %4418 }
 0x56f   : > { %v4211_v44 = vmul.f32 0.01, %v4145_v36  ;;  %v4147_v26 = vadd.f32 %v4146_v52, %v10407_v53  ;;  %v4274_v16 = vmax.f32 %v4143_v49, %v4210_v59  ;;  %v4269_v49 = vmax.f32 %v4131_v60, %v4205_v8  ;;  %v10415_v59 = vld [vmem:[#allocation84_spill] sm:$0xff] }
 0x570   : > { %v4101_v52 = vadd.f32 %v9689_v7, %v10413_v11  ;;  %v4262_v15 = vmax.f32 %v4113_v10, %v4198_v20  ;;  %v4195_v0 = vmul.f32 0.01, %v4105_v29  ;;  %v4303_v30 = vpack.c.bf16 %v4267_v17, %v4265_v50 }
 0x571   : > { %v4212_v12 = vmul.f32 0.01, %v4147_v26  ;;  %v4275_v23 = vmax.f32 %v4145_v36, %v4211_v44  ;;  %v4305_v53 = vpack.c.bf16 %v4271_v28, %v4269_v49  ;;  %v10414_v36 = vld [vmem:[#allocation36_spill] sm:$0xff]  ;;  %v4093_v44 = vadd.f32 %v9677_v40, %v10415_v59  ;;  %v6941_v28 = vld [vmem:[#allocation7 + $0x34] ss:$8 sps:$4 sm:$0xff]  }
 0x572   : > { %v4097_v51 = vadd.f32 %v9687_v39, %v10414_v36  ;;  %v4095_v60 = vadd.f32 %v9681_v58, %v10414_v36  ;;  %v4263_v39 = vmax.f32 %v4115_v14, %v4199_v54  ;;  %v4260_v13 = vmax.f32 %v4107_v46, %v4196_v57  ;;  %v6938_v14 = vld [vmem:[#allocation7 + $0x24] ss:$8 sps:$4 sm:$0xff]   ;;  %v6948_v46 = vld [vmem:[#allocation7 + $0x60] ss:$8 sps:$4 sm:$0xff]   ;;  %v9741_v11 = vpop.permute.xlu1 %4408 }
 0x573   : > { %v4276_v3 = vmax.f32 %v4147_v26, %v4212_v12  ;;  %v4307_v6 = vpack.c.bf16 %v4275_v23, %v4273_v33  ;;  %v4194_v26 = vmul.f32 0.01, %v4103_v4  ;;  %v4302_v12 = vpack.c.bf16 %v4264_v19, %v4262_v15 }
 0x574   : > { %v4192_v62 = vmul.f32 0.01, %v4097_v51  ;;  %v4091_v7 = vadd.f32 %v9670_v21, %v10415_v59  ;;  %v4193_v27 = vmul.f32 0.01, %v4101_v52  ;;  %v4261_v45 = vmax.f32 %v4111_v1, %v4197_v41  ;;  %v9735_v1 = vpop.permute.xlu0 %4413 }
 0x575   : > { %v4308_v22 = vpack.c.bf16 %v4276_v3, %v4274_v16  ;;  %v4190_v24 = vmul.f32 0.01, %v4093_v44  ;;  %v4258_v40 = vmax.f32 %v4103_v4, %v4194_v26  ;;  %v4191_v55 = vmul.f32 0.01, %v4095_v60 }
 0x576   : > { %v4259_v23 = vmax.f32 %v4105_v29, %v4195_v0  ;;  %v4301_v38 = vpack.c.bf16 %v4263_v39, %v4261_v45  ;;  %v4256_v37 = vmax.f32 %v4097_v51, %v4192_v62  ;;  %v4189_v16 = vmul.f32 0.01, %v4091_v7  ;;  %v9745_v20 = vpop.permute.xlu1 %4398 }
 0x577   : > { %4517 = vmatprep.subr.bf16.mxu0 %v4308_v22  ;;  %v4300_v58 = vpack.c.bf16 %v4260_v13, %v4258_v40  ;;  %v4257_v3 = vmax.f32 %v4101_v52, %v4193_v27  ;;  %v4254_v5 = vmax.f32 %v4093_v44, %v4190_v24  ;;  %v4255_v8 = vmax.f32 %v4095_v60, %v4191_v55  ;;  %v6933_v22 = vld [vmem:[#allocation7 + $0x10] ss:$8 sps:$4 sm:$0xff]  }
 0x578   : > { %4518 = vmatpush2.bf16.msra.mxu0 %v4307_v6  ;;  %v4253_v21 = vmax.f32 %v4091_v7, %v4189_v16  ;;  %v6939_v6 = vld [vmem:[#allocation7 + $0x30] ss:$8 sps:$4 sm:$0xff]   ;;  %v9739_v49 = vpop.permute.xlu0 %4403 }
 0x579   : > { %4519 = vmatprep.subr.bf16.mxu0 %v4306_v63  ;;  %v4299_v33 = vpack.c.bf16 %v4259_v23, %v4257_v3  ;;  %v4298_v43 = vpack.c.bf16 %v4256_v37, %v4254_v5  ;;  %v10416_v63 = vmov 0  }
 0x57a   : > { %v4297_v10 = vpack.c.bf16 %v4255_v8, %v4253_v21  ;;  %v9749_v29 = vpop.permute.xlu1 %4388 }
 0x57c   : > { %4520 = vmatpush2.bf16.msra.mxu0 %v4305_v53  ;;  %v9743_v4 = vpop.permute.xlu0 %4393 }
 0x57d   : > { %4521 = vmatprep.subr.bf16.mxu0 %v4304_v35 }
 0x57e   : > { %v9753_v17 = vpop.permute.xlu1 %4378 }
 0x580   : > { %4522 = vmatpush2.bf16.msra.mxu0 %v4303_v30  ;;  %v9747_v31 = vpop.permute.xlu0 %4383 }
 0x581   : > { %4523 = vmatprep.subr.bf16.mxu0 %v4302_v12 }
 0x582   : > { %v9757_v36 = vpop.permute.xlu1 %4368 }
 0x584   : > { %4524 = vmatpush2.bf16.msra.mxu0 %v4301_v38  ;;  %v9751_v54 = vpop.permute.xlu0 %4373 }
 0x585   : > { %4525 = vmatprep.subr.bf16.mxu0 %v4300_v58 }
 0x586   : > { %v4359_v57 = vpop.permute.xlu1 %4358 }
 0x588   : > { %4526 = vmatpush2.bf16.msra.mxu0 %v4299_v33  ;;  %v9755_v53 = vpop.permute.xlu0 %4363 }
 0x589   : > { %4527 = vmatprep.subr.bf16.mxu0 %v4298_v43 }
 0x58a   : > { %v4349_v59 = vpop.permute.xlu1 %4348 }
 0x58c   : > { %4528 = vmatpush2.bf16.msra.mxu0 %v4297_v10  ;;  %v4354_v51 = vpop.permute.xlu0 %4353 }
 0x58d   : > { %4529 = vmatprep.subr.bf16.mxu0 %v9684_v32  ;;  %v6944_v32 = vld [vmem:[#allocation7 + $0x44] ss:$8 sps:$4 sm:$0xff]  }
 0x590   : > { %4530 = vmatpush2.bf16.msra.mxu0 %v9679_v42  ;;  %v6942_v42 = vld [vmem:[#allocation7 + $0x40] ss:$8 sps:$4 sm:$0xff]   ;;  %v4344_v19 = vpop.permute.xlu0 %4343 }
 0x591   : > { %4531 = vmatprep.subr.bf16.mxu0 %v9659_v9  ;;  %v6947_v9 = vld [vmem:[#allocation7 + $0x54] ss:$8 sps:$4 sm:$0xff]  }
 0x594   : > { %4532 = vmatpush2.bf16.msra.mxu0 %v9649_v2  ;;  %v6945_v2 = vld [vmem:[#allocation7 + $0x50] ss:$8 sps:$4 sm:$0xff]  }
 0x597   : > { %4534 = vmatmul.mubr.bf16.vlgmr.msra.gmra.mxu0 %v6930_v25 }
 0x598   : > { %4543 = vmatprep.mubr.bf16.mxu0 %v6935_v48 }
 0x59f   : > { %4544 = vmatmul.mubr.bf16.gmra.mxu0 %v6933_v22 }
 0x5a0   : > { %4553 = vmatprep.mubr.bf16.mxu0 %v6938_v14 }
 0x5a7   : > { %4554 = vmatmul.mubr.bf16.gmra.mxu0 %v6936_v18 }
 0x5a8   : > { %4563 = vmatprep.mubr.bf16.mxu0 %v6941_v28 }
 0x5af   : > { %4564 = vmatmul.mubr.bf16.gmra.mxu0 %v6939_v6 }
 0x5b0   : > { %4573 = vmatprep.mubr.bf16.mxu0 %v6944_v32 }
 0x5b7   : > { %4574 = vmatmul.mubr.bf16.gmra.mxu0 %v6942_v42 }
 0x5b8   : > { %4583 = vmatprep.mubr.bf16.mxu0 %v6947_v9 }
 0x5bf   : > { %4584 = vmatmul.mubr.bf16.gmra.mxu0 %v6945_v2 }
 0x5c0   : > { %4593 = vmatprep.mubr.bf16.mxu0 %v6950_v34 }
 0x5c7   : > { %4594 = vmatmul.mubr.bf16.gmra.mxu0 %v6948_v46 }
 0x5c8   : > { %4603 = vmatprep.mubr.bf16.mxu0 %v6953_v56 }
 0x5cf   : > { %4604 = vmatmul.mubr.bf16.gmra.mxu0 %v6951_v61 }
 0x5d0   : > { %4886 = vmatprep.mubr.bf16.mxu0 %v10416_v63 }
 0x657   : > { %v4535_v35 = vpop.f32.mrf.mxu0 }
 0x658   : > { %v4536_v52 = vadd.f32 %v4535_v35, %v4344_v19 }
 0x659   : > { %v4537_v41 = vpop.f32.mrf.mxu0 }
 0x65a   : > { %v4538_v50 = vadd.f32 %v4537_v41, %v4344_v19  ;;  %v4614_v26 = vmul.f32 0.01, %v4536_v52 }
 0x65b   : > { %v4539_v44 = vpop.f32.mrf.mxu0 }
 0x65c   : > { %v4540_v15 = vadd.f32 %v4539_v44, %v4349_v59  ;;  %v4615_v0 = vmul.f32 0.01, %v4538_v50  ;;  %v4646_v13 = vmax.f32 %v4536_v52, %v4614_v26 }
 0x65d   : > { %v4541_v60 = vpop.f32.mrf.mxu0 }
 0x65e   : > { %v4616_v39 = vmul.f32 0.01, %v4540_v15  ;;  %v4542_v30 = vadd.f32 %v4541_v60, %v4349_v59  ;;  %v4647_v24 = vmax.f32 %v4538_v50, %v4615_v0 }
 0x65f   : > { %v4545_v62 = vpop.f32.mrf.mxu0 }
 0x660   : > { %v4648_v12 = vmax.f32 %v4540_v15, %v4616_v39  ;;  %v4617_v7 = vmul.f32 0.01, %v4542_v30  ;;  %v4546_v27 = vadd.f32 %v4545_v62, %v4354_v51 }
 0x661   : > { %v4547_v45 = vpop.f32.mrf.mxu0 }
 0x662   : > { %v9759_v40 = vpack.c.bf16 %v4648_v12, %v4646_v13  ;;  %v4649_v55 = vmax.f32 %v4542_v30, %v4617_v7  ;;  %v4548_v23 = vadd.f32 %v4547_v45, %v4354_v51  ;;  %v4618_v37 = vmul.f32 0.01, %v4546_v27 }
 0x663   : > { %v4549_v38 = vpop.f32.mrf.mxu0 }
 0x664   : > { %v4550_v58 = vadd.f32 %v4549_v38, %v4359_v57  ;;  %v9761_v16 = vpack.c.bf16 %v4649_v55, %v4647_v24  ;;  %v4619_v5 = vmul.f32 0.01, %v4548_v23  ;;  %v4650_v21 = vmax.f32 %v4546_v27, %v4618_v37 }
 0x665   : > { %v4551_v3 = vpop.f32.mrf.mxu0 }
 0x666   : > { %v4620_v8 = vmul.f32 0.01, %v4550_v58  ;;  %v4552_v33 = vadd.f32 %v4551_v3, %v4359_v57  ;;  %v4651_v22 = vmax.f32 %v4548_v23, %v4619_v5 }
 0x667   : > { %v9763_v43 = vpop.f32.mrf.mxu0 }
 0x668   : > { %v4652_v10 = vmax.f32 %v4550_v58, %v4620_v8  ;;  %v4621_v25 = vmul.f32 0.01, %v4552_v33 }
 0x669   : > { %v9765_v48 = vpop.f32.mrf.mxu0 }
 0x66a   : > { %v9767_v14 = vpack.c.bf16 %v4652_v10, %v4650_v21  ;;  %v4653_v18 = vmax.f32 %v4552_v33, %v4621_v25 }
 0x66b   : > { %v9769_v28 = vpop.f32.mrf.mxu0 }
 0x66c   : > { %v9771_v6 = vpack.c.bf16 %v4653_v18, %v4651_v22 }
 0x66d   : > { %v9773_v32 = vpop.f32.mrf.mxu0 }
 0x66f   : > { %v9775_v42 = vpop.f32.mrf.mxu0 }
 0x671   : > { %v9777_v9 = vpop.f32.mrf.mxu0 }
 0x673   : > { %v9779_v2 = vpop.f32.mrf.mxu0 }
 0x675   : > { %v4571_v34 = vpop.f32.mrf.mxu0 }
 0x677   : > { %v4575_v46 = vpop.f32.mrf.mxu0 }
 0x679   : > { %v4577_v56 = vpop.f32.mrf.mxu0 }
 0x67b   : > { %v4579_v61 = vpop.f32.mrf.mxu0 }
 0x67d   : > { %v4581_v51 = vpop.f32.mrf.mxu0 }
 0x67e   : > { %v4582_v5 = vadd.f32 %v4581_v51, %v9749_v29 }
 0x67f   : > { %v4585_v57 = vpop.f32.mrf.mxu0 }
 0x680   : > { %v4586_v18 = vadd.f32 %v4585_v57, %v9743_v4 }
 0x681   : > { %v4587_v19 = vpop.f32.mrf.mxu0 }
 0x682   : > { %v4634_v57 = vmul.f32 0.01, %v4586_v18 }
 0x683   : > { %v4589_v35 = vpop.f32.mrf.mxu0 }
 0x684   : > { %v4590_v8 = vadd.f32 %v4589_v35, %v9745_v20  ;;  %v4572_v35 = vadd.f32 %v4571_v34, %v9753_v17 }
 0x685   : > { %v4591_v52 = vpop.f32.mrf.mxu0 }
 0x686   : > { %v4592_v12 = vadd.f32 %v4591_v52, %v9745_v20  ;;  %v4636_v51 = vmul.f32 0.01, %v4590_v8 }
 0x687   : > { %v4595_v41 = vpop.f32.mrf.mxu0 }
 0x688   : > { %v4596_v38 = vadd.f32 %v4595_v41, %v9739_v49  ;;  %v4668_v34 = vmax.f32 %v4590_v8, %v4636_v51 }
 0x689   : > { %v4597_v50 = vpop.f32.mrf.mxu0 }
 0x68a   : > { %v4598_v62 = vadd.f32 %v4597_v50, %v9739_v49  ;;  %v4578_v49 = vadd.f32 %v4577_v56, %v9747_v31  ;;  %v4568_v56 = vadd.f32 %v9777_v9, %v9751_v54  ;;  %v4666_v9 = vmax.f32 %v4586_v18, %v4634_v57 }
 0x68b   : > { %v4599_v59 = vpop.f32.mrf.mxu0 }
 0x68c   : > { %v4600_v7 = vadd.f32 %v4599_v59, %v9741_v11  ;;  %v4639_v58 = vmul.f32 0.01, %v4598_v62  ;;  %v4580_v59 = vadd.f32 %v4579_v61, %v9749_v29  ;;  %v4570_v29 = vadd.f32 %v9779_v2, %v9753_v17 }
 0x68d   : > { %v4601_v44 = vpop.f32.mrf.mxu0  ;;  %v4560_v2 = vadd.f32 %v9769_v28, %v9757_v36 }
 0x68e   : > { %v4602_v60 = vadd.f32 %v4601_v44, %v9741_v11  ;;  %v4640_v33 = vmul.f32 0.01, %v4600_v7  ;;  %v4637_v11 = vmul.f32 0.01, %v4592_v12  ;;  %v4632_v61 = vmul.f32 0.01, %v4580_v59 }
 0x68f   : > { %v4605_v26 = vpop.f32.mrf.mxu0 }
 0x690   : > { %v4606_v39 = vadd.f32 %v4605_v26, %v9735_v1  ;;  %v4641_v45 = vmul.f32 0.01, %v4602_v60  ;;  %v4672_v44 = vmax.f32 %v4600_v7, %v4640_v33  ;;  %v4633_v26 = vmul.f32 0.01, %v4582_v5 }
 0x691   : > { %v4607_v15 = vpop.f32.mrf.mxu0  ;;  %v4566_v7 = vadd.f32 %v9775_v42, %v9751_v54  ;;  %v4556_v54 = vadd.f32 %v9763_v43, %v9755_v53 }
 0x692   : > { %v4608_v0 = vadd.f32 %v4607_v15, %v9735_v1  ;;  %v4642_v37 = vmul.f32 0.01, %v4606_v39  ;;  %v4588_v1 = vadd.f32 %v4587_v19, %v9743_v4  ;;  %v4673_v10 = vmax.f32 %v4602_v60, %v4641_v45 }
 0x693   : > { %v4609_v30 = vpop.f32.mrf.mxu0  ;;  %v4671_v19 = vmax.f32 %v4598_v62, %v4639_v58  ;;  %v4669_v15 = vmax.f32 %v4592_v12, %v4637_v11  ;;  %v4576_v4 = vadd.f32 %v4575_v46, %v9747_v31  ;;  %v4629_v12 = vmul.f32 0.01, %v4572_v35 }
 0x694   : > { %v4610_v13 = vadd.f32 %v4609_v30, %v9737_v47  ;;  %v4643_v24 = vmul.f32 0.01, %v4608_v0  ;;  %v4674_v52 = vmax.f32 %v4606_v39, %v4642_v37  ;;  %v4635_v41 = vmul.f32 0.01, %v4588_v1 }
 0x695   : > { %v4611_v27 = vpop.f32.mrf.mxu0  ;;  %v4691_v60 = vpack.c.bf16 %v4673_v10, %v4671_v19  ;;  %v4631_v39 = vmul.f32 0.01, %v4578_v49  ;;  %v4665_v31 = vmax.f32 %v4582_v5, %v4633_v26  ;;  %v4558_v45 = vadd.f32 %v9765_v48, %v9755_v53  ;;  %v9824_v19 = vpop.permute.xlu0 %4798 }
 0x696   : > { %v4644_v55 = vmul.f32 0.01, %v4610_v13  ;;  %v4612_v23 = vadd.f32 %v4611_v27, %v9737_v47  ;;  %v4675_v25 = vmax.f32 %v4608_v0, %v4643_v24  ;;  %v4638_v47 = vmul.f32 0.01, %v4596_v38 }
 0x697   : > { %v4667_v30 = vmax.f32 %v4588_v1, %v4635_v41  ;;  %v4630_v27 = vmul.f32 0.01, %v4576_v4  ;;  %v4627_v24 = vmul.f32 0.01, %v4568_v56  ;;  %v4663_v17 = vmax.f32 %v4578_v49, %v4631_v39  ;;  %v6956_v49 = vld [vmem:[#allocation8 + $0x10] sm:$0xff]   ;;  %v6957_v41 = vld [vmem:[#allocation8 + $0x18] sm:$0xff]  }
 0x698   : > { %v4645_v3 = vmul.f32 0.01, %v4612_v23  ;;  %v4676_v21 = vmax.f32 %v4610_v13, %v4644_v55  ;;  %v4670_v0 = vmax.f32 %v4596_v38, %v4638_v47  ;;  %v4562_v13 = vadd.f32 %v9773_v32, %v9757_v36  ;;  %v6954_v47 = vld [vmem:[#allocation8] sm:$0xff]  }
 0x699   : > { %v4689_v46 = vpack.c.bf16 %v4669_v15, %v4667_v30  ;;  %v4628_v55 = vmul.f32 0.01, %v4570_v29  ;;  %v4664_v32 = vmax.f32 %v4580_v59, %v4632_v61  ;;  %v4661_v37 = vmax.f32 %v4572_v35, %v4629_v12  ;;  %v9828_v59 = vpop.permute.xlu0 %4788 }
 0x69a   : > { %v4677_v22 = vmax.f32 %v4612_v23, %v4645_v3  ;;  %v4692_v20 = vpack.c.bf16 %v4676_v21, %v4674_v52  ;;  %v4690_v62 = vpack.c.bf16 %v4672_v44, %v4670_v0  ;;  %v4688_v23 = vpack.c.bf16 %v4668_v34, %v4666_v9  ;;  %v6955_v52 = vld [vmem:[#allocation8 + $0x8] sm:$0xff]  }
 0x69b   : > { %v4625_v38 = vmul.f32 0.01, %v4562_v13  ;;  %v4687_v1 = vpack.c.bf16 %v4665_v31, %v4663_v17  ;;  %v4626_v42 = vmul.f32 0.01, %v4566_v7  ;;  %v4662_v58 = vmax.f32 %v4576_v4, %v4630_v27 }
 0x69c   : > { %v4693_v50 = vpack.c.bf16 %v4677_v22, %v4675_v25  ;;  %v4623_v3 = vmul.f32 0.01, %v4558_v45  ;;  %v4659_v48 = vmax.f32 %v4568_v56, %v4627_v24  ;;  %v4624_v5 = vmul.f32 0.01, %v4560_v2 }
 0x69d   : > { %v4660_v8 = vmax.f32 %v4570_v29, %v4628_v55  ;;  %v4686_v33 = vpack.c.bf16 %v4664_v32, %v4662_v58  ;;  %v4657_v21 = vmax.f32 %v4562_v13, %v4625_v38  ;;  %v4622_v28 = vmul.f32 0.01, %v4556_v54  ;;  %v9832_v44 = vpop.permute.xlu0 %4778 }
 0x69e   : > { %4854 = vmatprep.subr.bf16.mxu0 %v4693_v50  ;;  %v4685_v36 = vpack.c.bf16 %v4661_v37, %v4659_v48  ;;  %v4658_v11 = vmax.f32 %v4566_v7, %v4626_v42  ;;  %v4655_v10 = vmax.f32 %v4558_v45, %v4623_v3  ;;  %v4656_v25 = vmax.f32 %v4560_v2, %v4624_v5  ;;  %v9826_v50 = vpop.permute.xlu1 %4803 }
 0x69f   : > { %4855 = vmatpush1.bf16.msra.mxu0 %v4692_v20  ;;  %v4654_v53 = vmax.f32 %v4556_v54, %v4622_v28 }
 0x6a0   : > { %4856 = vmatprep.subr.bf16.mxu0 %v4691_v60  ;;  %v4684_v22 = vpack.c.bf16 %v4660_v8, %v4658_v11  ;;  %v4683_v18 = vpack.c.bf16 %v4657_v21, %v4655_v10 }
 0x6a1   : > { %v4682_v43 = vpack.c.bf16 %v4656_v25, %v4654_v53  ;;  %v9836_v35 = vpop.permute.xlu0 %4768 }
 0x6a2   : > { %v9830_v51 = vpop.permute.xlu1 %4793 }
 0x6a3   : > { %4857 = vmatpush1.bf16.msra.mxu0 %v4690_v62 }
 0x6a4   : > { %4858 = vmatprep.subr.bf16.mxu0 %v4689_v46 }
 0x6a5   : > { %v9840_v15 = vpop.permute.xlu0 %4758 }
 0x6a6   : > { %v9834_v20 = vpop.permute.xlu1 %4783 }
 0x6a7   : > { %4859 = vmatpush1.bf16.msra.mxu0 %v4688_v23 }
 0x6a8   : > { %4860 = vmatprep.subr.bf16.mxu0 %v4687_v1 }
 0x6a9   : > { %v9844_v4 = vpop.permute.xlu0 %4748 }
 0x6aa   : > { %v9838_v26 = vpop.permute.xlu1 %4773 }
 0x6ab   : > { %4861 = vmatpush1.bf16.msra.mxu0 %v4686_v33 }
 0x6ac   : > { %4862 = vmatprep.subr.bf16.mxu0 %v4685_v36 }
 0x6ad   : > { %v4739_v0 = vpop.permute.xlu0 %4738 }
 0x6ae   : > { %v9842_v60 = vpop.permute.xlu1 %4763 }
 0x6af   : > { %4863 = vmatpush1.bf16.msra.mxu0 %v4684_v22 }
 0x6b0   : > { %4864 = vmatprep.subr.bf16.mxu0 %v4683_v18 }
 0x6b1   : > { %v4729_v39 = vpop.permute.xlu0 %4728 }
 0x6b2   : > { %v9846_v57 = vpop.permute.xlu1 %4753 }
 0x6b3   : > { %4865 = vmatpush1.bf16.msra.mxu0 %v4682_v43 }
 0x6b4   : > { %4866 = vmatprep.subr.bf16.mxu0 %v9771_v6  ;;  %v6961_v6 = vld [vmem:[#allocation8 + $0x38] sm:$0xff]  }
 0x6b6   : > { %v4744_v56 = vpop.permute.xlu1 %4743 }
 0x6b7   : > { %4867 = vmatpush1.bf16.msra.mxu0 %v9767_v14  ;;  %v6958_v14 = vld [vmem:[#allocation8 + $0x20] sm:$0xff]  }
 0x6b8   : > { %4868 = vmatprep.subr.bf16.mxu0 %v9761_v16  ;;  %v6960_v16 = vld [vmem:[#allocation8 + $0x30] sm:$0xff]  }
 0x6ba   : > { %v4734_v62 = vpop.permute.xlu1 %4733 }
 0x6bb   : > { %4869 = vmatpush1.bf16.msra.mxu0 %v9759_v40  ;;  %v6959_v40 = vld [vmem:[#allocation8 + $0x28] sm:$0xff]  }
 0x6be   : > { %4887 = vmatmul.mubr.bf16.vlgmr.msra.gmra.mxu0 %v6954_v47 }
 0x6bf   : > { %4896 = vmatprep.mubr.bf16.mxu0 %v10416_v63 }
 0x6c6   : > { %4897 = vmatmul.mubr.bf16.gmra.mxu0 %v6955_v52 }
 0x6c7   : > { %4906 = vmatprep.mubr.bf16.mxu0 %v10416_v63 }
 0x6ce   : > { %4907 = vmatmul.mubr.bf16.gmra.mxu0 %v6956_v49 }
 0x6cf   : > { %4916 = vmatprep.mubr.bf16.mxu0 %v10416_v63 }
 0x6d6   : > { %4917 = vmatmul.mubr.bf16.gmra.mxu0 %v6957_v41 }
 0x6d7   : > { %4926 = vmatprep.mubr.bf16.mxu0 %v10416_v63 }
 0x6de   : > { %4927 = vmatmul.mubr.bf16.gmra.mxu0 %v6958_v14 }
 0x6df   : > { %4936 = vmatprep.mubr.bf16.mxu0 %v10416_v63 }
 0x6e6   : > { %4937 = vmatmul.mubr.bf16.gmra.mxu0 %v6959_v40 }
 0x6e7   : > { %4946 = vmatprep.mubr.bf16.mxu0 %v10416_v63 }
 0x6ee   : > { %4947 = vmatmul.mubr.bf16.gmra.mxu0 %v6960_v16 }
 0x6ef   : > { %4956 = vmatprep.mubr.bf16.mxu0 %v10416_v63 }
 0x6f6   : > { %4957 = vmatmul.mubr.bf16.gmra.mxu0 %v6961_v6 }
 0x6f7   : > { %5518 = vmatprep.mubr.bf16.mxu0 %v10416_v63 }
 0x77e   : > { %v4888_v30 = vpop.f32.mrf.mxu0 }
 0x77f   : > { %v4889_v29 = vadd.f32 %v4888_v30, %v4729_v39 }
 0x780   : > { %v4890_v61 = vpop.f32.mrf.mxu0 }
 0x781   : > { %v4891_v34 = vadd.f32 %v4890_v61, %v4729_v39  ;;  %v4967_v12 = vmul.f32 0.01, %v4889_v29 }
 0x782   : > { %v4892_v13 = vpop.f32.mrf.mxu0 }
 0x783   : > { %v4893_v31 = vadd.f32 %v4892_v13, %v4734_v62  ;;  %v4968_v7 = vmul.f32 0.01, %v4891_v34  ;;  %v4999_v24 = vmax.f32 %v4889_v29, %v4967_v12 }
 0x784   : > { %v4894_v46 = vpop.f32.mrf.mxu0 }
 0x785   : > { %v4969_v27 = vmul.f32 0.01, %v4893_v31  ;;  %v4895_v9 = vadd.f32 %v4894_v46, %v4734_v62  ;;  %v5000_v23 = vmax.f32 %v4891_v34, %v4968_v7 }
 0x786   : > { %v4898_v45 = vpop.f32.mrf.mxu0 }
 0x787   : > { %v5001_v17 = vmax.f32 %v4893_v31, %v4969_v27  ;;  %v4970_v2 = vmul.f32 0.01, %v4895_v9  ;;  %v4899_v55 = vadd.f32 %v4898_v45, %v4739_v0 }
 0x788   : > { %v4900_v32 = vpop.f32.mrf.mxu0 }
 0x789   : > { %v9848_v38 = vpack.c.bf16 %v5001_v17, %v4999_v24  ;;  %v5002_v37 = vmax.f32 %v4895_v9, %v4970_v2  ;;  %v4901_v1 = vadd.f32 %v4900_v32, %v4739_v0  ;;  %v4971_v42 = vmul.f32 0.01, %v4899_v55 }
 0x78a   : > { %v4902_v54 = vpop.f32.mrf.mxu0 }
 0x78b   : > { %v4903_v58 = vadd.f32 %v4902_v54, %v4744_v56  ;;  %v9850_v3 = vpack.c.bf16 %v5002_v37, %v5000_v23  ;;  %v4972_v5 = vmul.f32 0.01, %v4901_v1  ;;  %v5003_v36 = vmax.f32 %v4899_v55, %v4971_v42 }
 0x78c   : > { %v4904_v48 = vpop.f32.mrf.mxu0 }
 0x78d   : > { %v4973_v8 = vmul.f32 0.01, %v4903_v58  ;;  %v4905_v33 = vadd.f32 %v4904_v48, %v4744_v56  ;;  %v5004_v25 = vmax.f32 %v4901_v1, %v4972_v5 }
 0x78e   : > { %v9852_v21 = vpop.f32.mrf.mxu0 }
 0x78f   : > { %v5005_v28 = vmax.f32 %v4903_v58, %v4973_v8  ;;  %v4974_v11 = vmul.f32 0.01, %v4905_v33 }
 0x790   : > { %v9854_v10 = vpop.f32.mrf.mxu0 }
 0x791   : > { %v9856_v22 = vpack.c.bf16 %v5005_v28, %v5003_v36  ;;  %v5006_v18 = vmax.f32 %v4905_v33, %v4974_v11 }
 0x792   : > { %v9858_v53 = vpop.f32.mrf.mxu0 }
 0x793   : > { %v9860_v43 = vpack.c.bf16 %v5006_v18, %v5004_v25 }
 0x794   : > { %v9862_v47 = vpop.f32.mrf.mxu0 }
 0x796   : > { %v9864_v52 = vpop.f32.mrf.mxu0 }
 0x798   : > { %v9866_v49 = vpop.f32.mrf.mxu0 }
 0x79a   : > { %v9868_v41 = vpop.f32.mrf.mxu0 }
 0x79c   : > { %v4924_v14 = vpop.f32.mrf.mxu0 }
 0x79e   : > { %v4928_v40 = vpop.f32.mrf.mxu0 }
 0x7a0   : > { %v4930_v16 = vpop.f32.mrf.mxu0 }
 0x7a2   : > { %v4932_v6 = vpop.f32.mrf.mxu0 }
 0x7a4   : > { %v4934_v0 = vpop.f32.mrf.mxu0 }
 0x7a5   : > { %v4935_v5 = vadd.f32 %v4934_v0, %v9838_v26 }
 0x7a6   : > { %v4938_v56 = vpop.f32.mrf.mxu0 }
 0x7a7   : > { %v4939_v18 = vadd.f32 %v4938_v56, %v9832_v44 }
 0x7a8   : > { %v4940_v39 = vpop.f32.mrf.mxu0 }
 0x7a9   : > { %v4987_v56 = vmul.f32 0.01, %v4939_v18 }
 0x7aa   : > { %v4942_v30 = vpop.f32.mrf.mxu0 }
 0x7ab   : > { %v4943_v8 = vadd.f32 %v4942_v30, %v9834_v20  ;;  %v4925_v30 = vadd.f32 %v4924_v14, %v9842_v60 }
 0x7ac   : > { %v4944_v29 = vpop.f32.mrf.mxu0 }
 0x7ad   : > { %v4945_v17 = vadd.f32 %v4944_v29, %v9834_v20  ;;  %v4989_v0 = vmul.f32 0.01, %v4943_v8 }
 0x7ae   : > { %v4948_v61 = vpop.f32.mrf.mxu0 }
 0x7af   : > { %v4949_v54 = vadd.f32 %v4948_v61, %v9828_v59  ;;  %v5021_v14 = vmax.f32 %v4943_v8, %v4989_v0 }
 0x7b0   : > { %v4950_v34 = vpop.f32.mrf.mxu0 }
 0x7b1   : > { %v4951_v45 = vadd.f32 %v4950_v34, %v9828_v59  ;;  %v4931_v59 = vadd.f32 %v4930_v16, %v9836_v35  ;;  %v4921_v16 = vadd.f32 %v9866_v49, %v9840_v15  ;;  %v5019_v49 = vmax.f32 %v4939_v18, %v4987_v56 }
 0x7b2   : > { %v4952_v62 = vpop.f32.mrf.mxu0 }
 0x7b3   : > { %v4953_v2 = vadd.f32 %v4952_v62, %v9830_v51  ;;  %v4992_v58 = vmul.f32 0.01, %v4951_v45  ;;  %v4933_v62 = vadd.f32 %v4932_v6, %v9838_v26  ;;  %v4923_v26 = vadd.f32 %v9868_v41, %v9842_v60 }
 0x7b4   : > { %v4954_v13 = vpop.f32.mrf.mxu0  ;;  %v4913_v41 = vadd.f32 %v9858_v53, %v9846_v57 }
 0x7b5   : > { %v4955_v46 = vadd.f32 %v4954_v13, %v9830_v51  ;;  %v4993_v33 = vmul.f32 0.01, %v4953_v2  ;;  %v4990_v51 = vmul.f32 0.01, %v4945_v17  ;;  %v4985_v6 = vmul.f32 0.01, %v4933_v62 }
 0x7b6   : > { %v4958_v12 = vpop.f32.mrf.mxu0 }
 0x7b7   : > { %v4959_v27 = vadd.f32 %v4958_v12, %v9824_v19  ;;  %v4994_v32 = vmul.f32 0.01, %v4955_v46  ;;  %v5025_v13 = vmax.f32 %v4953_v2, %v4993_v33  ;;  %v4986_v12 = vmul.f32 0.01, %v4935_v5 }
 0x7b8   : > { %v4960_v31 = vpop.f32.mrf.mxu0  ;;  %v4919_v2 = vadd.f32 %v9864_v52, %v9840_v15  ;;  %v4909_v15 = vadd.f32 %v9852_v21, %v9844_v4 }
 0x7b9   : > { %v4961_v7 = vadd.f32 %v4960_v31, %v9824_v19  ;;  %v4995_v42 = vmul.f32 0.01, %v4959_v27  ;;  %v4941_v19 = vadd.f32 %v4940_v39, %v9832_v44  ;;  %v5026_v28 = vmax.f32 %v4955_v46, %v4994_v32 }
 0x7ba   : > { %v4962_v9 = vpop.f32.mrf.mxu0  ;;  %v5024_v39 = vmax.f32 %v4951_v45, %v4992_v58  ;;  %v5022_v31 = vmax.f32 %v4945_v17, %v4990_v51  ;;  %v4929_v44 = vadd.f32 %v4928_v40, %v9836_v35  ;;  %v4982_v17 = vmul.f32 0.01, %v4925_v30 }
 0x7bb   : > { %v4963_v24 = vadd.f32 %v4962_v9, %v9826_v50  ;;  %v4996_v23 = vmul.f32 0.01, %v4961_v7  ;;  %v5027_v29 = vmax.f32 %v4959_v27, %v4995_v42  ;;  %v4988_v61 = vmul.f32 0.01, %v4941_v19 }
 0x7bc   : > { %v4964_v55 = vpop.f32.mrf.mxu0  ;;  %v5044_v46 = vpack.c.bf16 %v5026_v28, %v5024_v39  ;;  %v4984_v27 = vmul.f32 0.01, %v4931_v59  ;;  %v5018_v35 = vmax.f32 %v4935_v5, %v4986_v12  ;;  %v4911_v32 = vadd.f32 %v9854_v10, %v9844_v4 }
 0x7bd   : > { %v4997_v37 = vmul.f32 0.01, %v4963_v24  ;;  %v4965_v1 = vadd.f32 %v4964_v55, %v9826_v50  ;;  %v5028_v11 = vmax.f32 %v4961_v7, %v4996_v23  ;;  %v4991_v50 = vmul.f32 0.01, %v4949_v54 }
 0x7be   : > { %v5020_v9 = vmax.f32 %v4941_v19, %v4988_v61  ;;  %v4983_v55 = vmul.f32 0.01, %v4929_v44  ;;  %v4980_v23 = vmul.f32 0.01, %v4921_v16  ;;  %v5016_v60 = vmax.f32 %v4931_v59, %v4984_v27 }
 0x7bf   : > { %v4998_v48 = vmul.f32 0.01, %v4965_v1  ;;  %v5029_v36 = vmax.f32 %v4963_v24, %v4997_v37  ;;  %v5023_v7 = vmax.f32 %v4949_v54, %v4991_v50  ;;  %v4915_v24 = vadd.f32 %v9862_v47, %v9846_v57  ;;  %v6962_v50 = vld [vmem:[%s10005_s6] sm:$0xff]  }
 0x7c0   : > { %v5042_v40 = vpack.c.bf16 %v5022_v31, %v5020_v9  ;;  %v4981_v37 = vmul.f32 0.01, %v4923_v26  ;;  %v5017_v47 = vmax.f32 %v4933_v62, %v4985_v6  ;;  %v5014_v42 = vmax.f32 %v4925_v30, %v4982_v17  ;;  %v5096_v30 = vpop.permute.xlu0 %5095 }
 0x7c1   : > { %v5030_v25 = vmax.f32 %v4965_v1, %v4998_v48  ;;  %v5045_v20 = vpack.c.bf16 %v5029_v36, %v5027_v29  ;;  %v5043_v45 = vpack.c.bf16 %v5025_v13, %v5023_v7  ;;  %v5041_v1 = vpack.c.bf16 %v5021_v14, %v5019_v49  ;;  %v6963_v29 = vld [vmem:[%s10005_s6 + $0x8] sm:$0xff]   ;;  %v5101_v13 = vpop.permute.xlu1 %5100 }
 0x7c2   : > { %v4978_v54 = vmul.f32 0.01, %v4915_v24  ;;  %v5040_v19 = vpack.c.bf16 %v5018_v35, %v5016_v60  ;;  %v4979_v52 = vmul.f32 0.01, %v4919_v2  ;;  %v5015_v58 = vmax.f32 %v4929_v44, %v4983_v55 }
 0x7c3   : > { %v5046_v34 = vpack.c.bf16 %v5030_v25, %v5028_v11  ;;  %v4976_v48 = vmul.f32 0.01, %v4911_v32  ;;  %v5012_v10 = vmax.f32 %v4921_v16, %v4980_v23  ;;  %v4977_v5 = vmul.f32 0.01, %v4913_v41 }
 0x7c4   : > { %v5013_v8 = vmax.f32 %v4923_v26, %v4981_v37  ;;  %v5039_v33 = vpack.c.bf16 %v5017_v47, %v5015_v58  ;;  %v5010_v36 = vmax.f32 %v4915_v24, %v4978_v54  ;;  %v4975_v53 = vmul.f32 0.01, %v4909_v15  ;;  %v5086_v56 = vpop.permute.xlu0 %5085 }
 0x7c5   : > { %5127 = vmatprep.subr.bf16.mxu1 %v5046_v34  ;;  %v5038_v57 = vpack.c.bf16 %v5014_v42, %v5012_v10  ;;  %v5011_v51 = vmax.f32 %v4919_v2, %v4979_v52  ;;  %v5008_v28 = vmax.f32 %v4911_v32, %v4976_v48  ;;  %v5009_v11 = vmax.f32 %v4913_v41, %v4977_v5 }
 0x7c6   : > { %5128 = vmatpush1.bf16.msra.mxu1 %v5045_v20  ;;  %v5007_v4 = vmax.f32 %v4909_v15, %v4975_v53 }
 0x7c7   : > { %5129 = vmatprep.subr.bf16.mxu1 %v5044_v46  ;;  %v5037_v25 = vpack.c.bf16 %v5013_v8, %v5011_v51  ;;  %v5036_v18 = vpack.c.bf16 %v5010_v36, %v5008_v28  ;;  %v5091_v46 = vpop.permute.xlu1 %5090 }
 0x7c8   : > { %v5035_v21 = vpack.c.bf16 %v5009_v11, %v5007_v4  ;;  %v5076_v17 = vpop.permute.xlu0 %5075 }
 0x7ca   : > { %5130 = vmatpush1.bf16.msra.mxu1 %v5043_v45 }
 0x7cb   : > { %5131 = vmatprep.subr.bf16.mxu1 %v5042_v40  ;;  %v5081_v27 = vpop.permute.xlu1 %5080 }
 0x7cc   : > { %v5066_v8 = vpop.permute.xlu0 %5065 }
 0x7ce   : > { %5132 = vmatpush1.bf16.msra.mxu1 %v5041_v1 }
 0x7cf   : > { %5133 = vmatprep.subr.bf16.mxu1 %v5040_v19  ;;  %v5071_v37 = vpop.permute.xlu1 %5070 }
 0x7d2   : > { %5134 = vmatpush1.bf16.msra.mxu1 %v5039_v33 }
 0x7d3   : > { %5135 = vmatprep.subr.bf16.mxu1 %v5038_v57 }
 0x7d6   : > { %5136 = vmatpush1.bf16.msra.mxu1 %v5037_v25 }
 0x7d7   : > { %5137 = vmatprep.subr.bf16.mxu1 %v5036_v18 }
 0x7da   : > { %5138 = vmatpush1.bf16.msra.mxu1 %v5035_v21 }
 0x7db   : > { %5139 = vmatprep.subr.bf16.mxu1 %v9860_v43 }
 0x7de   : > { %5140 = vmatpush1.bf16.msra.mxu1 %v9856_v22 }
 0x7df   : > { %5141 = vmatprep.subr.bf16.mxu1 %v9850_v3  ;;  %v6964_v3 = vld [vmem:[%s10005_s6 + $0x10] sm:$0xff]  }
 0x7e2   : > { %5142 = vmatpush1.bf16.msra.mxu1 %v9848_v38  ;;  %v6965_v38 = vld [vmem:[%s10005_s6 + $0x18] sm:$0xff]  }
 0x7e5   : > { %5160 = vmatmul.mubr.bf16.vlgmr.msra.gmra.mxu1 %v6962_v50 }
 0x7e6   : > { %5169 = vmatprep.mubr.bf16.mxu1 %v10416_v63 }
 0x7ed   : > { %5170 = vmatmul.mubr.bf16.gmra.mxu1 %v6963_v29 }
 0x7ee   : > { %5179 = vmatprep.mubr.bf16.mxu1 %v10416_v63 }
 0x7f5   : > { %5180 = vmatmul.mubr.bf16.gmra.mxu1 %v6964_v3 }
 0x7f6   : > { %5189 = vmatprep.mubr.bf16.mxu1 %v10416_v63 }
 0x7fd   : > { %5190 = vmatmul.mubr.bf16.gmra.mxu1 %v6965_v38 }
 0x7fe   : > { %5361 = vmatprep.mubr.bf16.mxu1 %v10416_v63 }
 0x8a5   : > { %v9921_v22 = vpop.f32.mrf.mxu1 }
 0x8a6   : > { %v5162_v38 = vadd.f32 %v9921_v22, %v5066_v8 }
 0x8a7   : > { %v5163_v43 = vpop.f32.mrf.mxu1 }
 0x8a8   : > { %v5164_v53 = vadd.f32 %v5163_v43, %v5066_v8 }
 0x8a9   : > { %v5165_v59 = vpop.f32.mrf.mxu1 }
 0x8aa   : > { %v5166_v25 = vadd.f32 %v5165_v59, %v5071_v37 }
 0x8ab   : > { %v5167_v61 = vpop.f32.mrf.mxu1 }
 0x8ac   : > { %v5168_v42 = vadd.f32 %v5167_v61, %v5071_v37  ;;  %v5202_v43 = vmul.f32 0.01, %v5166_v25 }
 0x8ad   : > { %v5171_v39 = vpop.f32.mrf.mxu1 }
 0x8ae   : > { %v5172_v33 = vadd.f32 %v5171_v39, %v5076_v17  ;;  %v5203_v50 = vmul.f32 0.01, %v5168_v42  ;;  %v5201_v39 = vmul.f32 0.01, %v5164_v53 }
 0x8af   : > { %v5173_v34 = vpop.f32.mrf.mxu1 }
 0x8b0   : > { %v5174_v47 = vadd.f32 %v5173_v34, %v5076_v17  ;;  %v5204_v61 = vmul.f32 0.01, %v5172_v33 }
 0x8b1   : > { %v5175_v62 = vpop.f32.mrf.mxu1 }
 0x8b2   : > { %v5176_v19 = vadd.f32 %v5175_v62, %v5081_v27  ;;  %v5205_v51 = vmul.f32 0.01, %v5174_v47 }
 0x8b3   : > { %v5177_v0 = vpop.f32.mrf.mxu1 }
 0x8b4   : > { %v5178_v35 = vadd.f32 %v5177_v0, %v5081_v27  ;;  %v5206_v18 = vmul.f32 0.01, %v5176_v19  ;;  %v5221_v62 = vmax.f32 %v5174_v47, %v5205_v51  ;;  %v6967_v27 = vld [vmem:[#allocation10 + $0x8] sm:$0xff]  }
 0x8b5   : > { %v5181_v20 = vpop.f32.mrf.mxu1 }
 0x8b6   : > { %v5182_v60 = vadd.f32 %v5181_v20, %v5086_v56  ;;  %v5207_v58 = vmul.f32 0.01, %v5178_v35  ;;  %v5222_v0 = vmax.f32 %v5176_v19, %v5206_v18  ;;  %v5219_v20 = vmax.f32 %v5168_v42, %v5203_v50 }
 0x8b7   : > { %v5183_v12 = vpop.f32.mrf.mxu1 }
 0x8b8   : > { %v5184_v45 = vadd.f32 %v5183_v12, %v5086_v56  ;;  %v5208_v36 = vmul.f32 0.01, %v5182_v60  ;;  %v5223_v29 = vmax.f32 %v5178_v35, %v5207_v58  ;;  %v5220_v12 = vmax.f32 %v5172_v33, %v5204_v61 }
 0x8b9   : > { %v5185_v31 = vpop.f32.mrf.mxu1 }
 0x8ba   : > { %v5186_v40 = vadd.f32 %v5185_v31, %v5091_v46  ;;  %v5209_v1 = vmul.f32 0.01, %v5184_v45  ;;  %v5224_v34 = vmax.f32 %v5182_v60, %v5208_v36  ;;  %v5235_v59 = vpack.c.bf16 %v5223_v29, %v5221_v62 }
 0x8bb   : > { %v5187_v44 = vpop.f32.mrf.mxu1  ;;  %v5217_v31 = vmax.f32 %v5164_v53, %v5201_v39 }
 0x8bc   : > { %v5188_v9 = vadd.f32 %v5187_v44, %v5091_v46  ;;  %v5210_v15 = vmul.f32 0.01, %v5186_v40  ;;  %v5225_v28 = vmax.f32 %v5184_v45, %v5209_v1  ;;  %v5218_v46 = vmax.f32 %v5166_v25, %v5202_v43 }
 0x8bd   : > { %v5191_v7 = vpop.f32.mrf.mxu1  ;;  %v5234_v44 = vpack.c.bf16 %v5222_v0, %v5220_v12  ;;  %v5233_v56 = vpack.c.bf16 %v5219_v20, %v5217_v31 }
 0x8be   : > { %v5192_v6 = vadd.f32 %v5191_v7, %v5096_v30  ;;  %v5211_v55 = vmul.f32 0.01, %v5188_v9  ;;  %v5226_v4 = vmax.f32 %v5186_v40, %v5210_v15 }
 0x8bf   : > { %v5193_v16 = vpop.f32.mrf.mxu1 }
 0x8c0   : > { %v5194_v26 = vadd.f32 %v5193_v16, %v5096_v30  ;;  %v5212_v41 = vmul.f32 0.01, %v5192_v6  ;;  %v5227_v48 = vmax.f32 %v5188_v9, %v5211_v55  ;;  %v5200_v30 = vmul.f32 0.01, %v5162_v38  ;;  %v6966_v16 = vld [vmem:[#allocation10] sm:$0xff]   ;;  %v6968_v9 = vld [vmem:[#allocation10 + $0x10] sm:$0xff]   ;;  %v5294_v55 = vpop.permute.xlu1 %5293 }
 0x8c1   : > { %v5195_v14 = vpop.f32.mrf.mxu1 }
 0x8c2   : > { %v5196_v24 = vadd.f32 %v5195_v14, %v5101_v13  ;;  %v5213_v49 = vmul.f32 0.01, %v5194_v26  ;;  %v5228_v57 = vmax.f32 %v5192_v6, %v5212_v41  ;;  %v5237_v3 = vpack.c.bf16 %v5227_v48, %v5225_v28 }
 0x8c3   : > { %v5197_v2 = vpop.f32.mrf.mxu1  ;;  %v5216_v22 = vmax.f32 %v5162_v38, %v5200_v30 }
 0x8c4   : > { %v5214_v32 = vmul.f32 0.01, %v5196_v24  ;;  %v5198_v23 = vadd.f32 %v5197_v2, %v5101_v13  ;;  %v5229_v10 = vmax.f32 %v5194_v26, %v5213_v49  ;;  %v5236_v13 = vpack.c.bf16 %v5226_v4, %v5224_v34  ;;  %v6969_v26 = vld [vmem:[#allocation10 + $0x18] sm:$0xff]   ;;  %v5284_v41 = vpop.permute.xlu1 %5283 }
 0x8c5   : > { %v5232_v7 = vpack.c.bf16 %v5218_v46, %v5216_v22 }
 0x8c6   : > { %v5215_v54 = vmul.f32 0.01, %v5198_v23  ;;  %v5230_v52 = vmax.f32 %v5196_v24, %v5214_v32  ;;  %v5289_v32 = vpop.permute.xlu0 %5288 }
 0x8c8   : > { %v5231_v5 = vmax.f32 %v5198_v23, %v5215_v54  ;;  %v5238_v21 = vpack.c.bf16 %v5230_v52, %v5228_v57  ;;  %v5274_v42 = vpop.permute.xlu1 %5273 }
 0x8ca   : > { %v5239_v11 = vpack.c.bf16 %v5231_v5, %v5229_v10  ;;  %v5279_v47 = vpop.permute.xlu0 %5278 }
 0x8cc   : > { %5337 = vmatprep.subr.bf16.mxu1 %v5239_v11  ;;  %v5264_v18 = vpop.permute.xlu1 %5263 }
 0x8cd   : > { %5338 = vmatpush1.bf16.msra.mxu1 %v5238_v21 }
 0x8ce   : > { %5339 = vmatprep.subr.bf16.mxu1 %v5237_v3  ;;  %v5269_v5 = vpop.permute.xlu0 %5268 }
 0x8d1   : > { %5340 = vmatpush1.bf16.msra.mxu1 %v5236_v13 }
 0x8d2   : > { %5341 = vmatprep.subr.bf16.mxu1 %v5235_v59  ;;  %v5259_v0 = vpop.permute.xlu0 %5258 }
 0x8d5   : > { %5342 = vmatpush1.bf16.msra.mxu1 %v5234_v44 }
 0x8d6   : > { %5343 = vmatprep.subr.bf16.mxu1 %v5233_v56 }
 0x8d9   : > { %5344 = vmatpush1.bf16.msra.mxu1 %v5232_v7 }
 0x8dc   : > { %6436 = vmatmul.mubr.msk.bf16.vlgmr.msra.gmra.mxu1 %vm5316_vm0, %v6966_v16 }
 0x8dd   : > { %5371 = vmatprep.mubr.bf16.mxu1 %v10416_v63 }
 0x8e4   : > { %6437 = vmatmul.mubr.msk.bf16.gmra.mxu1 %vm5316_vm0, %v6967_v27 }
 0x8e5   : > { %5381 = vmatprep.mubr.bf16.mxu1 %v10416_v63 }
 0x8ec   : > { %6438 = vmatmul.mubr.msk.bf16.gmra.mxu1 %vm5316_vm0, %v6968_v9 }
 0x8ed   : > { %5391 = vmatprep.mubr.bf16.mxu1 %v10416_v63 }
 0x8f4   : > { %6439 = vmatmul.mubr.msk.bf16.gmra.mxu1 %vm5316_vm0, %v6969_v26 }
 0x8f5   : > { %5636 = vmatprep.mubr.bf16.mxu1 %v10416_v63 }
 0x99c   : > { %v9932_v6 = vpop.f32.mrf.mxu1 }
 0x99d   : > { %v5364_v26 = vadd.f32 %v9932_v6, %v5259_v0 }
 0x99e   : > { %v5365_v14 = vpop.f32.mrf.mxu1 }
 0x99f   : > { %v5366_v30 = vadd.f32 %v5365_v14, %v5259_v0 }
 0x9a0   : > { %v5367_v45 = vpop.f32.mrf.mxu1 }
 0x9a1   : > { %v5368_v44 = vadd.f32 %v5367_v45, %v5264_v18 }
 0x9a2   : > { %v5369_v24 = vpop.f32.mrf.mxu1 }
 0x9a3   : > { %v5370_v29 = vadd.f32 %v5369_v24, %v5264_v18  ;;  %v5404_v14 = vmul.f32 0.01, %v5368_v44 }
 0x9a4   : > { %v5373_v17 = vpop.f32.mrf.mxu1 }
 0x9a5   : > { %v5374_v13 = vadd.f32 %v5373_v17, %v5269_v5  ;;  %v5405_v16 = vmul.f32 0.01, %v5370_v29  ;;  %v5403_v17 = vmul.f32 0.01, %v5366_v30 }
 0x9a6   : > { %v5375_v35 = vpop.f32.mrf.mxu1 }
 0x9a7   : > { %v5376_v4 = vadd.f32 %v5375_v35, %v5269_v5  ;;  %v5406_v24 = vmul.f32 0.01, %v5374_v13 }
 0x9a8   : > { %v5377_v40 = vpop.f32.mrf.mxu1 }
 0x9a9   : > { %v5378_v3 = vadd.f32 %v5377_v40, %v5274_v42  ;;  %v5407_v12 = vmul.f32 0.01, %v5376_v4 }
 0x9aa   : > { %v5379_v2 = vpop.f32.mrf.mxu1 }
 0x9ab   : > { %v5380_v8 = vadd.f32 %v5379_v2, %v5274_v42  ;;  %v5408_v56 = vmul.f32 0.01, %v5378_v3  ;;  %v5423_v40 = vmax.f32 %v5376_v4, %v5407_v12  ;;  %v6971_v42 = vld [vmem:[%s10007_s8 + $0x8] sm:$0xff]  }
 0x9ac   : > { %v5383_v49 = vpop.f32.mrf.mxu1 }
 0x9ad   : > { %v5384_v11 = vadd.f32 %v5383_v49, %v5279_v47  ;;  %v5409_v34 = vmul.f32 0.01, %v5380_v8  ;;  %v5424_v2 = vmax.f32 %v5378_v3, %v5408_v56  ;;  %v5421_v49 = vmax.f32 %v5370_v29, %v5405_v16  ;;  %v6972_v16 = vld [vmem:[%s10008_s9] sm:$0xff]  }
 0x9ae   : > { %v5385_v23 = vpop.f32.mrf.mxu1 }
 0x9af   : > { %v5386_v48 = vadd.f32 %v5385_v23, %v5279_v47  ;;  %v5410_v20 = vmul.f32 0.01, %v5384_v11  ;;  %v5425_v27 = vmax.f32 %v5380_v8, %v5409_v34  ;;  %v5422_v23 = vmax.f32 %v5374_v13, %v5406_v24 }
 0x9b0   : > { %v5387_v60 = vpop.f32.mrf.mxu1 }
 0x9b1   : > { %v5388_v33 = vadd.f32 %v5387_v60, %v5284_v41  ;;  %v5411_v21 = vmul.f32 0.01, %v5386_v48  ;;  %v5426_v35 = vmax.f32 %v5384_v11, %v5410_v20  ;;  %v5437_v45 = vpack.c.bf16 %v5425_v27, %v5423_v40  ;;  %v6973_v27 = vld [vmem:[%s10008_s9 + $0x8] sm:$0xff]  }
 0x9b2   : > { %v5389_v37 = vpop.f32.mrf.mxu1  ;;  %v5419_v60 = vmax.f32 %v5366_v30, %v5403_v17 }
 0x9b3   : > { %v5390_v19 = vadd.f32 %v5389_v37, %v5284_v41  ;;  %v5412_v38 = vmul.f32 0.01, %v5388_v33  ;;  %v5427_v31 = vmax.f32 %v5386_v48, %v5411_v21  ;;  %v5420_v41 = vmax.f32 %v5368_v44, %v5404_v14  ;;  %v5463_v48 = vpop.permute.xlu0 %5462 }
 0x9b4   : > { %v5393_v1 = vpop.f32.mrf.mxu1  ;;  %v5436_v37 = vpack.c.bf16 %v5424_v2, %v5422_v23  ;;  %v5435_v47 = vpack.c.bf16 %v5421_v49, %v5419_v60 }
 0x9b5   : > { %v5394_v52 = vadd.f32 %v5393_v1, %v5289_v32  ;;  %v5413_v57 = vmul.f32 0.01, %v5390_v19  ;;  %v5428_v22 = vmax.f32 %v5388_v33, %v5412_v38 }
 0x9b6   : > { %v5395_v54 = vpop.f32.mrf.mxu1 }
 0x9b7   : > { %v5396_v15 = vadd.f32 %v5395_v54, %v5289_v32  ;;  %v5414_v25 = vmul.f32 0.01, %v5394_v52  ;;  %v5429_v39 = vmax.f32 %v5390_v19, %v5413_v57  ;;  %v5402_v32 = vmul.f32 0.01, %v5364_v26  ;;  %v6970_v54 = vld [vmem:[%s10007_s8] sm:$0xff]  }
 0x9b8   : > { %v5397_v58 = vpop.f32.mrf.mxu1 }
 0x9b9   : > { %v5398_v10 = vadd.f32 %v5397_v58, %v5294_v55  ;;  %v5415_v53 = vmul.f32 0.01, %v5396_v15  ;;  %v5430_v59 = vmax.f32 %v5394_v52, %v5414_v25  ;;  %v5439_v9 = vpack.c.bf16 %v5429_v39, %v5427_v31  ;;  %v5468_v52 = vpop.permute.xlu1 %5467 }
 0x9ba   : > { %v5399_v36 = vpop.f32.mrf.mxu1  ;;  %v5418_v6 = vmax.f32 %v5364_v26, %v5402_v32 }
 0x9bb   : > { %v5416_v51 = vmul.f32 0.01, %v5398_v10  ;;  %v5400_v28 = vadd.f32 %v5399_v36, %v5294_v55  ;;  %v5431_v62 = vmax.f32 %v5396_v15, %v5415_v53  ;;  %v5438_v55 = vpack.c.bf16 %v5428_v22, %v5426_v35  ;;  %v5453_v53 = vpop.permute.xlu0 %5452 }
 0x9bc   : > { %v5434_v1 = vpack.c.bf16 %v5420_v41, %v5418_v6 }
 0x9bd   : > { %v5417_v50 = vmul.f32 0.01, %v5400_v28  ;;  %v5432_v61 = vmax.f32 %v5398_v10, %v5416_v51  ;;  %v5458_v8 = vpop.permute.xlu1 %5457 }
 0x9bf   : > { %v5433_v43 = vmax.f32 %v5400_v28, %v5417_v50  ;;  %v5440_v7 = vpack.c.bf16 %v5432_v61, %v5430_v59  ;;  %v5580_v17 = vpop.permute.xlu0 %5579 }
 0x9c1   : > { %v5441_v46 = vpack.c.bf16 %v5433_v43, %v5431_v62  ;;  %v5585_v24 = vpop.permute.xlu1 %5584 }
 0x9c3   : > { %5494 = vmatprep.subr.bf16.mxu0 %v5441_v46  ;;  %v5570_v32 = vpop.permute.xlu0 %5569 }
 0x9c4   : > { %5495 = vmatpush1.bf16.msra.mxu0 %v5440_v7 }
 0x9c5   : > { %5496 = vmatprep.subr.bf16.mxu0 %v5439_v9  ;;  %v5575_v2 = vpop.permute.xlu1 %5574 }
 0x9c8   : > { %5497 = vmatpush1.bf16.msra.mxu0 %v5438_v55 }
 0x9c9   : > { %5498 = vmatprep.subr.bf16.mxu0 %v5437_v45 }
 0x9cc   : > { %5499 = vmatpush1.bf16.msra.mxu0 %v5436_v37 }
 0x9cd   : > { %5500 = vmatprep.subr.bf16.mxu0 %v5435_v47 }
 0x9d0   : > { %5501 = vmatpush1.bf16.msra.mxu0 %v5434_v1 }
 0x9d3   : > { %6442 = vmatmul.mubr.msk.bf16.vlgmr.msra.gmra.mxu0 %vm5316_vm0, %v6970_v54 }
 0x9d4   : > { %5528 = vmatprep.mubr.bf16.mxu0 %v10416_v63 }
 0x9db   : > { %6443 = vmatmul.mubr.msk.bf16.gmra.mxu0 %vm5316_vm0, %v6971_v42 }
 0x9dc   : > { %5731 = vmatprep.mubr.bf16.mxu0 %v10416_v63 }
 0xa93   : > { %v5520_v19 = vpop.f32.mrf.mxu0 }
 0xa94   : > { %v5521_v38 = vadd.f32 %v5520_v19, %v5453_v53 }
 0xa95   : > { %v5522_v15 = vpop.f32.mrf.mxu0 }
 0xa96   : > { %v5523_v11 = vadd.f32 %v5522_v15, %v5453_v53  ;;  %v5539_v59 = vmul.f32 0.01, %v5521_v38 }
 0xa97   : > { %v5524_v58 = vpop.f32.mrf.mxu0 }
 0xa98   : > { %v5525_v18 = vadd.f32 %v5524_v58, %v5458_v8  ;;  %v5540_v34 = vmul.f32 0.01, %v5523_v11  ;;  %v5547_v22 = vmax.f32 %v5521_v38, %v5539_v59 }
 0xa99   : > { %v5526_v10 = vpop.f32.mrf.mxu0 }
 0xa9a   : > { %v5527_v36 = vadd.f32 %v5526_v10, %v5458_v8  ;;  %v5541_v62 = vmul.f32 0.01, %v5525_v18  ;;  %v5548_v12 = vmax.f32 %v5523_v11, %v5540_v34  ;;  %v5689_v34 = vpop.permute.xlu1 %5688 }
 0xa9b   : > { %v5530_v5 = vpop.f32.mrf.mxu0 }
 0xa9c   : > { %v5531_v51 = vadd.f32 %v5530_v5, %v5463_v48  ;;  %v5542_v21 = vmul.f32 0.01, %v5527_v36  ;;  %v5549_v46 = vmax.f32 %v5525_v18, %v5541_v62 }
 0xa9d   : > { %v5532_v33 = vpop.f32.mrf.mxu0 }
 0xa9e   : > { %v5533_v57 = vadd.f32 %v5532_v33, %v5463_v48  ;;  %v5543_v61 = vmul.f32 0.01, %v5531_v51  ;;  %v5550_v0 = vmax.f32 %v5527_v36, %v5542_v21  ;;  %v5555_v7 = vpack.c.bf16 %v5549_v46, %v5547_v22 }
 0xa9f   : > { %v5534_v28 = vpop.f32.mrf.mxu0 }
 0xaa0   : > { %v5535_v25 = vadd.f32 %v5534_v28, %v5468_v52  ;;  %v5544_v50 = vmul.f32 0.01, %v5533_v57  ;;  %v5551_v30 = vmax.f32 %v5531_v51, %v5543_v61  ;;  %v5556_v56 = vpack.c.bf16 %v5550_v0, %v5548_v12 }
 0xaa1   : > { %v5536_v4 = vpop.f32.mrf.mxu0 }
 0xaa2   : > { %v5545_v29 = vmul.f32 0.01, %v5535_v25  ;;  %v5537_v3 = vadd.f32 %v5536_v4, %v5468_v52  ;;  %v5552_v13 = vmax.f32 %v5533_v57, %v5544_v50  ;;  %v6974_v50 = vld [vmem:[#allocation11] sm:$0xff]  }
 0xaa4   : > { %v5546_v39 = vmul.f32 0.01, %v5537_v3  ;;  %v5553_v43 = vmax.f32 %v5535_v25, %v5545_v29 }
 0xaa6   : > { %v5554_v20 = vmax.f32 %v5537_v3, %v5546_v39  ;;  %v5557_v44 = vpack.c.bf16 %v5553_v43, %v5551_v30  ;;  %v5684_v3 = vpop.permute.xlu0 %5683 }
 0xaa8   : > { %v5558_v31 = vpack.c.bf16 %v5554_v20, %v5552_v13 }
 0xaaa   : > { %5616 = vmatprep.subr.bf16.mxu1 %v5558_v31 }
 0xaab   : > { %5617 = vmatpush1.bf16.msra.mxu1 %v5557_v44 }
 0xaac   : > { %5618 = vmatprep.subr.bf16.mxu1 %v5556_v56 }
 0xaaf   : > { %5619 = vmatpush1.bf16.msra.mxu1 %v5555_v7 }
 0xab2   : > { %6446 = vmatmul.mubr.msk.bf16.vlgmr.msra.gmra.mxu1 %vm5597_vm1, %v6972_v16  ;;  %v5752_v16 = vld [vmem:[%s10010_s11] sm:$0xf] }
 0xab3   : > { %5646 = vmatprep.mubr.bf16.mxu1 %v10416_v63 }
 0xaba   : > { %6447 = vmatmul.mubr.msk.bf16.gmra.mxu1 %vm5597_vm1, %v6973_v27  ;;  %v5757_v27 = vpop.permute.xlu0 %5756 }
 0xabb   : > { %5795 = vmatprep.mubr.bf16.mxu1 %v10416_v63 }
 0xb72   : > { %v5638_v9 = vpop.f32.mrf.mxu1 }
 0xb73   : > { %v5639_v15 = vadd.f32 %v5638_v9, %v5570_v32 }
 0xb74   : > { %v5640_v26 = vpop.f32.mrf.mxu1 }
 0xb75   : > { %v5641_v41 = vadd.f32 %v5640_v26, %v5570_v32  ;;  %v5657_v57 = vmul.f32 0.01, %v5639_v15 }
 0xb76   : > { %v5642_v35 = vpop.f32.mrf.mxu1 }
 0xb77   : > { %v5643_v47 = vadd.f32 %v5642_v35, %v5575_v2  ;;  %v5658_v58 = vmul.f32 0.01, %v5641_v41  ;;  %v5665_v4 = vmax.f32 %v5639_v15, %v5657_v57 }
 0xb78   : > { %v5644_v40 = vpop.f32.mrf.mxu1 }
 0xb79   : > { %v5645_v49 = vadd.f32 %v5644_v40, %v5575_v2  ;;  %v5659_v10 = vmul.f32 0.01, %v5643_v47  ;;  %v5666_v51 = vmax.f32 %v5641_v41, %v5658_v58  ;;  %v5815_v41 = vpop.permute.xlu1 %5814 }
 0xb7a   : > { %v5648_v14 = vpop.f32.mrf.mxu1 }
 0xb7b   : > { %v5649_v23 = vadd.f32 %v5648_v14, %v5580_v17  ;;  %v5660_v1 = vmul.f32 0.01, %v5645_v49  ;;  %v5667_v11 = vmax.f32 %v5643_v47, %v5659_v10 }
 0xb7c   : > { %v5650_v55 = vpop.f32.mrf.mxu1 }
 0xb7d   : > { %v5651_v45 = vadd.f32 %v5650_v55, %v5580_v17  ;;  %v5661_v52 = vmul.f32 0.01, %v5649_v23  ;;  %v5668_v8 = vmax.f32 %v5645_v49, %v5660_v1  ;;  %v5673_v21 = vpack.c.bf16 %v5667_v11, %v5665_v4 }
 0xb7e   : > { %v5652_v60 = vpop.f32.mrf.mxu1 }
 0xb7f   : > { %v5653_v37 = vadd.f32 %v5652_v60, %v5585_v24  ;;  %v5662_v54 = vmul.f32 0.01, %v5651_v45  ;;  %v5669_v53 = vmax.f32 %v5649_v23, %v5661_v52  ;;  %v5674_v18 = vpack.c.bf16 %v5668_v8, %v5666_v51  ;;  %v5810_v60 = vld [vmem:[#allocation13] sm:$0x3]  ;;  %v5880_v8 = vpop.permute.xlu0 %5879 }
 0xb80   : > { %v5654_v6 = vpop.f32.mrf.mxu1 }
 0xb81   : > { %v5663_v42 = vmul.f32 0.01, %v5653_v37  ;;  %v5655_v19 = vadd.f32 %v5654_v6, %v5585_v24  ;;  %v5670_v33 = vmax.f32 %v5651_v45, %v5662_v54 }
 0xb83   : > { %v5664_v48 = vmul.f32 0.01, %v5655_v19  ;;  %v5671_v5 = vmax.f32 %v5653_v37, %v5663_v42 }
 0xb85   : > { %v5672_v36 = vmax.f32 %v5655_v19, %v5664_v48  ;;  %v5675_v25 = vpack.c.bf16 %v5671_v5, %v5669_v53 }
 0xb87   : > { %v5676_v28 = vpack.c.bf16 %v5672_v36, %v5670_v33 }
 0xb89   : > { %5711 = vmatprep.subr.bf16.mxu0 %v5676_v28 }
 0xb8a   : > { %5712 = vmatpush1.bf16.msra.mxu0 %v5675_v25 }
 0xb8b   : > { %5713 = vmatprep.subr.bf16.mxu0 %v5674_v18 }
 0xb8e   : > { %5714 = vmatpush1.bf16.msra.mxu0 %v5673_v21 }
 0xb91   : > { %6449 = vmatmul.mubr.msk.bf16.vlgmr.msra.gmra.mxu0 %vm5597_vm1, %v6974_v50 }
 0xb92   : > { %5860 = vmatprep.mubr.bf16.mxu0 %v10416_v63 }
 0xc51   : > { %v5733_v29 = vpop.f32.mrf.mxu0 }
 0xc52   : > { %v5734_v39 = vadd.f32 %v5733_v29, %v5684_v3 }
 0xc53   : > { %v5735_v38 = vpop.f32.mrf.mxu0 }
 0xc54   : > { %v5736_v61 = vadd.f32 %v5735_v38, %v5684_v3  ;;  %v5742_v30 = vmul.f32 0.01, %v5734_v39  ;;  %v5940_v3 = vld [vmem:[#allocation14] sm:$0x1]  ;;  %v5945_v38 = vpop.permute.xlu1 %5944 }
 0xc55   : > { %v5737_v62 = vpop.f32.mrf.mxu0 }
 0xc56   : > { %v5738_v43 = vadd.f32 %v5737_v62, %v5689_v34  ;;  %v5743_v13 = vmul.f32 0.01, %v5736_v61  ;;  %v5746_v56 = vmax.f32 %v5734_v39, %v5742_v30 }
 0xc57   : > { %v5739_v0 = vpop.f32.mrf.mxu0 }
 0xc58   : > { %v5744_v20 = vmul.f32 0.01, %v5738_v43  ;;  %v5740_v59 = vadd.f32 %v5739_v0, %v5689_v34  ;;  %v5747_v46 = vmax.f32 %v5736_v61, %v5743_v13  ;;  %v7284_v13 = vmov 1966171168  }
 0xc5a   : > { %v5745_v12 = vmul.f32 0.01, %v5740_v59  ;;  %v5748_v31 = vmax.f32 %v5738_v43, %v5744_v20  ;;  %v6009_v20 = vunpack.c.l.s4 %v7284_v13 }
 0xc5c   : > { %v5749_v44 = vmax.f32 %v5740_v59, %v5745_v12  ;;  %v5750_v7 = vpack.c.bf16 %v5748_v31, %v5746_v56  ;;  %v6011_v59 = vlaneseq  ;;  %v6010_v31 = vunpack.c.0.s8 %v6009_v20 }
 0xc5e   : > { %v5751_v22 = vpack.c.bf16 %v5749_v44, %v5747_v46  ;;  %v6012_v46 = vshrl.u32 %v6011_v59, 7  ;;  %vm6025_vm9 = vcmp.lt.s32.totalorder %v6011_v59, 256 }
 0xc60   : > { %5777 = vmatprep.subr.bf16.mxu1 %v5751_v22 }
 0xc61   : > { %5778 = vmatpush1.bf16.msra.mxu1 %v5750_v7 }
 0xc64   : > { %6450 = vmatmul.mubr.msk.bf16.vlgmr.msra.gmra.mxu1 %vm5759_vm2, %v5752_v16  ;;  %v6013_v16 = vsub.s32 %v6010_v31, %v6012_v46 }
 0xc65   : > { %5925 = vmatprep.mubr.bf16.mxu1 %v10416_v63 }
 0xd24   : > { %v5797_v9 = vpop.f32.mrf.mxu1 }
 0xd25   : > { %v5798_v26 = vadd.f32 %v5797_v9, %v5757_v27 }
 0xd26   : > { %v5799_v24 = vpop.f32.mrf.mxu1 }
 0xd27   : > { %v5804_v35 = vmul.f32 0.01, %v5798_v26  ;;  %v5800_v17 = vadd.f32 %v5799_v24, %v5757_v27 }
 0xd28   : > { %v5801_v40 = vpop.f32.mrf.mxu1 }
 0xd29   : > { %v5806_v14 = vmax.f32 %v5798_v26, %v5804_v35  ;;  %v5805_v2 = vmul.f32 0.01, %v5800_v17 }
 0xd2a   : > { %v5802_v55 = vpop.f32.mrf.mxu1 }
 0xd2b   : > { %v5808_v49 = vpack.c.bf16 %v5806_v14, %v5806_v14  ;;  %v5807_v45 = vmax.f32 %v5800_v17, %v5805_v2 }
 0xd2d   : > { %v5809_v32 = vpack.c.bf16 %v5807_v45, %v5807_v45  ;;  %v5823_v23 = vsel %vm5821_vm3, %v5808_v49, 0 }
 0xd2f   : > { %6451 = vmatprep.subr.msk.bf16.mxu0 %vm5821_vm3, %v5809_v32 }
 0xd30   : > { %5843 = vmatpush1.bf16.msra.mxu0 %v5823_v23 }
 0xd33   : > { %6452 = vmatmul.mubr.msk.bf16.vlgmr.msra.gmra.mxu0 %vm5817_vm4, %v5810_v60 }
 0xd34   : > { %5990 = vmatprep.mubr.bf16.mxu0 %v10416_v63  ;;  %v5875_v63 = vld [vmem:[%s10012_s13] sm:$0x1] }
 0xdf3   : > { %v5862_v37 = vpop.f32.mrf.mxu0 }
 0xdf4   : > { %v5863_v47 = vadd.f32 %v5862_v37, %v5815_v41 }
 0xdf5   : > { %v5864_v6 = vpop.f32.mrf.mxu0 }
 0xdf6   : > { %v5869_v1 = vmul.f32 0.01, %v5863_v47  ;;  %v5865_v54 = vadd.f32 %v5864_v6, %v5815_v41 }
 0xdf7   : > { %v5866_v42 = vpop.f32.mrf.mxu0 }
 0xdf8   : > { %v5871_v19 = vmax.f32 %v5863_v47, %v5869_v1  ;;  %v5870_v15 = vmul.f32 0.01, %v5865_v54 }
 0xdf9   : > { %v5867_v52 = vpop.f32.mrf.mxu0 }
 0xdfa   : > { %v5873_v58 = vpack.c.bf16 %v5871_v19, %v5871_v19  ;;  %v5872_v48 = vmax.f32 %v5865_v54, %v5870_v15 }
 0xdfc   : > { %v5874_v10 = vpack.c.bf16 %v5872_v48, %v5872_v48  ;;  %v5888_v5 = vsel %vm5886_vm5, %v5873_v58, 0 }
 0xdfe   : > { %6453 = vmatprep.subr.msk.bf16.mxu1 %vm5886_vm5, %v5874_v10 }
 0xdff   : > { %5908 = vmatpush1.bf16.msra.mxu1 %v5888_v5 }
 0xe02   : > { %6454 = vmatmul.mubr.msk.bf16.vlgmr.msra.gmra.mxu1 %vm5882_vm6, %v5875_v63 }
 0xec2   : > { %v5927_v33 = vpop.f32.mrf.mxu1 }
 0xec3   : > { %v5928_v36 = vadd.f32 %v5927_v33, %v5880_v8 }
 0xec4   : > { %v5929_v57 = vpop.f32.mrf.mxu1 }
 0xec5   : > { %v5934_v53 = vmul.f32 0.01, %v5928_v36  ;;  %v5930_v51 = vadd.f32 %v5929_v57, %v5880_v8 }
 0xec6   : > { %v5931_v28 = vpop.f32.mrf.mxu1 }
 0xec7   : > { %v5936_v11 = vmax.f32 %v5928_v36, %v5934_v53  ;;  %v5935_v25 = vmul.f32 0.01, %v5930_v51 }
 0xec8   : > { %v5932_v18 = vpop.f32.mrf.mxu1 }
 0xec9   : > { %v5938_v4 = vpack.c.bf16 %v5936_v11, %v5936_v11  ;;  %v5937_v21 = vmax.f32 %v5930_v51, %v5935_v25 }
 0xecb   : > { %v5939_v50 = vpack.c.bf16 %v5937_v21, %v5937_v21  ;;  %v5953_v29 = vsel %vm5951_vm7, %v5938_v4, 0 }
 0xecd   : > { %6455 = vmatprep.subr.msk.bf16.mxu0 %vm5951_vm7, %v5939_v50 }
 0xece   : > { %5973 = vmatpush1.bf16.msra.mxu0 %v5953_v29 }
 0xed1   : > { %6456 = vmatmul.mubr.msk.bf16.vlgmr.msra.gmra.mxu0 %vm5947_vm8, %v5940_v3 }
 0xf91   : > { %v5992_v61 = vpop.f32.mrf.mxu0 }
 0xf92   : > { %v5993_v34 = vadd.f32 %v5992_v61, %v5945_v38 }
 0xf93   : > { %v5994_v39 = vpop.f32.mrf.mxu0 }
 0xf94   : > { %6975 = vtanh.f32 %v5993_v34  ;;  %v5995_v62 = vadd.f32 %v5994_v39, %v5945_v38 }
 0xf95   : > { %v5996_v43 = vpop.f32.mrf.mxu0 }
 0xf96   : > { %6977 = vtanh.f32 %v5995_v62 }
 0xf97   : > { %v5997_v0 = vpop.f32.mrf.mxu0 }
 0xfa1   : > { %v6976_v30 = vpop.eup %6975 }
 0xfa2   : > { %v6001_v12 = vadd.f32 1.0, %v6976_v30 }
 0xfa3   : > { %v6978_v44 = vpop.eup %6977 }
 0xfa4   : > { %v6002_v56 = vadd.f32 1.0, %v6978_v44  ;;  %v6003_v22 = vmul.f32 0.5, %v6001_v12 }
 0xfa6   : > { %v6004_v7 = vmul.f32 0.5, %v6002_v56 }
 0xfa8   : > { %v6007_v27 = vcombine.low %v6003_v22, %v6004_v7 }
 0xfaa   : > { %v6014_v9 = vrot.slane %v6007_v27, %v6013_v16 }
 0xfac   : > { %v6021_v26 = vrot.slane %v6014_v9, %v6013_v16 }
 0xfae   : > { %6027 = vst.msk [vmem:[%s630_s19] sm:$0x3] %vm6025_vm9, %v6021_v26 }
 0xfaf   : > { %7200 = shalt.err (!%p7197_p10)
}
 0xfb0   : > { %s7201_s25 = scalar_lea.hbm %s6041_s29, 32  ;;  %s7205_s24 = scalar_lea.hbm %s10015_s16, 64 }
 0xfb1   : > { %p7202_p12 = scmp.ne.s32.totalorder %s6041_s29, %s7201_s25  ;;  %p7206_p6 = scmp.lt.s32.totalorder %s6041_s29, %s10015_s16 }
 0xfb2   : > { %p7207_p2 = scmp.lt.s32.totalorder %s7205_s24, %s7201_s25 }
 0xfb3   : > { %p7203_p0 = pnand %p7202_p12, %p10417_p7 }
 0xfb4   : > { %p7208_p9 = por %p7207_p2, %p7206_p6 }
 0xfb5   : > { %p7204_p3 = pneg %p7203_p0 }
 0xfb7   : > { %p7209_p4 = pnand %p7208_p9, %p7204_p3 }
 0xfb9   : > { %7212 = shalt.err (!%p7209_p4)
}
 0xfba   : > { %6560 = dma.vmem_to_hbm [thread:$0]  (%p10417_p7), %s6044_s27, 32, %s6041_s29, %s6029_s5  }
 0xfbb PF: > { %s10418_s18 = sld [smem:[#allocation25_spill]] }
 0xfbc   : > { %s10419_s26 = sld [smem:[#allocation23_spill]] }
 0xfbd   : > { %s10420_s3 = sld [smem:[#allocation28_spill]] }
 0xfc1   : > { %p6607_p8 = scmp.ge.s32.totalorder %s10418_s18, 2 }
 0xfc2   : > { %s6055_s17 = sand.u32 1, %s10419_s26  }
 0xfc3   : > { %p10421_p11 = scmp.ne.s32.totalorder %s10420_s3, 0  ;;  %s6056_s28 = scalar_lea.sflag [#allocation4], %s6055_s17 }
 0xfc5   : > { %p6588_p13 = pnand %p6607_p8, %p10421_p11 }
 0xfc7   : > { %p6589_p1 = pneg %p6588_p13 }
 0xfc9   : > { %7250 = dma.done.wait (%p6589_p1), %s6056_s28, 32  }
 0xfca   : > { %7252 = vsyncadd (%p6589_p1), %s6056_s28, 4294967264  ;;  %s10422_s24 = sld [smem:[#allocation26_spill]]  ;;  %s10425_s21 = smov %s7259_s22 }
 0xfcb   : > { %s10423_s20 = sld [smem:[#allocation24_spill]] }
 0xfcc   : > { %s10424_s23 = sld [smem:[#allocation27_spill]] }
 0xfd0   : > { %p31_p5 = scmp.ge.s32.totalorder %s10422_s24, 4  }
 0xfd1   : > { %s10426_s22 = smov %s10423_s20 }
 0xfd2   :  { %33 = sbr.rel (!%p31_p5) target bundleno = 12 (0xc), region = 152 }
 0xfd7   :  { %6061 = vsyncpa [#allocation3], 1 }
 0xfd8   :  { %6063 = vsyncpa [#allocation3 + $0x1], 1 }
 0xfd9   :  { %6064 = vsyncpa [#allocation6], 1 }
 0xfda   :  { %6065 = vsyncpa [#allocation9], 1 }
 0xfdb   :  { %6066 = vsyncpa [#allocation12], 1 }
 0xfdc   :  { %6067 = vsyncpa [#allocation15], 1 }
 0xfdd   :  { %6068 = vsyncpa [#allocation4], 1 }
 0xfde   :  { %6070 = vsyncpa [#allocation4 + $0x1], 1 }

</bundles_post_ra>
